<compile_context>
chip_gen: v6e
topology: v6e:2x2x1
jax: 0.10.0
libtpu: 0.0.40
codegen_flags: <defaults>
</compile_context>

<pallas_src>
import math
import functools

import jax
import jax.numpy as jnp
from jax.experimental import pallas as pl
from jax.experimental.pallas import tpu as pltpu


# ----------------------------- in-kernel helpers -----------------------------

def _layernorm(x, gamma, beta, eps=1e-5):
    # x: (rows, E) f32; gamma/beta: (1, E) f32.  Biased variance, as nn.LayerNorm.
    x = x.astype(jnp.float32)
    mu = jnp.mean(x, axis=-1, keepdims=True)
    var = jnp.mean(jnp.square(x - mu), axis=-1, keepdims=True)
    return (x - mu) * jax.lax.rsqrt(var + eps) * gamma + beta


def _erf(x):
    # Abramowitz & Stegun 7.1.26 rational approximation, |err| <= 1.5e-7.
    # Used instead of jax.lax.erf so the kernel only relies on exp/mul/recip,
    # which are guaranteed to lower in Mosaic (EUP/VPU).
    a1, a2, a3, a4, a5 = 0.254829592, -0.284496736, 1.421413741, -1.453152027, 1.061405429
    p = 0.3275911
    z = jnp.abs(x)
    t = 1.0 / (1.0 + p * z)
    poly = ((((a5 * t + a4) * t + a3) * t + a2) * t + a1) * t
    y = 1.0 - poly * jnp.exp(-z * z)
    return jnp.where(x < 0, -y, y)


def _gelu_exact(x):
    # nn.GELU() default = exact erf-based GELU (to ~1.5e-7 via _erf).
    return 0.5 * x * (1.0 + _erf(x * 0.7071067811865476))


def _mha_core(q, k, v, wo, bo, TB, Lq, Lk, num_heads, cdt):
    """Multi-head attention core.

    q: (TB*Lq, E) f32, already scaled by 1/sqrt(D) (folded into Wq at wrapper time)
    k, v: (TB*Lk, E) f32
    wo: (E, E) pre-transposed (in,out) out-projection in compute dtype, bo: (1, E) f32
    Returns (TB*Lq, E) f32.

    Per-head scores / P@V use TB-batched 3-D einsums (single batch dim -> known-good
    Mosaic lowering).  Head outputs are lane-concatenated and pushed through ONE
    full-K (K=E) out-projection matmul (review fix: no per-head K=D matmuls).
    """
    E = q.shape[-1]
    D = E // num_heads
    approx = jnp.dtype(cdt) != jnp.dtype(jnp.float32)

    q3 = q.astype(cdt).reshape(TB, Lq, E)      # leading-dim reshapes: free
    k3 = k.astype(cdt).reshape(TB, Lk, E)
    v3 = v.astype(cdt).reshape(TB, Lk, E)

    head_outs = []
    for h in range(num_heads):                  # static unroll over heads
        lo = h * D
        qh = q3[:, :, lo:lo + D]
        kh = k3[:, :, lo:lo + D]
        vh = v3[:, :, lo:lo + D]
        s = jnp.einsum('bqd,bkd->bqk', qh, kh,
                       preferred_element_type=jnp.float32)        # (TB, Lq, Lk)
        s = s - jnp.max(s, axis=-1, keepdims=True)
        p = jnp.exp(s)
        # Normalize AFTER P@V (smaller multiply); approx reciprocal -> EUP slot.
        inv = pl.reciprocal(jnp.sum(p, axis=-1, keepdims=True), approx=approx)
        oh = jnp.einsum('bqk,bkd->bqd', p.astype(cdt), vh,
                        preferred_element_type=jnp.float32) * inv  # (TB, Lq, D) f32
        head_outs.append(oh.astype(cdt))

    # Assemble heads along lanes once, then a single full-K out-projection.
    o = jnp.concatenate(head_outs, axis=-1).reshape(TB * Lq, E)     # (rows, E)
    return jnp.dot(o, wo, preferred_element_type=jnp.float32) + bo


# --------------------------------- kernel ------------------------------------

def decoder_kernel(num_heads, compute_dtype,
                   x_ref, mem_ref,
                   n1g_ref, n1b_ref,
                   ca_wq_ref, ca_bq_ref, ca_wkv_ref, ca_bkv_ref, ca_wo_ref, ca_bo_ref,
                   n2g_ref, n2b_ref,
                   sa_wqkv_ref, sa_bqkv_ref, sa_wo_ref, sa_bo_ref,
                   n3g_ref, n3b_ref,
                   w1_ref, b1_ref, w2_ref, b2_ref,
                   o_ref):
    cdt = compute_dtype
    TB, Lq, E = x_ref.shape
    _, Lm, _ = mem_ref.shape

    # Flatten the batch tile into the row dim so all dense ops see (TB*Lq, E).
    x = x_ref[...].astype(jnp.float32).reshape(TB * Lq, E)          # f32 residual stream
    mem = mem_ref[...].reshape(TB * Lm, E).astype(cdt)              # only used as MXU input

    # ---- x = x + cross_attn(norm1(x), memory, memory) ----
    x_ln = _layernorm(x, n1g_ref[...], n1b_ref[...]).astype(cdt)
    q = jnp.dot(x_ln, ca_wq_ref[...], preferred_element_type=jnp.float32) + ca_bq_ref[...]
    kv = jnp.dot(mem, ca_wkv_ref[...], preferred_element_type=jnp.float32) + ca_bkv_ref[...]
    # TODO(synk): for very long memory (e.g. Lm>=4096 at production E) tile the KV axis
    # (second "arbitrary" grid dim / flash-style loop) instead of keeping (TB,Lm,*) resident.
    x = x + _mha_core(q, kv[:, :E], kv[:, E:], ca_wo_ref[...], ca_bo_ref[...],
                      TB, Lq, Lm, num_heads, cdt)

    # ---- x = x + self_attn(norm2(x), norm2(x), norm2(x)) ----
    x_ln = _layernorm(x, n2g_ref[...], n2b_ref[...]).astype(cdt)
    qkv = jnp.dot(x_ln, sa_wqkv_ref[...], preferred_element_type=jnp.float32) + sa_bqkv_ref[...]
    x = x + _mha_core(qkv[:, :E], qkv[:, E:2 * E], qkv[:, 2 * E:],
                      sa_wo_ref[...], sa_bo_ref[...], TB, Lq, Lq, num_heads, cdt)

    # ---- x = x + mlp(norm3(x)) ----
    x_ln = _layernorm(x, n3g_ref[...], n3b_ref[...]).astype(cdt)
    h = _gelu_exact(jnp.dot(x_ln, w1_ref[...], preferred_element_type=jnp.float32) + b1_ref[...])
    x = x + jnp.dot(h.astype(cdt), w2_ref[...], preferred_element_type=jnp.float32) + b2_ref[...]

    o_ref[...] = x.reshape(TB, Lq, E).astype(o_ref.dtype)


# ----------------------- wrapper-side weight preparation ----------------------

_PARAM_ORDER = ["n1_g", "n1_b",
                "ca_wq", "ca_bq", "ca_wkv", "ca_bkv", "ca_wo", "ca_bo",
                "n2_g", "n2_b",
                "sa_wqkv", "sa_bqkv", "sa_wo", "sa_bo",
                "n3_g", "n3_b",
                "mlp_w1", "mlp_b1", "mlp_w2", "mlp_b2"]


def prepare_params(params, num_heads, compute_dtype=jnp.bfloat16):
    """One-time XLA-side repack of PyTorch-layout params into kernel-friendly layout.

    Matmul weights -> (in,out), cast to compute_dtype (bf16 for MXU-native rate).
    Biases / LayerNorm params stay f32 (added / applied in f32 inside the kernel).
    The 1/sqrt(head_dim) softmax scale is folded into Wq / bq.
    """
    E = params["n1_g"].shape[-1]
    D = E // num_heads
    scale = 1.0 / math.sqrt(D)
    f32, cdt = jnp.float32, compute_dtype

    def split(w, b):
        # w: (3E, E) stacked [Wq; Wk; Wv], b: (1, 3E).
        wq, wk, wv = w[:E].T * scale, w[E:2 * E].T, w[2 * E:].T
        bq, bk, bv = b[:, :E] * scale, b[:, E:2 * E], b[:, 2 * E:]
        return wq, bq, wk, bk, wv, bv

    ca_wq, ca_bq, ca_wk, ca_bk, ca_wv, ca_bv = split(params["ca_w"], params["ca_b"])
    sa_wq, sa_bq, sa_wk, sa_bk, sa_wv, sa_bv = split(params["sa_w"], params["sa_b"])

    return {
        "n1_g": params["n1_g"].astype(f32), "n1_b": params["n1_b"].astype(f32),
        "ca_wq": ca_wq.astype(cdt), "ca_bq": ca_bq.astype(f32),
        "ca_wkv": jnp.concatenate([ca_wk, ca_wv], axis=1).astype(cdt),   # (E, 2E) fused K|V
        "ca_bkv": jnp.concatenate([ca_bk, ca_bv], axis=1).astype(f32),
        "ca_wo": params["ca_ow"].T.astype(cdt), "ca_bo": params["ca_ob"].astype(f32),
        "n2_g": params["n2_g"].astype(f32), "n2_b": params["n2_b"].astype(f32),
        "sa_wqkv": jnp.concatenate([sa_wq, sa_wk, sa_wv], axis=1).astype(cdt),  # (E, 3E)
        "sa_bqkv": jnp.concatenate([sa_bq, sa_bk, sa_bv], axis=1).astype(f32),
        "sa_wo": params["sa_ow"].T.astype(cdt), "sa_bo": params["sa_ob"].astype(f32),
        "n3_g": params["n3_g"].astype(f32), "n3_b": params["n3_b"].astype(f32),
        "mlp_w1": params["mlp_w1"].T.astype(cdt), "mlp_b1": params["mlp_b1"].astype(f32),
        "mlp_w2": params["mlp_w2"].T.astype(cdt), "mlp_b2": params["mlp_b2"].astype(f32),
    }


def _pick_batch_tile(B, Lq, target_rows=256):
    """Pick TB so TB*Lq ~ target_rows (MXU M-fill, amortizes ~0.35us/step grid
    overhead) while keeping >=2 grid steps when possible so the "parallel" grid
    axis can shard across v7x's two TensorCores (no effect on v5e/v6e)."""
    divisors = [d for d in range(1, B + 1) if B % d == 0]
    fitting = [d for d in divisors if d * Lq <= target_rows]
    tb = max(fitting) if fitting else 1
    if B // tb < 2 and fitting:
        multi = [d for d in fitting if B // d >= 2]
        if multi:
            tb = max(multi)
    return tb


def _default_vmem_limit():
    # ~96 MiB on v5e/v6e (128 MiB physical VMEM), ~48 MiB on v7x (64 MiB physical).
    try:
        cap = pltpu.get_tpu_info().vmem_capacity_bytes
    except Exception:
        cap = 128 * 1024 * 1024
    return int(min(96 * 1024 * 1024, cap * 3 // 4))


# -------------------------------- wrapper ------------------------------------

def transformer_decoder(x, memory, params, num_heads, *,
                        compute_dtype=jnp.bfloat16, out_dtype=None, batch_tile=None):
    B, Lq, E = x.shape
    _, Lm, _ = memory.shape
    out_dtype = compute_dtype if out_dtype is None else out_dtype

    prepped = prepare_params(params, num_heads, compute_dtype)
    param_arrays = [prepped[k] for k in _PARAM_ORDER]

    x = x.astype(compute_dtype)
    memory = memory.astype(compute_dtype)

    TB = batch_tile if batch_tile is not None else _pick_batch_tile(B, Lq)
    assert B % TB == 0, "batch tile must divide batch"

    def full_spec(a):
        # Whole (small) weight resident in VMEM; constant block index so it is never
        # re-fetched across grid steps.
        # (For production E on v7x, switch these to single-buffered specs to halve
        #  resident weight VMEM.)
        return pl.BlockSpec(a.shape, lambda b: (0,) * a.ndim)

    grid_spec = pltpu.PrefetchScalarGridSpec(
        num_scalar_prefetch=0,
        grid=(B // TB,),
        in_specs=[pl.BlockSpec((TB, Lq, E), lambda b: (b, 0, 0)),
                  pl.BlockSpec((TB, Lm, E), lambda b: (b, 0, 0))]
                 + [full_spec(a) for a in param_arrays],
        out_specs=pl.BlockSpec((TB, Lq, E), lambda b: (b, 0, 0)),
    )

    return pl.pallas_call(
        functools.partial(decoder_kernel, num_heads, compute_dtype),
        out_shape=jax.ShapeDtypeStruct((B, Lq, E), out_dtype),
        grid_spec=grid_spec,
        compiler_params=pltpu.CompilerParams(
            dimension_semantics=("parallel",),        # batch-tile axis shards across TCs
            vmem_limit_bytes=_default_vmem_limit(),
        ),
    )(x, memory, *param_arrays)


# ------------------------- deterministic parameter init ----------------------

def init_params(key, embed_dim, mlp_ratio=4.0):
    # PyTorch storage layout: Linear weight (out, in); in_proj_weight (3E, E).
    E = embed_dim
    H = int(E * mlp_ratio)
    ks = jax.random.split(key, 8)

    def w(k, shape):
        return jax.random.normal(k, shape, jnp.float32) * 0.02

    return {
        "n1_g": jnp.ones((1, E), jnp.float32),  "n1_b": jnp.zeros((1, E), jnp.float32),
        "ca_w": w(ks[0], (3 * E, E)),           "ca_b": w(ks[1], (1, 3 * E)),
        "ca_ow": w(ks[2], (E, E)),              "ca_ob": jnp.zeros((1, E), jnp.float32),
        "n2_g": jnp.ones((1, E), jnp.float32),  "n2_b": jnp.zeros((1, E), jnp.float32),
        "sa_w": w(ks[3], (3 * E, E)),           "sa_b": w(ks[4], (1, 3 * E)),
        "sa_ow": w(ks[5], (E, E)),              "sa_ob": jnp.zeros((1, E), jnp.float32),
        "n3_g": jnp.ones((1, E), jnp.float32),  "n3_b": jnp.zeros((1, E), jnp.float32),
        "mlp_w1": w(ks[6], (H, E)),             "mlp_b1": jnp.zeros((1, H), jnp.float32),
        "mlp_w2": w(ks[7], (E, H)),             "mlp_b2": jnp.zeros((1, E), jnp.float32),
    }


# --------------------------- pure-JAX reference (check) ----------------------

def reference(x, memory, params, num_heads):
    def ln(t, g, b):
        mu = t.mean(-1, keepdims=True)
        var = ((t - mu) ** 2).mean(-1, keepdims=True)
        return (t - mu) / jnp.sqrt(var + 1e-5) * g + b

    def mha(q_in, kv_in, w, b, ow, ob):
        E = q_in.shape[-1]
        D = E // num_heads
        q = q_in @ w[:E].T + b[0, :E]
        k = kv_in @ w[E:2 * E].T + b[0, E:2 * E]
        v = kv_in @ w[2 * E:].T + b[0, 2 * E:]
        Bb, Lq, _ = q.shape
        Lk = k.shape[1]
        q = q.reshape(Bb, Lq, num_heads, D).transpose(0, 2, 1, 3)
        k = k.reshape(Bb, Lk, num_heads, D).transpose(0, 2, 1, 3)
        v = v.reshape(Bb, Lk, num_heads, D).transpose(0, 2, 1, 3)
        s = jnp.einsum('bhqd,bhkd->bhqk', q, k) / math.sqrt(D)
        p = jax.nn.softmax(s, axis=-1)
        o = jnp.einsum('bhqk,bhkd->bhqd', p, v).transpose(0, 2, 1, 3).reshape(Bb, Lq, E)
        return o @ ow.T + ob

    x_ln = ln(x, params["n1_g"], params["n1_b"])
    x = x + mha(x_ln, memory, params["ca_w"], params["ca_b"], params["ca_ow"], params["ca_ob"])
    x_ln = ln(x, params["n2_g"], params["n2_b"])
    x = x + mha(x_ln, x_ln, params["sa_w"], params["sa_b"], params["sa_ow"], params["sa_ob"])
    x_ln = ln(x, params["n3_g"], params["n3_b"])
    h = jax.nn.gelu(x_ln @ params["mlp_w1"].T + params["mlp_b1"], approximate=False)
    m = h @ params["mlp_w2"].T + params["mlp_b2"]
    return x + m


# ----------------------------------- main ------------------------------------

if __name__ == "__main__":
    # E=128 keeps every activation / output store lane-dense; heads=4 -> D=32.
    B, Lq, Lm, E, NUM_HEADS = 2, 8, 8, 128, 4

    key = jax.random.PRNGKey(0)
    k_x, k_mem, k_p = jax.random.split(key, 3)
    x = jax.random.normal(k_x, (B, Lq, E), jnp.float32)
    memory = jax.random.normal(k_mem, (B, Lm, E), jnp.float32)
    params = init_params(k_p, E, mlp_ratio=4.0)

    with jax.default_matmul_precision("highest"):
        ref = jax.block_until_ready(reference(x, memory, params, NUM_HEADS))

    # f32 compute path: tight check of the kernel math (structure / layout bugs).
    out_f32 = jax.block_until_ready(
        transformer_decoder(x, memory, params, NUM_HEADS, compute_dtype=jnp.float32))
    assert out_f32.shape == (B, Lq, E)
    assert jnp.allclose(out_f32, ref, rtol=1e-2, atol=1e-2), "f32 kernel mismatch vs reference"

    # bf16 production path (MXU-native rate, half the HBM/VMEM traffic); f32 accumulation.
    out_bf16 = jax.block_until_ready(transformer_decoder(x, memory, params, NUM_HEADS))
    assert out_bf16.dtype == jnp.bfloat16
    assert jnp.allclose(out_bf16.astype(jnp.float32), ref, rtol=6e-2, atol=6e-2), \
        "bf16 kernel mismatch vs reference"

    # TODO(synk): nn.Dropout is identity here (eval mode); training-mode stochastic
    # dropout (and attention masks, which the reference forward never passes) are not
    # implemented in the kernel.
    print("KERNEL_OK")
</pallas_src>

<mosaic_0001>
module attributes {stable_mosaic.version = 11 : i64} {
  func.func @decoder_kernel(%arg0: i32, %arg1: memref<1x8x128xf32, #tpu.memory_space<vmem>>, %arg2: memref<1x8x128xf32, #tpu.memory_space<vmem>>, %arg3: memref<1x128xf32, #tpu.memory_space<vmem>>, %arg4: memref<1x128xf32, #tpu.memory_space<vmem>>, %arg5: memref<128x128xf32, #tpu.memory_space<vmem>>, %arg6: memref<1x128xf32, #tpu.memory_space<vmem>>, %arg7: memref<128x256xf32, #tpu.memory_space<vmem>>, %arg8: memref<1x256xf32, #tpu.memory_space<vmem>>, %arg9: memref<128x128xf32, #tpu.memory_space<vmem>>, %arg10: memref<1x128xf32, #tpu.memory_space<vmem>>, %arg11: memref<1x128xf32, #tpu.memory_space<vmem>>, %arg12: memref<1x128xf32, #tpu.memory_space<vmem>>, %arg13: memref<128x384xf32, #tpu.memory_space<vmem>>, %arg14: memref<1x384xf32, #tpu.memory_space<vmem>>, %arg15: memref<128x128xf32, #tpu.memory_space<vmem>>, %arg16: memref<1x128xf32, #tpu.memory_space<vmem>>, %arg17: memref<1x128xf32, #tpu.memory_space<vmem>>, %arg18: memref<1x128xf32, #tpu.memory_space<vmem>>, %arg19: memref<128x512xf32, #tpu.memory_space<vmem>>, %arg20: memref<1x512xf32, #tpu.memory_space<vmem>>, %arg21: memref<512x128xf32, #tpu.memory_space<vmem>>, %arg22: memref<1x128xf32, #tpu.memory_space<vmem>>, %arg23: memref<1x8x128xf32, #tpu.memory_space<vmem>>) attributes {dimension_semantics = [#tpu.dimension_semantics<parallel>], iteration_bounds = array<i64: 2>, scalar_prefetch = 0 : i64, scratch_operands = 0 : i64, tpu.core_type = #tpu.core_type<tc>, window_params = [{transform_indices = @transform_0, window_bounds = array<i64: 1, 8, 128>}, {transform_indices = @transform_1, window_bounds = array<i64: 1, 8, 128>}, {pipeline_mode = #tpu.pipeline_mode<synchronous>, transform_indices = @transform_2, window_bounds = array<i64: 1, 128>}, {pipeline_mode = #tpu.pipeline_mode<synchronous>, transform_indices = @transform_3, window_bounds = array<i64: 1, 128>}, {pipeline_mode = #tpu.pipeline_mode<synchronous>, transform_indices = @transform_4, window_bounds = array<i64: 128, 128>}, {pipeline_mode = #tpu.pipeline_mode<synchronous>, transform_indices = @transform_5, window_bounds = array<i64: 1, 128>}, {pipeline_mode = #tpu.pipeline_mode<synchronous>, transform_indices = @transform_6, window_bounds = array<i64: 128, 256>}, {pipeline_mode = #tpu.pipeline_mode<synchronous>, transform_indices = @transform_7, window_bounds = array<i64: 1, 256>}, {pipeline_mode = #tpu.pipeline_mode<synchronous>, transform_indices = @transform_8, window_bounds = array<i64: 128, 128>}, {pipeline_mode = #tpu.pipeline_mode<synchronous>, transform_indices = @transform_9, window_bounds = array<i64: 1, 128>}, {pipeline_mode = #tpu.pipeline_mode<synchronous>, transform_indices = @transform_10, window_bounds = array<i64: 1, 128>}, {pipeline_mode = #tpu.pipeline_mode<synchronous>, transform_indices = @transform_11, window_bounds = array<i64: 1, 128>}, {pipeline_mode = #tpu.pipeline_mode<synchronous>, transform_indices = @transform_12, window_bounds = array<i64: 128, 384>}, {pipeline_mode = #tpu.pipeline_mode<synchronous>, transform_indices = @transform_13, window_bounds = array<i64: 1, 384>}, {pipeline_mode = #tpu.pipeline_mode<synchronous>, transform_indices = @transform_14, window_bounds = array<i64: 128, 128>}, {pipeline_mode = #tpu.pipeline_mode<synchronous>, transform_indices = @transform_15, window_bounds = array<i64: 1, 128>}, {pipeline_mode = #tpu.pipeline_mode<synchronous>, transform_indices = @transform_16, window_bounds = array<i64: 1, 128>}, {pipeline_mode = #tpu.pipeline_mode<synchronous>, transform_indices = @transform_17, window_bounds = array<i64: 1, 128>}, {pipeline_mode = #tpu.pipeline_mode<synchronous>, transform_indices = @transform_18, window_bounds = array<i64: 128, 512>}, {pipeline_mode = #tpu.pipeline_mode<synchronous>, transform_indices = @transform_19, window_bounds = array<i64: 1, 512>}, {pipeline_mode = #tpu.pipeline_mode<synchronous>, transform_indices = @transform_20, window_bounds = array<i64: 512, 128>}, {pipeline_mode = #tpu.pipeline_mode<synchronous>, transform_indices = @transform_21, window_bounds = array<i64: 1, 128>}, {transform_indices = @transform_22, window_bounds = array<i64: 1, 8, 128>}]} {
    %c0 = arith.constant 0 : index
    %c0_0 = arith.constant 0 : index
    %c0_1 = arith.constant 0 : index
    %0 = vector.load %arg1[%c0, %c0_0, %c0_1] : memref<1x8x128xf32, #tpu.memory_space<vmem>>, vector<1x8x128xf32>
    %1 = vector.shape_cast %0 : vector<1x8x128xf32> to vector<8x128xf32>
    %c0_2 = arith.constant 0 : index
    %c0_3 = arith.constant 0 : index
    %c0_4 = arith.constant 0 : index
    %2 = vector.load %arg2[%c0_2, %c0_3, %c0_4] : memref<1x8x128xf32, #tpu.memory_space<vmem>>, vector<1x8x128xf32>
    %3 = vector.shape_cast %2 : vector<1x8x128xf32> to vector<8x128xf32>
    %c0_5 = arith.constant 0 : index
    %c0_6 = arith.constant 0 : index
    %4 = vector.load %arg3[%c0_5, %c0_6] : memref<1x128xf32, #tpu.memory_space<vmem>>, vector<1x128xf32>
    %c0_7 = arith.constant 0 : index
    %c0_8 = arith.constant 0 : index
    %5 = vector.load %arg4[%c0_7, %c0_8] : memref<1x128xf32, #tpu.memory_space<vmem>>, vector<1x128xf32>
    %cst = arith.constant dense<0.000000e+00> : vector<8xf32>
    %6 = vector.multi_reduction <add>, %1, %cst [1] : vector<8x128xf32> to vector<8xf32>
    %7 = vector.shape_cast %6 : vector<8xf32> to vector<8x1xf32>
    %cst_9 = arith.constant 1.280000e+02 : f32
    %8 = vector.broadcast %cst_9 : f32 to vector<8x1xf32>
    %9 = arith.divf %7, %8 : vector<8x1xf32>
    %10 = vector.broadcast %9 : vector<8x1xf32> to vector<8x128xf32>
    %11 = arith.subf %1, %10 : vector<8x128xf32>
    %12 = arith.mulf %11, %11 : vector<8x128xf32>
    %cst_10 = arith.constant dense<0.000000e+00> : vector<8xf32>
    %13 = vector.multi_reduction <add>, %12, %cst_10 [1] : vector<8x128xf32> to vector<8xf32>
    %14 = vector.shape_cast %13 : vector<8xf32> to vector<8x1xf32>
    %cst_11 = arith.constant 1.280000e+02 : f32
    %15 = vector.broadcast %cst_11 : f32 to vector<8x1xf32>
    %16 = arith.divf %14, %15 : vector<8x1xf32>
    %17 = vector.broadcast %9 : vector<8x1xf32> to vector<8x128xf32>
    %18 = arith.subf %1, %17 : vector<8x128xf32>
    %cst_12 = arith.constant 9.99999974E-6 : f32
    %19 = vector.broadcast %cst_12 : f32 to vector<8x1xf32>
    %20 = arith.addf %16, %19 : vector<8x1xf32>
    %21 = math.rsqrt %20 : vector<8x1xf32>
    %22 = vector.broadcast %21 : vector<8x1xf32> to vector<8x128xf32>
    %23 = arith.mulf %18, %22 : vector<8x128xf32>
    %24 = vector.broadcast %4 : vector<1x128xf32> to vector<8x128xf32>
    %25 = arith.mulf %23, %24 : vector<8x128xf32>
    %26 = vector.broadcast %5 : vector<1x128xf32> to vector<8x128xf32>
    %27 = arith.addf %25, %26 : vector<8x128xf32>
    %c0_13 = arith.constant 0 : index
    %c0_14 = arith.constant 0 : index
    %28 = vector.load %arg5[%c0_13, %c0_14] : memref<128x128xf32, #tpu.memory_space<vmem>>, vector<128x128xf32>
    %cst_15 = arith.constant dense<0.000000e+00> : vector<8x128xf32>
    %29 = tpu.matmul %27, %28, %cst_15 {dimension_numbers = #tpu.dot_dimension_numbers<[1], [0], [0], [1], [0, 0, 1, 1], [], []>} : vector<8x128xf32>, vector<128x128xf32>, vector<8x128xf32> -> vector<8x128xf32>
    %c0_16 = arith.constant 0 : index
    %c0_17 = arith.constant 0 : index
    %30 = vector.load %arg6[%c0_16, %c0_17] : memref<1x128xf32, #tpu.memory_space<vmem>>, vector<1x128xf32>
    %31 = vector.broadcast %30 : vector<1x128xf32> to vector<8x128xf32>
    %32 = arith.addf %29, %31 : vector<8x128xf32>
    %c0_18 = arith.constant 0 : index
    %c0_19 = arith.constant 0 : index
    %33 = vector.load %arg7[%c0_18, %c0_19] : memref<128x256xf32, #tpu.memory_space<vmem>>, vector<128x256xf32>
    %cst_20 = arith.constant dense<0.000000e+00> : vector<8x256xf32>
    %34 = tpu.matmul %3, %33, %cst_20 {dimension_numbers = #tpu.dot_dimension_numbers<[1], [0], [0], [1], [0, 0, 1, 1], [], []>} : vector<8x128xf32>, vector<128x256xf32>, vector<8x256xf32> -> vector<8x256xf32>
    %c0_21 = arith.constant 0 : index
    %c0_22 = arith.constant 0 : index
    %35 = vector.load %arg8[%c0_21, %c0_22] : memref<1x256xf32, #tpu.memory_space<vmem>>, vector<1x256xf32>
    %36 = vector.broadcast %35 : vector<1x256xf32> to vector<8x256xf32>
    %37 = arith.addf %34, %36 : vector<8x256xf32>
    %38 = vector.extract_strided_slice %37 {offsets = [0, 0], sizes = [8, 128], strides = [1, 1]} : vector<8x256xf32> to vector<8x128xf32>
    %39 = vector.extract_strided_slice %37 {offsets = [0, 128], sizes = [8, 128], strides = [1, 1]} : vector<8x256xf32> to vector<8x128xf32>
    %c0_23 = arith.constant 0 : index
    %c0_24 = arith.constant 0 : index
    %40 = vector.load %arg9[%c0_23, %c0_24] : memref<128x128xf32, #tpu.memory_space<vmem>>, vector<128x128xf32>
    %c0_25 = arith.constant 0 : index
    %c0_26 = arith.constant 0 : index
    %41 = vector.load %arg10[%c0_25, %c0_26] : memref<1x128xf32, #tpu.memory_space<vmem>>, vector<1x128xf32>
    %42 = vector.shape_cast %32 : vector<8x128xf32> to vector<1x8x128xf32>
    %43 = vector.shape_cast %38 : vector<8x128xf32> to vector<1x8x128xf32>
    %44 = vector.shape_cast %39 : vector<8x128xf32> to vector<1x8x128xf32>
    %45 = vector.extract_strided_slice %42 {offsets = [0, 0, 0], sizes = [1, 8, 32], strides = [1, 1, 1]} : vector<1x8x128xf32> to vector<1x8x32xf32>
    %46 = vector.extract_strided_slice %43 {offsets = [0, 0, 0], sizes = [1, 8, 32], strides = [1, 1, 1]} : vector<1x8x128xf32> to vector<1x8x32xf32>
    %47 = vector.extract_strided_slice %44 {offsets = [0, 0, 0], sizes = [1, 8, 32], strides = [1, 1, 1]} : vector<1x8x128xf32> to vector<1x8x32xf32>
    "tpu.trace_start"() <{level = 10 : i32, message = "bqd,bkd->bqk"}> : () -> ()
    %cst_27 = arith.constant dense<0.000000e+00> : vector<1x8x8xf32>
    %48 = tpu.matmul %45, %46, %cst_27 {dimension_numbers = #tpu.dot_dimension_numbers<[2], [2], [1], [1], [0, 0, 0, 1, 1, 1], [0], [0]>} : vector<1x8x32xf32>, vector<1x8x32xf32>, vector<1x8x8xf32> -> vector<1x8x8xf32>
    "tpu.trace_stop"() : () -> ()
    %cst_28 = arith.constant dense<0xFF800000> : vector<1x8xf32>
    %49 = vector.multi_reduction <maximumf>, %48, %cst_28 [2] : vector<1x8x8xf32> to vector<1x8xf32>
    %50 = vector.shape_cast %49 : vector<1x8xf32> to vector<1x8x1xf32>
    %51 = vector.broadcast %50 : vector<1x8x1xf32> to vector<1x8x8xf32>
    %52 = arith.subf %48, %51 : vector<1x8x8xf32>
    %53 = math.exp %52 : vector<1x8x8xf32>
    %cst_29 = arith.constant dense<0.000000e+00> : vector<1x8xf32>
    %54 = vector.multi_reduction <add>, %53, %cst_29 [2] : vector<1x8x8xf32> to vector<1x8xf32>
    %55 = vector.shape_cast %54 : vector<1x8xf32> to vector<1x8x1xf32>
    %56 = tpu.reciprocal %55 : vector<1x8x1xf32> -> vector<1x8x1xf32>
    "tpu.trace_start"() <{level = 10 : i32, message = "bqk,bkd->bqd"}> : () -> ()
    %cst_30 = arith.constant dense<0.000000e+00> : vector<1x8x32xf32>
    %57 = tpu.matmul %53, %47, %cst_30 {dimension_numbers = #tpu.dot_dimension_numbers<[2], [1], [1], [2], [0, 0, 0, 1, 1, 2], [0], [0]>} : vector<1x8x8xf32>, vector<1x8x32xf32>, vector<1x8x32xf32> -> vector<1x8x32xf32>
    "tpu.trace_stop"() : () -> ()
    %58 = vector.broadcast %56 : vector<1x8x1xf32> to vector<1x8x32xf32>
    %59 = arith.mulf %57, %58 : vector<1x8x32xf32>
    %60 = vector.extract_strided_slice %42 {offsets = [0, 0, 32], sizes = [1, 8, 32], strides = [1, 1, 1]} : vector<1x8x128xf32> to vector<1x8x32xf32>
    %61 = vector.extract_strided_slice %43 {offsets = [0, 0, 32], sizes = [1, 8, 32], strides = [1, 1, 1]} : vector<1x8x128xf32> to vector<1x8x32xf32>
    %62 = vector.extract_strided_slice %44 {offsets = [0, 0, 32], sizes = [1, 8, 32], strides = [1, 1, 1]} : vector<1x8x128xf32> to vector<1x8x32xf32>
    "tpu.trace_start"() <{level = 10 : i32, message = "bqd,bkd->bqk"}> : () -> ()
    %cst_31 = arith.constant dense<0.000000e+00> : vector<1x8x8xf32>
    %63 = tpu.matmul %60, %61, %cst_31 {dimension_numbers = #tpu.dot_dimension_numbers<[2], [2], [1], [1], [0, 0, 0, 1, 1, 1], [0], [0]>} : vector<1x8x32xf32>, vector<1x8x32xf32>, vector<1x8x8xf32> -> vector<1x8x8xf32>
    "tpu.trace_stop"() : () -> ()
    %cst_32 = arith.constant dense<0xFF800000> : vector<1x8xf32>
    %64 = vector.multi_reduction <maximumf>, %63, %cst_32 [2] : vector<1x8x8xf32> to vector<1x8xf32>
    %65 = vector.shape_cast %64 : vector<1x8xf32> to vector<1x8x1xf32>
    %66 = vector.broadcast %65 : vector<1x8x1xf32> to vector<1x8x8xf32>
    %67 = arith.subf %63, %66 : vector<1x8x8xf32>
    %68 = math.exp %67 : vector<1x8x8xf32>
    %cst_33 = arith.constant dense<0.000000e+00> : vector<1x8xf32>
    %69 = vector.multi_reduction <add>, %68, %cst_33 [2] : vector<1x8x8xf32> to vector<1x8xf32>
    %70 = vector.shape_cast %69 : vector<1x8xf32> to vector<1x8x1xf32>
    %71 = tpu.reciprocal %70 : vector<1x8x1xf32> -> vector<1x8x1xf32>
    "tpu.trace_start"() <{level = 10 : i32, message = "bqk,bkd->bqd"}> : () -> ()
    %cst_34 = arith.constant dense<0.000000e+00> : vector<1x8x32xf32>
    %72 = tpu.matmul %68, %62, %cst_34 {dimension_numbers = #tpu.dot_dimension_numbers<[2], [1], [1], [2], [0, 0, 0, 1, 1, 2], [0], [0]>} : vector<1x8x8xf32>, vector<1x8x32xf32>, vector<1x8x32xf32> -> vector<1x8x32xf32>
    "tpu.trace_stop"() : () -> ()
    %73 = vector.broadcast %71 : vector<1x8x1xf32> to vector<1x8x32xf32>
    %74 = arith.mulf %72, %73 : vector<1x8x32xf32>
    %75 = vector.extract_strided_slice %42 {offsets = [0, 0, 64], sizes = [1, 8, 32], strides = [1, 1, 1]} : vector<1x8x128xf32> to vector<1x8x32xf32>
    %76 = vector.extract_strided_slice %43 {offsets = [0, 0, 64], sizes = [1, 8, 32], strides = [1, 1, 1]} : vector<1x8x128xf32> to vector<1x8x32xf32>
    %77 = vector.extract_strided_slice %44 {offsets = [0, 0, 64], sizes = [1, 8, 32], strides = [1, 1, 1]} : vector<1x8x128xf32> to vector<1x8x32xf32>
    "tpu.trace_start"() <{level = 10 : i32, message = "bqd,bkd->bqk"}> : () -> ()
    %cst_35 = arith.constant dense<0.000000e+00> : vector<1x8x8xf32>
    %78 = tpu.matmul %75, %76, %cst_35 {dimension_numbers = #tpu.dot_dimension_numbers<[2], [2], [1], [1], [0, 0, 0, 1, 1, 1], [0], [0]>} : vector<1x8x32xf32>, vector<1x8x32xf32>, vector<1x8x8xf32> -> vector<1x8x8xf32>
    "tpu.trace_stop"() : () -> ()
    %cst_36 = arith.constant dense<0xFF800000> : vector<1x8xf32>
    %79 = vector.multi_reduction <maximumf>, %78, %cst_36 [2] : vector<1x8x8xf32> to vector<1x8xf32>
    %80 = vector.shape_cast %79 : vector<1x8xf32> to vector<1x8x1xf32>
    %81 = vector.broadcast %80 : vector<1x8x1xf32> to vector<1x8x8xf32>
    %82 = arith.subf %78, %81 : vector<1x8x8xf32>
    %83 = math.exp %82 : vector<1x8x8xf32>
    %cst_37 = arith.constant dense<0.000000e+00> : vector<1x8xf32>
    %84 = vector.multi_reduction <add>, %83, %cst_37 [2] : vector<1x8x8xf32> to vector<1x8xf32>
    %85 = vector.shape_cast %84 : vector<1x8xf32> to vector<1x8x1xf32>
    %86 = tpu.reciprocal %85 : vector<1x8x1xf32> -> vector<1x8x1xf32>
    "tpu.trace_start"() <{level = 10 : i32, message = "bqk,bkd->bqd"}> : () -> ()
    %cst_38 = arith.constant dense<0.000000e+00> : vector<1x8x32xf32>
    %87 = tpu.matmul %83, %77, %cst_38 {dimension_numbers = #tpu.dot_dimension_numbers<[2], [1], [1], [2], [0, 0, 0, 1, 1, 2], [0], [0]>} : vector<1x8x8xf32>, vector<1x8x32xf32>, vector<1x8x32xf32> -> vector<1x8x32xf32>
    "tpu.trace_stop"() : () -> ()
    %88 = vector.broadcast %86 : vector<1x8x1xf32> to vector<1x8x32xf32>
    %89 = arith.mulf %87, %88 : vector<1x8x32xf32>
    %90 = vector.extract_strided_slice %42 {offsets = [0, 0, 96], sizes = [1, 8, 32], strides = [1, 1, 1]} : vector<1x8x128xf32> to vector<1x8x32xf32>
    %91 = vector.extract_strided_slice %43 {offsets = [0, 0, 96], sizes = [1, 8, 32], strides = [1, 1, 1]} : vector<1x8x128xf32> to vector<1x8x32xf32>
    %92 = vector.extract_strided_slice %44 {offsets = [0, 0, 96], sizes = [1, 8, 32], strides = [1, 1, 1]} : vector<1x8x128xf32> to vector<1x8x32xf32>
    "tpu.trace_start"() <{level = 10 : i32, message = "bqd,bkd->bqk"}> : () -> ()
    %cst_39 = arith.constant dense<0.000000e+00> : vector<1x8x8xf32>
    %93 = tpu.matmul %90, %91, %cst_39 {dimension_numbers = #tpu.dot_dimension_numbers<[2], [2], [1], [1], [0, 0, 0, 1, 1, 1], [0], [0]>} : vector<1x8x32xf32>, vector<1x8x32xf32>, vector<1x8x8xf32> -> vector<1x8x8xf32>
    "tpu.trace_stop"() : () -> ()
    %cst_40 = arith.constant dense<0xFF800000> : vector<1x8xf32>
    %94 = vector.multi_reduction <maximumf>, %93, %cst_40 [2] : vector<1x8x8xf32> to vector<1x8xf32>
    %95 = vector.shape_cast %94 : vector<1x8xf32> to vector<1x8x1xf32>
    %96 = vector.broadcast %95 : vector<1x8x1xf32> to vector<1x8x8xf32>
    %97 = arith.subf %93, %96 : vector<1x8x8xf32>
    %98 = math.exp %97 : vector<1x8x8xf32>
    %cst_41 = arith.constant dense<0.000000e+00> : vector<1x8xf32>
    %99 = vector.multi_reduction <add>, %98, %cst_41 [2] : vector<1x8x8xf32> to vector<1x8xf32>
    %100 = vector.shape_cast %99 : vector<1x8xf32> to vector<1x8x1xf32>
    %101 = tpu.reciprocal %100 : vector<1x8x1xf32> -> vector<1x8x1xf32>
    "tpu.trace_start"() <{level = 10 : i32, message = "bqk,bkd->bqd"}> : () -> ()
    %cst_42 = arith.constant dense<0.000000e+00> : vector<1x8x32xf32>
    %102 = tpu.matmul %98, %92, %cst_42 {dimension_numbers = #tpu.dot_dimension_numbers<[2], [1], [1], [2], [0, 0, 0, 1, 1, 2], [0], [0]>} : vector<1x8x8xf32>, vector<1x8x32xf32>, vector<1x8x32xf32> -> vector<1x8x32xf32>
    "tpu.trace_stop"() : () -> ()
    %103 = vector.broadcast %101 : vector<1x8x1xf32> to vector<1x8x32xf32>
    %104 = arith.mulf %102, %103 : vector<1x8x32xf32>
    %105 = tpu.concatenate %59, %74, %89, %104 in 2 : vector<1x8x32xf32>, vector<1x8x32xf32>, vector<1x8x32xf32>, vector<1x8x32xf32> -> vector<1x8x128xf32>
    %106 = vector.shape_cast %105 : vector<1x8x128xf32> to vector<8x128xf32>
    %cst_43 = arith.constant dense<0.000000e+00> : vector<8x128xf32>
    %107 = tpu.matmul %106, %40, %cst_43 {dimension_numbers = #tpu.dot_dimension_numbers<[1], [0], [0], [1], [0, 0, 1, 1], [], []>} : vector<8x128xf32>, vector<128x128xf32>, vector<8x128xf32> -> vector<8x128xf32>
    %108 = vector.broadcast %41 : vector<1x128xf32> to vector<8x128xf32>
    %109 = arith.addf %107, %108 : vector<8x128xf32>
    %110 = arith.addf %1, %109 : vector<8x128xf32>
    %c0_44 = arith.constant 0 : index
    %c0_45 = arith.constant 0 : index
    %111 = vector.load %arg11[%c0_44, %c0_45] : memref<1x128xf32, #tpu.memory_space<vmem>>, vector<1x128xf32>
    %c0_46 = arith.constant 0 : index
    %c0_47 = arith.constant 0 : index
    %112 = vector.load %arg12[%c0_46, %c0_47] : memref<1x128xf32, #tpu.memory_space<vmem>>, vector<1x128xf32>
    %cst_48 = arith.constant dense<0.000000e+00> : vector<8xf32>
    %113 = vector.multi_reduction <add>, %110, %cst_48 [1] : vector<8x128xf32> to vector<8xf32>
    %114 = vector.shape_cast %113 : vector<8xf32> to vector<8x1xf32>
    %cst_49 = arith.constant 1.280000e+02 : f32
    %115 = vector.broadcast %cst_49 : f32 to vector<8x1xf32>
    %116 = arith.divf %114, %115 : vector<8x1xf32>
    %117 = vector.broadcast %116 : vector<8x1xf32> to vector<8x128xf32>
    %118 = arith.subf %110, %117 : vector<8x128xf32>
    %119 = arith.mulf %118, %118 : vector<8x128xf32>
    %cst_50 = arith.constant dense<0.000000e+00> : vector<8xf32>
    %120 = vector.multi_reduction <add>, %119, %cst_50 [1] : vector<8x128xf32> to vector<8xf32>
    %121 = vector.shape_cast %120 : vector<8xf32> to vector<8x1xf32>
    %cst_51 = arith.constant 1.280000e+02 : f32
    %122 = vector.broadcast %cst_51 : f32 to vector<8x1xf32>
    %123 = arith.divf %121, %122 : vector<8x1xf32>
    %124 = vector.broadcast %116 : vector<8x1xf32> to vector<8x128xf32>
    %125 = arith.subf %110, %124 : vector<8x128xf32>
    %cst_52 = arith.constant 9.99999974E-6 : f32
    %126 = vector.broadcast %cst_52 : f32 to vector<8x1xf32>
    %127 = arith.addf %123, %126 : vector<8x1xf32>
    %128 = math.rsqrt %127 : vector<8x1xf32>
    %129 = vector.broadcast %128 : vector<8x1xf32> to vector<8x128xf32>
    %130 = arith.mulf %125, %129 : vector<8x128xf32>
    %131 = vector.broadcast %111 : vector<1x128xf32> to vector<8x128xf32>
    %132 = arith.mulf %130, %131 : vector<8x128xf32>
    %133 = vector.broadcast %112 : vector<1x128xf32> to vector<8x128xf32>
    %134 = arith.addf %132, %133 : vector<8x128xf32>
    %c0_53 = arith.constant 0 : index
    %c0_54 = arith.constant 0 : index
    %135 = vector.load %arg13[%c0_53, %c0_54] : memref<128x384xf32, #tpu.memory_space<vmem>>, vector<128x384xf32>
    %cst_55 = arith.constant dense<0.000000e+00> : vector<8x384xf32>
    %136 = tpu.matmul %134, %135, %cst_55 {dimension_numbers = #tpu.dot_dimension_numbers<[1], [0], [0], [1], [0, 0, 1, 1], [], []>} : vector<8x128xf32>, vector<128x384xf32>, vector<8x384xf32> -> vector<8x384xf32>
    %c0_56 = arith.constant 0 : index
    %c0_57 = arith.constant 0 : index
    %137 = vector.load %arg14[%c0_56, %c0_57] : memref<1x384xf32, #tpu.memory_space<vmem>>, vector<1x384xf32>
    %138 = vector.broadcast %137 : vector<1x384xf32> to vector<8x384xf32>
    %139 = arith.addf %136, %138 : vector<8x384xf32>
    %140 = vector.extract_strided_slice %139 {offsets = [0, 0], sizes = [8, 128], strides = [1, 1]} : vector<8x384xf32> to vector<8x128xf32>
    %141 = vector.extract_strided_slice %139 {offsets = [0, 128], sizes = [8, 128], strides = [1, 1]} : vector<8x384xf32> to vector<8x128xf32>
    %142 = vector.extract_strided_slice %139 {offsets = [0, 256], sizes = [8, 128], strides = [1, 1]} : vector<8x384xf32> to vector<8x128xf32>
    %c0_58 = arith.constant 0 : index
    %c0_59 = arith.constant 0 : index
    %143 = vector.load %arg15[%c0_58, %c0_59] : memref<128x128xf32, #tpu.memory_space<vmem>>, vector<128x128xf32>
    %c0_60 = arith.constant 0 : index
    %c0_61 = arith.constant 0 : index
    %144 = vector.load %arg16[%c0_60, %c0_61] : memref<1x128xf32, #tpu.memory_space<vmem>>, vector<1x128xf32>
    %145 = vector.shape_cast %140 : vector<8x128xf32> to vector<1x8x128xf32>
    %146 = vector.shape_cast %141 : vector<8x128xf32> to vector<1x8x128xf32>
    %147 = vector.shape_cast %142 : vector<8x128xf32> to vector<1x8x128xf32>
    %148 = vector.extract_strided_slice %145 {offsets = [0, 0, 0], sizes = [1, 8, 32], strides = [1, 1, 1]} : vector<1x8x128xf32> to vector<1x8x32xf32>
    %149 = vector.extract_strided_slice %146 {offsets = [0, 0, 0], sizes = [1, 8, 32], strides = [1, 1, 1]} : vector<1x8x128xf32> to vector<1x8x32xf32>
    %150 = vector.extract_strided_slice %147 {offsets = [0, 0, 0], sizes = [1, 8, 32], strides = [1, 1, 1]} : vector<1x8x128xf32> to vector<1x8x32xf32>
    "tpu.trace_start"() <{level = 10 : i32, message = "bqd,bkd->bqk"}> : () -> ()
    %cst_62 = arith.constant dense<0.000000e+00> : vector<1x8x8xf32>
    %151 = tpu.matmul %148, %149, %cst_62 {dimension_numbers = #tpu.dot_dimension_numbers<[2], [2], [1], [1], [0, 0, 0, 1, 1, 1], [0], [0]>} : vector<1x8x32xf32>, vector<1x8x32xf32>, vector<1x8x8xf32> -> vector<1x8x8xf32>
    "tpu.trace_stop"() : () -> ()
    %cst_63 = arith.constant dense<0xFF800000> : vector<1x8xf32>
    %152 = vector.multi_reduction <maximumf>, %151, %cst_63 [2] : vector<1x8x8xf32> to vector<1x8xf32>
    %153 = vector.shape_cast %152 : vector<1x8xf32> to vector<1x8x1xf32>
    %154 = vector.broadcast %153 : vector<1x8x1xf32> to vector<1x8x8xf32>
    %155 = arith.subf %151, %154 : vector<1x8x8xf32>
    %156 = math.exp %155 : vector<1x8x8xf32>
    %cst_64 = arith.constant dense<0.000000e+00> : vector<1x8xf32>
    %157 = vector.multi_reduction <add>, %156, %cst_64 [2] : vector<1x8x8xf32> to vector<1x8xf32>
    %158 = vector.shape_cast %157 : vector<1x8xf32> to vector<1x8x1xf32>
    %159 = tpu.reciprocal %158 : vector<1x8x1xf32> -> vector<1x8x1xf32>
    "tpu.trace_start"() <{level = 10 : i32, message = "bqk,bkd->bqd"}> : () -> ()
    %cst_65 = arith.constant dense<0.000000e+00> : vector<1x8x32xf32>
    %160 = tpu.matmul %156, %150, %cst_65 {dimension_numbers = #tpu.dot_dimension_numbers<[2], [1], [1], [2], [0, 0, 0, 1, 1, 2], [0], [0]>} : vector<1x8x8xf32>, vector<1x8x32xf32>, vector<1x8x32xf32> -> vector<1x8x32xf32>
    "tpu.trace_stop"() : () -> ()
    %161 = vector.broadcast %159 : vector<1x8x1xf32> to vector<1x8x32xf32>
    %162 = arith.mulf %160, %161 : vector<1x8x32xf32>
    %163 = vector.extract_strided_slice %145 {offsets = [0, 0, 32], sizes = [1, 8, 32], strides = [1, 1, 1]} : vector<1x8x128xf32> to vector<1x8x32xf32>
    %164 = vector.extract_strided_slice %146 {offsets = [0, 0, 32], sizes = [1, 8, 32], strides = [1, 1, 1]} : vector<1x8x128xf32> to vector<1x8x32xf32>
    %165 = vector.extract_strided_slice %147 {offsets = [0, 0, 32], sizes = [1, 8, 32], strides = [1, 1, 1]} : vector<1x8x128xf32> to vector<1x8x32xf32>
    "tpu.trace_start"() <{level = 10 : i32, message = "bqd,bkd->bqk"}> : () -> ()
    %cst_66 = arith.constant dense<0.000000e+00> : vector<1x8x8xf32>
    %166 = tpu.matmul %163, %164, %cst_66 {dimension_numbers = #tpu.dot_dimension_numbers<[2], [2], [1], [1], [0, 0, 0, 1, 1, 1], [0], [0]>} : vector<1x8x32xf32>, vector<1x8x32xf32>, vector<1x8x8xf32> -> vector<1x8x8xf32>
    "tpu.trace_stop"() : () -> ()
    %cst_67 = arith.constant dense<0xFF800000> : vector<1x8xf32>
    %167 = vector.multi_reduction <maximumf>, %166, %cst_67 [2] : vector<1x8x8xf32> to vector<1x8xf32>
    %168 = vector.shape_cast %167 : vector<1x8xf32> to vector<1x8x1xf32>
    %169 = vector.broadcast %168 : vector<1x8x1xf32> to vector<1x8x8xf32>
    %170 = arith.subf %166, %169 : vector<1x8x8xf32>
    %171 = math.exp %170 : vector<1x8x8xf32>
    %cst_68 = arith.constant dense<0.000000e+00> : vector<1x8xf32>
    %172 = vector.multi_reduction <add>, %171, %cst_68 [2] : vector<1x8x8xf32> to vector<1x8xf32>
    %173 = vector.shape_cast %172 : vector<1x8xf32> to vector<1x8x1xf32>
    %174 = tpu.reciprocal %173 : vector<1x8x1xf32> -> vector<1x8x1xf32>
    "tpu.trace_start"() <{level = 10 : i32, message = "bqk,bkd->bqd"}> : () -> ()
    %cst_69 = arith.constant dense<0.000000e+00> : vector<1x8x32xf32>
    %175 = tpu.matmul %171, %165, %cst_69 {dimension_numbers = #tpu.dot_dimension_numbers<[2], [1], [1], [2], [0, 0, 0, 1, 1, 2], [0], [0]>} : vector<1x8x8xf32>, vector<1x8x32xf32>, vector<1x8x32xf32> -> vector<1x8x32xf32>
    "tpu.trace_stop"() : () -> ()
    %176 = vector.broadcast %174 : vector<1x8x1xf32> to vector<1x8x32xf32>
    %177 = arith.mulf %175, %176 : vector<1x8x32xf32>
    %178 = vector.extract_strided_slice %145 {offsets = [0, 0, 64], sizes = [1, 8, 32], strides = [1, 1, 1]} : vector<1x8x128xf32> to vector<1x8x32xf32>
    %179 = vector.extract_strided_slice %146 {offsets = [0, 0, 64], sizes = [1, 8, 32], strides = [1, 1, 1]} : vector<1x8x128xf32> to vector<1x8x32xf32>
    %180 = vector.extract_strided_slice %147 {offsets = [0, 0, 64], sizes = [1, 8, 32], strides = [1, 1, 1]} : vector<1x8x128xf32> to vector<1x8x32xf32>
    "tpu.trace_start"() <{level = 10 : i32, message = "bqd,bkd->bqk"}> : () -> ()
    %cst_70 = arith.constant dense<0.000000e+00> : vector<1x8x8xf32>
    %181 = tpu.matmul %178, %179, %cst_70 {dimension_numbers = #tpu.dot_dimension_numbers<[2], [2], [1], [1], [0, 0, 0, 1, 1, 1], [0], [0]>} : vector<1x8x32xf32>, vector<1x8x32xf32>, vector<1x8x8xf32> -> vector<1x8x8xf32>
    "tpu.trace_stop"() : () -> ()
    %cst_71 = arith.constant dense<0xFF800000> : vector<1x8xf32>
    %182 = vector.multi_reduction <maximumf>, %181, %cst_71 [2] : vector<1x8x8xf32> to vector<1x8xf32>
    %183 = vector.shape_cast %182 : vector<1x8xf32> to vector<1x8x1xf32>
    %184 = vector.broadcast %183 : vector<1x8x1xf32> to vector<1x8x8xf32>
    %185 = arith.subf %181, %184 : vector<1x8x8xf32>
    %186 = math.exp %185 : vector<1x8x8xf32>
    %cst_72 = arith.constant dense<0.000000e+00> : vector<1x8xf32>
    %187 = vector.multi_reduction <add>, %186, %cst_72 [2] : vector<1x8x8xf32> to vector<1x8xf32>
    %188 = vector.shape_cast %187 : vector<1x8xf32> to vector<1x8x1xf32>
    %189 = tpu.reciprocal %188 : vector<1x8x1xf32> -> vector<1x8x1xf32>
    "tpu.trace_start"() <{level = 10 : i32, message = "bqk,bkd->bqd"}> : () -> ()
    %cst_73 = arith.constant dense<0.000000e+00> : vector<1x8x32xf32>
    %190 = tpu.matmul %186, %180, %cst_73 {dimension_numbers = #tpu.dot_dimension_numbers<[2], [1], [1], [2], [0, 0, 0, 1, 1, 2], [0], [0]>} : vector<1x8x8xf32>, vector<1x8x32xf32>, vector<1x8x32xf32> -> vector<1x8x32xf32>
    "tpu.trace_stop"() : () -> ()
    %191 = vector.broadcast %189 : vector<1x8x1xf32> to vector<1x8x32xf32>
    %192 = arith.mulf %190, %191 : vector<1x8x32xf32>
    %193 = vector.extract_strided_slice %145 {offsets = [0, 0, 96], sizes = [1, 8, 32], strides = [1, 1, 1]} : vector<1x8x128xf32> to vector<1x8x32xf32>
    %194 = vector.extract_strided_slice %146 {offsets = [0, 0, 96], sizes = [1, 8, 32], strides = [1, 1, 1]} : vector<1x8x128xf32> to vector<1x8x32xf32>
    %195 = vector.extract_strided_slice %147 {offsets = [0, 0, 96], sizes = [1, 8, 32], strides = [1, 1, 1]} : vector<1x8x128xf32> to vector<1x8x32xf32>
    "tpu.trace_start"() <{level = 10 : i32, message = "bqd,bkd->bqk"}> : () -> ()
    %cst_74 = arith.constant dense<0.000000e+00> : vector<1x8x8xf32>
    %196 = tpu.matmul %193, %194, %cst_74 {dimension_numbers = #tpu.dot_dimension_numbers<[2], [2], [1], [1], [0, 0, 0, 1, 1, 1], [0], [0]>} : vector<1x8x32xf32>, vector<1x8x32xf32>, vector<1x8x8xf32> -> vector<1x8x8xf32>
    "tpu.trace_stop"() : () -> ()
    %cst_75 = arith.constant dense<0xFF800000> : vector<1x8xf32>
    %197 = vector.multi_reduction <maximumf>, %196, %cst_75 [2] : vector<1x8x8xf32> to vector<1x8xf32>
    %198 = vector.shape_cast %197 : vector<1x8xf32> to vector<1x8x1xf32>
    %199 = vector.broadcast %198 : vector<1x8x1xf32> to vector<1x8x8xf32>
    %200 = arith.subf %196, %199 : vector<1x8x8xf32>
    %201 = math.exp %200 : vector<1x8x8xf32>
    %cst_76 = arith.constant dense<0.000000e+00> : vector<1x8xf32>
    %202 = vector.multi_reduction <add>, %201, %cst_76 [2] : vector<1x8x8xf32> to vector<1x8xf32>
    %203 = vector.shape_cast %202 : vector<1x8xf32> to vector<1x8x1xf32>
    %204 = tpu.reciprocal %203 : vector<1x8x1xf32> -> vector<1x8x1xf32>
    "tpu.trace_start"() <{level = 10 : i32, message = "bqk,bkd->bqd"}> : () -> ()
    %cst_77 = arith.constant dense<0.000000e+00> : vector<1x8x32xf32>
    %205 = tpu.matmul %201, %195, %cst_77 {dimension_numbers = #tpu.dot_dimension_numbers<[2], [1], [1], [2], [0, 0, 0, 1, 1, 2], [0], [0]>} : vector<1x8x8xf32>, vector<1x8x32xf32>, vector<1x8x32xf32> -> vector<1x8x32xf32>
    "tpu.trace_stop"() : () -> ()
    %206 = vector.broadcast %204 : vector<1x8x1xf32> to vector<1x8x32xf32>
    %207 = arith.mulf %205, %206 : vector<1x8x32xf32>
    %208 = tpu.concatenate %162, %177, %192, %207 in 2 : vector<1x8x32xf32>, vector<1x8x32xf32>, vector<1x8x32xf32>, vector<1x8x32xf32> -> vector<1x8x128xf32>
    %209 = vector.shape_cast %208 : vector<1x8x128xf32> to vector<8x128xf32>
    %cst_78 = arith.constant dense<0.000000e+00> : vector<8x128xf32>
    %210 = tpu.matmul %209, %143, %cst_78 {dimension_numbers = #tpu.dot_dimension_numbers<[1], [0], [0], [1], [0, 0, 1, 1], [], []>} : vector<8x128xf32>, vector<128x128xf32>, vector<8x128xf32> -> vector<8x128xf32>
    %211 = vector.broadcast %144 : vector<1x128xf32> to vector<8x128xf32>
    %212 = arith.addf %210, %211 : vector<8x128xf32>
    %213 = arith.addf %110, %212 : vector<8x128xf32>
    %c0_79 = arith.constant 0 : index
    %c0_80 = arith.constant 0 : index
    %214 = vector.load %arg17[%c0_79, %c0_80] : memref<1x128xf32, #tpu.memory_space<vmem>>, vector<1x128xf32>
    %c0_81 = arith.constant 0 : index
    %c0_82 = arith.constant 0 : index
    %215 = vector.load %arg18[%c0_81, %c0_82] : memref<1x128xf32, #tpu.memory_space<vmem>>, vector<1x128xf32>
    %cst_83 = arith.constant dense<0.000000e+00> : vector<8xf32>
    %216 = vector.multi_reduction <add>, %213, %cst_83 [1] : vector<8x128xf32> to vector<8xf32>
    %217 = vector.shape_cast %216 : vector<8xf32> to vector<8x1xf32>
    %cst_84 = arith.constant 1.280000e+02 : f32
    %218 = vector.broadcast %cst_84 : f32 to vector<8x1xf32>
    %219 = arith.divf %217, %218 : vector<8x1xf32>
    %220 = vector.broadcast %219 : vector<8x1xf32> to vector<8x128xf32>
    %221 = arith.subf %213, %220 : vector<8x128xf32>
    %222 = arith.mulf %221, %221 : vector<8x128xf32>
    %cst_85 = arith.constant dense<0.000000e+00> : vector<8xf32>
    %223 = vector.multi_reduction <add>, %222, %cst_85 [1] : vector<8x128xf32> to vector<8xf32>
    %224 = vector.shape_cast %223 : vector<8xf32> to vector<8x1xf32>
    %cst_86 = arith.constant 1.280000e+02 : f32
    %225 = vector.broadcast %cst_86 : f32 to vector<8x1xf32>
    %226 = arith.divf %224, %225 : vector<8x1xf32>
    %227 = vector.broadcast %219 : vector<8x1xf32> to vector<8x128xf32>
    %228 = arith.subf %213, %227 : vector<8x128xf32>
    %cst_87 = arith.constant 9.99999974E-6 : f32
    %229 = vector.broadcast %cst_87 : f32 to vector<8x1xf32>
    %230 = arith.addf %226, %229 : vector<8x1xf32>
    %231 = math.rsqrt %230 : vector<8x1xf32>
    %232 = vector.broadcast %231 : vector<8x1xf32> to vector<8x128xf32>
    %233 = arith.mulf %228, %232 : vector<8x128xf32>
    %234 = vector.broadcast %214 : vector<1x128xf32> to vector<8x128xf32>
    %235 = arith.mulf %233, %234 : vector<8x128xf32>
    %236 = vector.broadcast %215 : vector<1x128xf32> to vector<8x128xf32>
    %237 = arith.addf %235, %236 : vector<8x128xf32>
    %c0_88 = arith.constant 0 : index
    %c0_89 = arith.constant 0 : index
    %238 = vector.load %arg19[%c0_88, %c0_89] : memref<128x512xf32, #tpu.memory_space<vmem>>, vector<128x512xf32>
    %cst_90 = arith.constant dense<0.000000e+00> : vector<8x512xf32>
    %239 = tpu.matmul %237, %238, %cst_90 {dimension_numbers = #tpu.dot_dimension_numbers<[1], [0], [0], [1], [0, 0, 1, 1], [], []>} : vector<8x128xf32>, vector<128x512xf32>, vector<8x512xf32> -> vector<8x512xf32>
    %c0_91 = arith.constant 0 : index
    %c0_92 = arith.constant 0 : index
    %240 = vector.load %arg20[%c0_91, %c0_92] : memref<1x512xf32, #tpu.memory_space<vmem>>, vector<1x512xf32>
    %241 = vector.broadcast %240 : vector<1x512xf32> to vector<8x512xf32>
    %242 = arith.addf %239, %241 : vector<8x512xf32>
    %cst_93 = arith.constant 5.000000e-01 : f32
    %243 = vector.broadcast %cst_93 : f32 to vector<8x512xf32>
    %244 = arith.mulf %243, %242 : vector<8x512xf32>
    %cst_94 = arith.constant 0.707106769 : f32
    %245 = vector.broadcast %cst_94 : f32 to vector<8x512xf32>
    %246 = arith.mulf %242, %245 : vector<8x512xf32>
    %247 = math.absf %246 : vector<8x512xf32>
    %cst_95 = arith.constant 0.327591091 : f32
    %248 = vector.broadcast %cst_95 : f32 to vector<8x512xf32>
    %249 = arith.mulf %248, %247 : vector<8x512xf32>
    %cst_96 = arith.constant 1.000000e+00 : f32
    %250 = vector.broadcast %cst_96 : f32 to vector<8x512xf32>
    %251 = arith.addf %250, %249 : vector<8x512xf32>
    %cst_97 = arith.constant 1.000000e+00 : f32
    %252 = vector.broadcast %cst_97 : f32 to vector<8x512xf32>
    %253 = arith.divf %252, %251 : vector<8x512xf32>
    %cst_98 = arith.constant 1.06140542 : f32
    %254 = vector.broadcast %cst_98 : f32 to vector<8x512xf32>
    %255 = arith.mulf %254, %253 : vector<8x512xf32>
    %cst_99 = arith.constant -1.45315206 : f32
    %256 = vector.broadcast %cst_99 : f32 to vector<8x512xf32>
    %257 = arith.addf %255, %256 : vector<8x512xf32>
    %258 = arith.mulf %257, %253 : vector<8x512xf32>
    %cst_100 = arith.constant 1.42141378 : f32
    %259 = vector.broadcast %cst_100 : f32 to vector<8x512xf32>
    %260 = arith.addf %258, %259 : vector<8x512xf32>
    %261 = arith.mulf %260, %253 : vector<8x512xf32>
    %cst_101 = arith.constant -0.284496725 : f32
    %262 = vector.broadcast %cst_101 : f32 to vector<8x512xf32>
    %263 = arith.addf %261, %262 : vector<8x512xf32>
    %264 = arith.mulf %263, %253 : vector<8x512xf32>
    %cst_102 = arith.constant 0.254829586 : f32
    %265 = vector.broadcast %cst_102 : f32 to vector<8x512xf32>
    %266 = arith.addf %264, %265 : vector<8x512xf32>
    %267 = arith.mulf %266, %253 : vector<8x512xf32>
    %cst_103 = arith.constant 0.000000e+00 : f32
    %268 = vector.broadcast %cst_103 : f32 to vector<8x512xf32>
    %269 = arith.subf %268, %247 : vector<8x512xf32>
    %270 = arith.mulf %269, %247 : vector<8x512xf32>
    %271 = math.exp %270 : vector<8x512xf32>
    %272 = arith.mulf %267, %271 : vector<8x512xf32>
    %cst_104 = arith.constant 1.000000e+00 : f32
    %273 = vector.broadcast %cst_104 : f32 to vector<8x512xf32>
    %274 = arith.subf %273, %272 : vector<8x512xf32>
    %cst_105 = arith.constant 0.000000e+00 : f32
    %275 = vector.broadcast %cst_105 : f32 to vector<8x512xf32>
    %276 = arith.cmpf olt, %246, %275 : vector<8x512xf32>
    %cst_106 = arith.constant 0.000000e+00 : f32
    %277 = vector.broadcast %cst_106 : f32 to vector<8x512xf32>
    %278 = arith.subf %277, %274 : vector<8x512xf32>
    %279 = arith.select %276, %278, %274 : vector<8x512xi1>, vector<8x512xf32>
    %cst_107 = arith.constant 1.000000e+00 : f32
    %280 = vector.broadcast %cst_107 : f32 to vector<8x512xf32>
    %281 = arith.addf %280, %279 : vector<8x512xf32>
    %282 = arith.mulf %244, %281 : vector<8x512xf32>
    %c0_108 = arith.constant 0 : index
    %c0_109 = arith.constant 0 : index
    %283 = vector.load %arg21[%c0_108, %c0_109] : memref<512x128xf32, #tpu.memory_space<vmem>>, vector<512x128xf32>
    %cst_110 = arith.constant dense<0.000000e+00> : vector<8x128xf32>
    %284 = tpu.matmul %282, %283, %cst_110 {dimension_numbers = #tpu.dot_dimension_numbers<[1], [0], [0], [1], [0, 0, 1, 1], [], []>} : vector<8x512xf32>, vector<512x128xf32>, vector<8x128xf32> -> vector<8x128xf32>
    %285 = arith.addf %213, %284 : vector<8x128xf32>
    %c0_111 = arith.constant 0 : index
    %c0_112 = arith.constant 0 : index
    %286 = vector.load %arg22[%c0_111, %c0_112] : memref<1x128xf32, #tpu.memory_space<vmem>>, vector<1x128xf32>
    %287 = vector.broadcast %286 : vector<1x128xf32> to vector<8x128xf32>
    %288 = arith.addf %285, %287 : vector<8x128xf32>
    %289 = vector.shape_cast %288 : vector<8x128xf32> to vector<1x8x128xf32>
    %c0_113 = arith.constant 0 : index
    %c0_114 = arith.constant 0 : index
    %c0_115 = arith.constant 0 : index
    %290 = vector.load %arg23[%c0_113, %c0_114, %c0_115] : memref<1x8x128xf32, #tpu.memory_space<vmem>>, vector<1x8x128xf32>
    tpu.vector_store %arg23[%c0_113, %c0_114, %c0_115], %289 {strides = array<i32>} : memref<1x8x128xf32, #tpu.memory_space<vmem>>, vector<1x8x128xf32>,
    return
  }
  func.func @transform_0(%arg0: i32) -> (i32, i32, i32) {
    %c0_i32 = arith.constant 0 : i32
    %c0_i32_0 = arith.constant 0 : i32
    %c0_i32_1 = arith.constant 0 : i32
    return %arg0, %c0_i32, %c0_i32_0 : i32, i32, i32
  }
  func.func @transform_1(%arg0: i32) -> (i32, i32, i32) {
    %c0_i32 = arith.constant 0 : i32
    %c0_i32_0 = arith.constant 0 : i32
    %c0_i32_1 = arith.constant 0 : i32
    return %arg0, %c0_i32, %c0_i32_0 : i32, i32, i32
  }
  func.func @transform_2(%arg0: i32) -> (i32, i32) {
    %c0_i32 = arith.constant 0 : i32
    %c0_i32_0 = arith.constant 0 : i32
    %c0_i32_1 = arith.constant 0 : i32
    return %c0_i32, %c0_i32_0 : i32, i32
  }
  func.func @transform_3(%arg0: i32) -> (i32, i32) {
    %c0_i32 = arith.constant 0 : i32
    %c0_i32_0 = arith.constant 0 : i32
    %c0_i32_1 = arith.constant 0 : i32
    return %c0_i32, %c0_i32_0 : i32, i32
  }
  func.func @transform_4(%arg0: i32) -> (i32, i32) {
    %c0_i32 = arith.constant 0 : i32
    %c0_i32_0 = arith.constant 0 : i32
    %c0_i32_1 = arith.constant 0 : i32
    return %c0_i32, %c0_i32_0 : i32, i32
  }
  func.func @transform_5(%arg0: i32) -> (i32, i32) {
    %c0_i32 = arith.constant 0 : i32
    %c0_i32_0 = arith.constant 0 : i32
    %c0_i32_1 = arith.constant 0 : i32
    return %c0_i32, %c0_i32_0 : i32, i32
  }
  func.func @transform_6(%arg0: i32) -> (i32, i32) {
    %c0_i32 = arith.constant 0 : i32
    %c0_i32_0 = arith.constant 0 : i32
    %c0_i32_1 = arith.constant 0 : i32
    return %c0_i32, %c0_i32_0 : i32, i32
  }
  func.func @transform_7(%arg0: i32) -> (i32, i32) {
    %c0_i32 = arith.constant 0 : i32
    %c0_i32_0 = arith.constant 0 : i32
    %c0_i32_1 = arith.constant 0 : i32
    return %c0_i32, %c0_i32_0 : i32, i32
  }
  func.func @transform_8(%arg0: i32) -> (i32, i32) {
    %c0_i32 = arith.constant 0 : i32
    %c0_i32_0 = arith.constant 0 : i32
    %c0_i32_1 = arith.constant 0 : i32
    return %c0_i32, %c0_i32_0 : i32, i32
  }
  func.func @transform_9(%arg0: i32) -> (i32, i32) {
    %c0_i32 = arith.constant 0 : i32
    %c0_i32_0 = arith.constant 0 : i32
    %c0_i32_1 = arith.constant 0 : i32
    return %c0_i32, %c0_i32_0 : i32, i32
  }
  func.func @transform_10(%arg0: i32) -> (i32, i32) {
    %c0_i32 = arith.constant 0 : i32
    %c0_i32_0 = arith.constant 0 : i32
    %c0_i32_1 = arith.constant 0 : i32
    return %c0_i32, %c0_i32_0 : i32, i32
  }
  func.func @transform_11(%arg0: i32) -> (i32, i32) {
    %c0_i32 = arith.constant 0 : i32
    %c0_i32_0 = arith.constant 0 : i32
    %c0_i32_1 = arith.constant 0 : i32
    return %c0_i32, %c0_i32_0 : i32, i32
  }
  func.func @transform_12(%arg0: i32) -> (i32, i32) {
    %c0_i32 = arith.constant 0 : i32
    %c0_i32_0 = arith.constant 0 : i32
    %c0_i32_1 = arith.constant 0 : i32
    return %c0_i32, %c0_i32_0 : i32, i32
  }
  func.func @transform_13(%arg0: i32) -> (i32, i32) {
    %c0_i32 = arith.constant 0 : i32
    %c0_i32_0 = arith.constant 0 : i32
    %c0_i32_1 = arith.constant 0 : i32
    return %c0_i32, %c0_i32_0 : i32, i32
  }
  func.func @transform_14(%arg0: i32) -> (i32, i32) {
    %c0_i32 = arith.constant 0 : i32
    %c0_i32_0 = arith.constant 0 : i32
    %c0_i32_1 = arith.constant 0 : i32
    return %c0_i32, %c0_i32_0 : i32, i32
  }
  func.func @transform_15(%arg0: i32) -> (i32, i32) {
    %c0_i32 = arith.constant 0 : i32
    %c0_i32_0 = arith.constant 0 : i32
    %c0_i32_1 = arith.constant 0 : i32
    return %c0_i32, %c0_i32_0 : i32, i32
  }
  func.func @transform_16(%arg0: i32) -> (i32, i32) {
    %c0_i32 = arith.constant 0 : i32
    %c0_i32_0 = arith.constant 0 : i32
    %c0_i32_1 = arith.constant 0 : i32
    return %c0_i32, %c0_i32_0 : i32, i32
  }
  func.func @transform_17(%arg0: i32) -> (i32, i32) {
    %c0_i32 = arith.constant 0 : i32
    %c0_i32_0 = arith.constant 0 : i32
    %c0_i32_1 = arith.constant 0 : i32
    return %c0_i32, %c0_i32_0 : i32, i32
  }
  func.func @transform_18(%arg0: i32) -> (i32, i32) {
    %c0_i32 = arith.constant 0 : i32
    %c0_i32_0 = arith.constant 0 : i32
    %c0_i32_1 = arith.constant 0 : i32
    return %c0_i32, %c0_i32_0 : i32, i32
  }
  func.func @transform_19(%arg0: i32) -> (i32, i32) {
    %c0_i32 = arith.constant 0 : i32
    %c0_i32_0 = arith.constant 0 : i32
    %c0_i32_1 = arith.constant 0 : i32
    return %c0_i32, %c0_i32_0 : i32, i32
  }
  func.func @transform_20(%arg0: i32) -> (i32, i32) {
    %c0_i32 = arith.constant 0 : i32
    %c0_i32_0 = arith.constant 0 : i32
    %c0_i32_1 = arith.constant 0 : i32
    return %c0_i32, %c0_i32_0 : i32, i32
  }
  func.func @transform_21(%arg0: i32) -> (i32, i32) {
    %c0_i32 = arith.constant 0 : i32
    %c0_i32_0 = arith.constant 0 : i32
    %c0_i32_1 = arith.constant 0 : i32
    return %c0_i32, %c0_i32_0 : i32, i32
  }
  func.func @transform_22(%arg0: i32) -> (i32, i32, i32) {
    %c0_i32 = arith.constant 0 : i32
    %c0_i32_0 = arith.constant 0 : i32
    %c0_i32_1 = arith.constant 0 : i32
    return %arg0, %c0_i32, %c0_i32_0 : i32, i32, i32
  }
}

</mosaic_0001>

<bundles_post_ra>
// kernel: tpu_custom_call.1
= control target key start
LH: loop header
LB: loop body
LE: loop exit
PB: predicated region body
PF: predicated region fallthrough
CT: control target
= control target key end

     0   :  { %s5547_s0 = inlined_call_operand.hbm [shape: f32[2,8,128], index: 0, kind: input, shape index: {}]   ;;  %s5548_s1 = inlined_call_operand.hbm [shape: f32[2,8,128], index: 1, kind: input, shape index: {}]   ;;  %s5549_s2 = inlined_call_operand.hbm [shape: f32[1,128], index: 2, kind: input, shape index: {}]   ;;  %s5550_s3 = inlined_call_operand.hbm [shape: f32[1,128], index: 3, kind: input, shape index: {}]   ;;  %s5551_s4 = inlined_call_operand.hbm [shape: f32[128,128], index: 4, kind: input, shape index: {}]   ;;  %s5552_s5 = inlined_call_operand.hbm [shape: f32[1,128], index: 5, kind: input, shape index: {}]   ;;  %s5553_s6 = inlined_call_operand.hbm [shape: f32[128,256], index: 6, kind: input, shape index: {}]   ;;  %s5554_s7 = inlined_call_operand.vmem [shape: f32[1,256], index: 7, kind: input, shape index: {}]   ;;  %s5555_s8 = inlined_call_operand.hbm [shape: f32[128,128], index: 8, kind: input, shape index: {}]   ;;  %s5556_s9 = inlined_call_operand.vmem [shape: f32[1,128], index: 9, kind: input, shape index: {}]   ;;  %s5557_s10 = inlined_call_operand.vmem [shape: f32[1,128], index: 10, kind: input, shape index: {}]   ;;  %s5558_s11 = inlined_call_operand.vmem [shape: f32[1,128], index: 11, kind: input, shape index: {}]   ;;  %s5559_s12 = inlined_call_operand.hbm [shape: f32[128,384], index: 12, kind: input, shape index: {}]   ;;  %s5560_s13 = inlined_call_operand.vmem [shape: f32[1,384], index: 13, kind: input, shape index: {}]   ;;  %s5561_s14 = inlined_call_operand.hbm [shape: f32[128,128], index: 14, kind: input, shape index: {}]   ;;  %s5562_s15 = inlined_call_operand.vmem [shape: f32[1,128], index: 15, kind: input, shape index: {}]   ;;  %s5563_s16 = inlined_call_operand.vmem [shape: f32[1,128], index: 16, kind: input, shape index: {}]   ;;  %s5564_s17 = inlined_call_operand.vmem [shape: f32[1,128], index: 17, kind: input, shape index: {}]   ;;  %s5565_s18 = inlined_call_operand.hbm [shape: f32[128,512], index: 18, kind: input, shape index: {}]   ;;  %s5566_s19 = inlined_call_operand.vmem [shape: f32[1,512], index: 19, kind: input, shape index: {}]   ;;  %s5567_s20 = inlined_call_operand.hbm [shape: f32[512,128], index: 20, kind: input, shape index: {}]   ;;  %s5568_s21 = inlined_call_operand.vmem [shape: f32[1,128], index: 21, kind: input, shape index: {}]   ;;  %s5569_s22 = inlined_call_operand.hbm [shape: f32[2,8,128], index: 22, kind: output, shape index: {}]  }
   0x1   :  { %5584 = sst [smem:[#allocation37_spill]] %s5547_s0 }
   0x2   :  { %5585 = sst [smem:[#allocation38_spill]] %s5548_s1 }
   0x3   :  { %5586 = sst [smem:[#allocation39_spill]] %s5549_s2 }
   0x4   :  { %5587 = sst [smem:[#allocation40_spill]] %s5550_s3 }
   0x5   :  { %5588 = sst [smem:[#allocation41_spill]] %s5551_s4 }
   0x6   :  { %5589 = sst [smem:[#allocation42_spill]] %s5552_s5 }
   0x7   :  { %5590 = sst [smem:[#allocation43_spill]] %s5553_s6 }
   0x8   :  { %5591 = sst [smem:[#allocation44_spill]] %s5555_s8 }
   0x9   :  { %5592 = sst [smem:[#allocation45_spill]] %s5559_s12 }
   0xa   :  { %5593 = sst [smem:[#allocation46_spill]] %s5561_s14 }
   0xb   :  { %5594 = sst [smem:[#allocation47_spill]] %s5564_s17 }
   0xc   :  { %5595 = sst [smem:[#allocation48_spill]] %s5565_s18 }
   0xd   :  { %5596 = sst [smem:[#allocation49_spill]] %s5566_s19 }
   0xe   :  { %5597 = sst [smem:[#allocation50_spill]] %s5567_s20 }
   0xf   :  { %5598 = sst [smem:[#allocation51_spill]] %s5568_s21 }
  0x10   :  { %5599 = sst [smem:[#allocation52_spill]] %s5569_s22 }
  0x11   :  { %27 = vsyncpa [#allocation3], 0 }
  0x12   :  { %29 = vsyncpa [#allocation3 + $0x1], 0 }
  0x13   :  { %30 = vsyncpa [#allocation6], 0 }
  0x14   :  { %32 = vsyncpa [#allocation6 + $0x1], 0 }
  0x15   :  { %33 = vsyncpa [#allocation9], 0 }
  0x16   :  { %34 = vsyncpa [#allocation12], 0 }
  0x17   :  { %35 = vsyncpa [#allocation15], 0 }
  0x18   :  { %36 = vsyncpa [#allocation18], 0 }
  0x19   :  { %37 = vsyncpa [#allocation21], 0 }
  0x1a   :  { %38 = vsyncpa [#allocation4], 0 }
  0x1b   :  { %40 = vsyncpa [#allocation4 + $0x1], 0  ;;  %s4888_s3 = smov 0   ;;  %s4890_s28 = smov 0  }
  0x1c   :  { %s4892_s29 = smov 0   ;;  %s4894_s30 = smov 0  }
  0x1d LB: > { %5600 = sst [smem:[#allocation32_spill]] %s4733_s3  ;;  %s4747_s4 = smov [#allocation7]   ;;  %s4745_s30 = sphi %s4894_s30, %s5651_s30   ;;  %s4741_s29 = sphi %s4892_s29, %s5653_s29   ;;  %s4737_s28 = sphi %s4890_s28, %s5655_s28   ;;  %s4733_s3 = sphi %s4888_s3, %s5654_s3  }
  0x1e   : > { %5601 = sst [smem:[#allocation33_spill]] %s4741_s29  ;;  %s562_s0 = sshll.u32 %s4747_s4, 4  ;;  %s563_s0 = int_to_ptr.vmem [resolvable:$true] %s562_s0 }
  0x1f   : > { %s4909_s23 = sadd.s32 4294967295, %s4745_s30   ;;  %p3660_p0 = scmp.ge.s32.totalorder %s4745_s30, 1 }
  0x20   : > { %p5573_p1 = scmp.eq.s32.totalorder %s4909_s23, 0  ;;  %p549_p2 = scmp.lt.s32.totalorder %s4745_s30, 3 }
  0x21   : > { %s4748_s5 = smov [#allocation8]   ;;  %s4749_s6 = smov [#allocation11]  }
  0x22   : > { %p4914_p3 = pnand %p3660_p0, %p549_p2  ;;  %s573_s24 = sshll.u32 %s4748_s5, 4  ;;  %s574_s24 = int_to_ptr.vmem [resolvable:$true] %s573_s24 }
  0x23   : > { %s597_s25 = sshll.u32 %s4749_s6, 4  ;;  %s4348_s27 = scalar_lea.vmem %s563_s0, 16  ;;  %s4927_s25 = int_to_ptr.vmem [resolvable:$true] %s597_s25 }
  0x24   : > { %s5602_s1 = scalar_select %p4914_p3, 1, 0 }
  0x25   : > { %p4164_p5 = pneg %p4914_p3  ;;  %p4349_p8 = scmp.ne.s32.totalorder %s563_s0, %s4348_s27 }
  0x26   : > { %s4355_s4 = scalar_lea.vmem %s563_s0, 32  ;;  %p4356_p11 = scmp.lt.s32.totalorder %s563_s0, %s563_s0 }
  0x27   : > { %p4923_p6 = pnand %p4164_p5, %p5573_p1  ;;  %p4357_p12 = scmp.lt.s32.totalorder %s4355_s4, %s4348_s27 }
  0x29   : > { %p4931_p7 = pneg %p4923_p6  ;;  %p4358_p13 = por %p4357_p12, %p4356_p11 }
  0x2b   : > { %p4351_p9 = pnand %p4349_p8, %p4931_p7 }
  0x2d   : > { %p4352_p10 = pneg %p4351_p9 }
  0x2f   : > { %p4359_p0 = pnand %p4358_p13, %p4352_p10 }
  0x31   : > { %4362 = shalt.err (!%p4359_p0)
}
  0x32   : > { %s5605_s22 = sld [smem:[#allocation39_spill]]  ;;  %s4374_s21 = scalar_lea.vmem %s574_s24, 16 }
  0x33   : > { %p4375_p2 = scmp.ne.s32.totalorder %s574_s24, %s4374_s21  ;;  %s4381_s19 = scalar_lea.vmem %s574_s24, 32 }
  0x34   : > { %p4382_p8 = scmp.lt.s32.totalorder %s574_s24, %s574_s24  ;;  %p4383_p9 = scmp.lt.s32.totalorder %s4381_s19, %s4374_s21 }
  0x35   : > { %p4377_p5 = pnand %p4375_p2, %p4931_p7 }
  0x36   : > { %p4384_p1 = por %p4383_p9, %p4382_p8 }
  0x37   : > { %p4378_p4 = pneg %p4377_p5 }
  0x38   : > { %4167 = dma.hbm_to_vmem [thread:$0]  (!%p4923_p6), %s5605_s22, 16, %s563_s0, [#allocation6]  }
  0x39   : > { %p4385_p3 = pnand %p4384_p1, %p4378_p4 }
  0x3b   : > { %4388 = shalt.err (!%p4385_p3)
}
  0x3c   : > { %s5606_s17 = sld [smem:[#allocation40_spill]]  ;;  %s4400_s22 = scalar_lea.vmem %s4927_s25, 16 }
  0x3d   : > { %p4401_p10 = scmp.ne.s32.totalorder %s4927_s25, %s4400_s22  ;;  %s4407_s19 = scalar_lea.vmem %s4927_s25, 32 }
  0x3e   : > { %p4408_p1 = scmp.lt.s32.totalorder %s4927_s25, %s4927_s25  ;;  %p4409_p3 = scmp.lt.s32.totalorder %s4407_s19, %s4400_s22 }
  0x3f   : > { %p4403_p11 = pnand %p4401_p10, %p4931_p7 }
  0x40   : > { %p4410_p4 = por %p4409_p3, %p4408_p1 }
  0x41   : > { %p4404_p12 = pneg %p4403_p11 }
  0x42   : > { %4170 = dma.hbm_to_vmem [thread:$0]  (!%p4923_p6), %s5606_s17, 16, %s574_s24, [#allocation9]  }
  0x43   : > { %p4411_p13 = pnand %p4410_p4, %p4404_p12 }
  0x45   : > { %4414 = shalt.err (!%p4411_p13)
}
  0x46   : > { %s5607_s5 = sld [smem:[#allocation42_spill]]  ;;  %s4750_s17 = smov [#allocation14]  }
  0x47   : > { %s623_s24 = sshll.u32 %s4750_s17, 4  ;;  %s4751_s6 = smov [#allocation17]   ;;  %s624_s24 = int_to_ptr.vmem [resolvable:$true] %s623_s24 }
  0x48   : > { %s661_s27 = sshll.u32 %s4751_s6, 4  ;;  %s4426_s4 = scalar_lea.vmem %s624_s24, 2048  ;;  %s662_s27 = int_to_ptr.vmem [resolvable:$true] %s661_s27 }
  0x49   : > { %p4427_p0 = scmp.ne.s32.totalorder %s624_s24, %s4426_s4  ;;  %p4434_p8 = scmp.lt.s32.totalorder %s624_s24, %s624_s24 }
  0x4a   : > { %p4435_p9 = scmp.lt.s32.totalorder %s4426_s4, %s4426_s4 }
  0x4b   : > { %p4429_p2 = pnand %p4427_p0, %p4931_p7 }
  0x4c   : > { %4176 = dma.hbm_to_vmem [thread:$0]  (!%p4923_p6), %s5607_s5, 16, %s4927_s25, [#allocation12]  }
  0x4d   : > { %p4430_p5 = pneg %p4429_p2  ;;  %p4436_p10 = por %p4435_p9, %p4434_p8 }
  0x4f   : > { %p4437_p11 = pnand %p4436_p10, %p4430_p5 }
  0x51   : > { %4440 = shalt.err (!%p4437_p11)
}
  0x52   : > { %s5575_s22 = smov 128   ;;  %s5576_s19 = smov 8  }
  0x53   : > { %s5608_s8 = sld [smem:[#allocation44_spill]]  ;;  %s4452_s0 = scalar_lea.vmem %s662_s27, 2048 }
  0x54   : > { %p4453_p12 = scmp.ne.s32.totalorder %s662_s27, %s4452_s0  ;;  %p4460_p4 = scmp.lt.s32.totalorder %s662_s27, %s662_s27 }
  0x55   : > { %p4461_p13 = scmp.lt.s32.totalorder %s4452_s0, %s4452_s0 }
  0x56   : > { %p4455_p1 = pnand %p4453_p12, %p4931_p7 }
  0x57   : > { %p4462_p0 = por %p4461_p13, %p4460_p4 }
  0x58   : > { %p4456_p3 = pneg %p4455_p1 }
  0x59   : > { %4182 = dma.hbm_to_vmem [thread:$0]  (!%p4923_p6), %s5608_s8, 2048, %s624_s24, [#allocation15], %s5575_s22, %s5575_s22, %s5576_s19  }
  0x5a   : > { %p4463_p2 = pnand %p4462_p0, %p4456_p3 }
  0x5c   : > { %4466 = shalt.err (!%p4463_p2)
}
  0x5d   : > { %s5609_s14 = sld [smem:[#allocation46_spill]]  ;;  %s4754_s24 = smov [#allocation10]  }
  0x5e   : > { %s583_s6 = sshll.u32 %s4754_s24, 4  ;;  %s4755_s4 = smov [#allocation13]   ;;  %s584_s6 = int_to_ptr.vmem [resolvable:$true] %s583_s6 }
  0x5f   : > { %s607_s25 = sshll.u32 %s4755_s4, 4  ;;  %s4478_s21 = scalar_lea.vmem %s584_s6, 2048  ;;  %s608_s25 = int_to_ptr.vmem [resolvable:$true] %s607_s25 }
  0x60   : > { %p4479_p5 = scmp.ne.s32.totalorder %s584_s6, %s4478_s21  ;;  %p4486_p10 = scmp.lt.s32.totalorder %s584_s6, %s584_s6 }
  0x61   : > { %p4487_p11 = scmp.lt.s32.totalorder %s4478_s21, %s4478_s21 }
  0x62   : > { %p4481_p8 = pnand %p4479_p5, %p4931_p7 }
  0x63   : > { %4188 = dma.hbm_to_vmem [thread:$0]  (!%p4923_p6), %s5609_s14, 2048, %s662_s27, [#allocation18], %s5575_s22, %s5575_s22, %s5576_s19  }
  0x64   : > { %p4482_p9 = pneg %p4481_p8  ;;  %p4488_p12 = por %p4487_p11, %p4486_p10 }
  0x66   : > { %p4489_p1 = pnand %p4488_p12, %p4482_p9 }
  0x68   : > { %4492 = shalt.err (!%p4489_p1)
}
  0x69   : > { %s5610_s5 = sld [smem:[#allocation41_spill]]  ;;  %s4504_s17 = scalar_lea.vmem %s608_s25, 4096 }
  0x6a   : > { %p4505_p3 = scmp.ne.s32.totalorder %s608_s25, %s4504_s17  ;;  %p4512_p0 = scmp.lt.s32.totalorder %s608_s25, %s608_s25 }
  0x6b   : > { %p4513_p2 = scmp.lt.s32.totalorder %s4504_s17, %s4504_s17 }
  0x6c   : > { %p4507_p4 = pnand %p4505_p3, %p4931_p7 }
  0x6d   : > { %p4514_p5 = por %p4513_p2, %p4512_p0 }
  0x6e   : > { %p4508_p13 = pneg %p4507_p4 }
  0x6f   : > { %4173 = dma.hbm_to_vmem [thread:$0]  (!%p4923_p6), %s5610_s5, 2048, %s584_s6, [#allocation9], %s5575_s22, %s5575_s22, %s5576_s19  }
  0x70   : > { %p4515_p8 = pnand %p4514_p5, %p4508_p13 }
  0x72   : > { %4518 = shalt.err (!%p4515_p8)
}
  0x73   : > { %s4756_s24 = smov 256   ;;  %s4757_s4 = smov 16  }
  0x74   : > { %s5611_s0 = sld [smem:[#allocation43_spill]]  ;;  %s4758_s6 = smov [#allocation16]  }
  0x75   : > { %s645_s5 = sshll.u32 %s4758_s6, 4  ;;  %s646_s5 = int_to_ptr.vmem [resolvable:$true] %s645_s5 }
  0x76   : > { %s4530_s22 = scalar_lea.vmem %s646_s5, 6144  ;;  %p4538_p12 = scmp.lt.s32.totalorder %s646_s5, %s646_s5 }
  0x77   : > { %p4531_p9 = scmp.ne.s32.totalorder %s646_s5, %s4530_s22  ;;  %p4539_p1 = scmp.lt.s32.totalorder %s4530_s22, %s4530_s22 }
  0x79   : > { %p4533_p10 = pnand %p4531_p9, %p4931_p7  ;;  %p4540_p3 = por %p4539_p1, %p4538_p12 }
  0x7a   : > { %4179 = dma.hbm_to_vmem [thread:$0]  (!%p4923_p6), %s5611_s0, 4096, %s608_s25, [#allocation12], %s4756_s24, %s4756_s24, %s4757_s4  }
  0x7b   : > { %p4534_p11 = pneg %p4533_p10 }
  0x7d   : > { %p4541_p4 = pnand %p4540_p3, %p4534_p11 }
  0x7f   : > { %4544 = shalt.err (!%p4541_p4)
}
  0x80   : > { %s4759_s17 = smov 384   ;;  %s4760_s19 = smov 24  }
  0x81   : > { %s5612_s12 = sld [smem:[#allocation45_spill]]  ;;  %s4761_s24 = smov [#allocation19]  }
  0x82   : > { %s683_s4 = sshll.u32 %s4761_s24, 4  ;;  %s684_s4 = int_to_ptr.vmem [resolvable:$true] %s683_s4 }
  0x83   : > { %s4556_s27 = scalar_lea.vmem %s684_s4, 8192  ;;  %p4564_p5 = scmp.lt.s32.totalorder %s684_s4, %s684_s4 }
  0x84   : > { %p4557_p13 = scmp.ne.s32.totalorder %s684_s4, %s4556_s27  ;;  %p4565_p8 = scmp.lt.s32.totalorder %s4556_s27, %s4556_s27 }
  0x86   : > { %p4559_p0 = pnand %p4557_p13, %p4931_p7  ;;  %p4566_p9 = por %p4565_p8, %p4564_p5 }
  0x87   : > { %4185 = dma.hbm_to_vmem [thread:$0]  (!%p4923_p6), %s5612_s12, 6144, %s646_s5, [#allocation15], %s4759_s17, %s4759_s17, %s4760_s19  }
  0x88   : > { %p4560_p2 = pneg %p4559_p0 }
  0x8a   : > { %p4567_p10 = pnand %p4566_p9, %p4560_p2 }
  0x8c   : > { %4570 = shalt.err (!%p4567_p10)
}
  0x8d   : > { %s4762_s22 = smov 512   ;;  %s4763_s0 = smov 32  }
  0x8e   : > { %s5613_s18 = sld [smem:[#allocation48_spill]]  ;;  %s4764_s5 = smov [#allocation20]  }
  0x8f   : > { %s699_s17 = sshll.u32 %s4764_s5, 4  ;;  %s700_s17 = int_to_ptr.vmem [resolvable:$true] %s699_s17 }
  0x90   : > { %s4582_s21 = scalar_lea.vmem %s700_s17, 8192  ;;  %p4590_p3 = scmp.lt.s32.totalorder %s700_s17, %s700_s17 }
  0x91   : > { %p4583_p11 = scmp.ne.s32.totalorder %s700_s17, %s4582_s21  ;;  %p4591_p4 = scmp.lt.s32.totalorder %s4582_s21, %s4582_s21 }
  0x93   : > { %p4585_p12 = pnand %p4583_p11, %p4931_p7  ;;  %p4592_p13 = por %p4591_p4, %p4590_p3 }
  0x94   : > { %4191 = dma.hbm_to_vmem [thread:$0]  (!%p4923_p6), %s5613_s18, 8192, %s684_s4, [#allocation18], %s4762_s22, %s4762_s22, %s4763_s0  }
  0x95   : > { %p4586_p1 = pneg %p4585_p12 }
  0x97   : > { %p4593_p0 = pnand %p4592_p13, %p4586_p1 }
  0x99   : > { %4596 = shalt.err (!%p4593_p0)
}
  0x9a   : > { %s5614_s25 = smov 8   ;;  %s5615_s24 = smov 128  }
  0x9b   : > { %s5616_s20 = sld [smem:[#allocation50_spill]]  ;;  %s3659_s26 = sadd.s32 4294967294, %s4745_s30  }
  0x9c   : > { %s5025_s2 = sadd.s32 1, %s4745_s30   ;;  %s53_s0 = sadd.s32 1, %s4741_s29 }
  0x9d   : > { %5617 = sst [smem:[#allocation34_spill]] %s5025_s2  ;;  %s50_s22 = ssub.s32 %s4745_s30, %s5025_s2 }
  0x9e   : > { %p51_p7 = scmp.eq.s32.totalorder %s50_s22, 0  ;;  %p60_p2 = scmp.ne.s32.totalorder %s4741_s29, %s4737_s28 }
  0x9f   : > { %p61_p5 = scmp.eq.s32.totalorder %s4745_s30, 0  ;;  %p66_p8 = scmp.ne.s32.totalorder %s4737_s28, %s4733_s3 }
  0xa0   : > { %s5036_s6 = scalar_select %p51_p7, %s4741_s29, %s53_s0  }
  0xa1   : > { %4194 = dma.hbm_to_vmem [thread:$0]  (!%p4923_p6), %s5616_s20, 8192, %s700_s17, [#allocation21], %s5615_s24, %s5615_s24, %s5614_s25  }
  0xa2   : > { %5618 = sst [smem:[#allocation35_spill]] %s5036_s6  ;;  %p5038_p9 = por %p61_p5, %p60_p2 }
  0xa3   : > { %p5620_p10 = scmp.eq.s32.totalorder %s4909_s23, 0  ;;  %p536_p11 = scmp.eq.s32.totalorder %s4909_s23, 1 }
  0xa4   : > { %p542_p12 = scmp.eq.s32.totalorder %s3659_s26, 1  ;;  %p4216_p1 = scmp.lt.s32.totalorder %s4745_s30, 2 }
  0xa5   : > { %p5044_p6 = por %p5620_p10, %p66_p8  ;;  %s716_s17 = sand.u32 1, %s4741_s29  }
  0xa6   : > { %p5051_p3 = por %p536_p11, %p60_p2  ;;  %p5055_p4 = por %p542_p12, %p66_p8 }
  0xa7   : > { %s5621_s5 = scalar_select %p5044_p6, 1, 0 }
  0xa8   : > { %s5622_s21 = scalar_select %p5051_p3, 1, 0 }
  0xa9   : > { %s5623_s25 = scalar_select %p5055_p4, 1, 0 }
  0xaa   : > { %s5059_s24 = sshll.u32 %s716_s17, 3  ;;  %s3673_s27 = sshll.u32 %s4745_s30, 7 }
  0xab   : > { %5624 = sst [smem:[#allocation36_spill]] %s5623_s25  ;;  %s720_s26 = scalar_lea.vmem [#allocation2], %s5059_s24 }
  0xac   : > { %s5625_s0 = sld [smem:[#allocation37_spill]]  ;;  %s727_s12 = sshll.u32 %s720_s26, 4  ;;  %s5068_s12 = int_to_ptr.vmem [resolvable:$true] %s727_s12 }
  0xad   : > { %p5072_p13 = pnand %p4216_p1, %p5038_p9  ;;  %s5627_s6 = sld [smem:[#allocation38_spill]] }
  0xae   : > { %s734_s22 = sand.u32 1, %s4745_s30   ;;  %s717_s29 = scalar_lea.sflag [#allocation3], %s716_s17 }
  0xaf   : > { %p4599_p7 = pneg %p5072_p13 }
  0xb2   : > { %s5065_s8 = scalar_lea.hbm %s5625_s0, %s3673_s27  ;;  %s4602_s25 = scalar_lea.hbm %s5625_s0, 256 }
  0xb3   : > { %s5079_s4 = scalar_lea.hbm %s5627_s6, %s3673_s27  ;;  %s4597_s2 = scalar_lea.hbm %s5065_s8, 128 }
  0xb4   : > { %p4598_p0 = scmp.ne.s32.totalorder %s5065_s8, %s4597_s2  ;;  %p4603_p8 = scmp.lt.s32.totalorder %s5065_s8, %s5625_s0 }
  0xb5   : > { %p4604_p9 = scmp.lt.s32.totalorder %s4602_s25, %s4597_s2 }
  0xb6   : > { %p4600_p2 = pnand %p4599_p7, %p4598_p0 }
  0xb7   : > { %p4605_p10 = por %p4604_p9, %p4603_p8 }
  0xb8   : > { %p4601_p5 = pneg %p4600_p2 }
  0xba   : > { %p4606_p11 = pnand %p4605_p10, %p4601_p5 }
  0xbc   : > { %4609 = shalt.err (!%p4606_p11)
}
  0xbd   : > { %s4610_s20 = scalar_lea.vmem %s5068_s12, 128  ;;  %s4765_s17 = smov [#allocation2]  }
  0xbe   : > { %p4611_p12 = scmp.ne.s32.totalorder %s5068_s12, %s4610_s20  ;;  %s4615_s27 = sshll.u32 %s4765_s17, 4  ;;  %s4616_s27 = int_to_ptr.vmem [resolvable:$false] %s4615_s27 }
  0xbf   : > { %s4617_s19 = scalar_lea.vmem %s4616_s27, 256  ;;  %p4618_p2 = scmp.lt.s32.totalorder %s5068_s12, %s4616_s27 }
  0xc0   : > { %p4613_p1 = pnand %p4611_p12, %p4599_p7  ;;  %p4619_p4 = scmp.lt.s32.totalorder %s4617_s19, %s4610_s20 }
  0xc2   : > { %p4614_p0 = pneg %p4613_p1  ;;  %p4620_p3 = por %p4619_p4, %p4618_p2 }
  0xc4   : > { %p4621_p8 = pnand %p4620_p3, %p4614_p0 }
  0xc6   : > { %4624 = shalt.err (!%p4621_p8)
}
  0xc7   : > { %4198 = dma.hbm_to_vmem [thread:$0]  (!%p5072_p13), %s5065_s8, 128, %s5068_s12, %s717_s29  }
  0xc8   : > { %s738_s3 = scalar_lea.vmem [#allocation5], %s5059_s24  ;;  %s735_s25 = scalar_lea.sflag [#allocation6], %s734_s22 }
  0xc9   : > { %s745_s2 = sshll.u32 %s738_s3, 4  ;;  %s4625_s26 = scalar_lea.hbm %s5079_s4, 128  ;;  %s746_s2 = int_to_ptr.vmem [resolvable:$true] %s745_s2 }
  0xca   : > { %p4626_p4 = scmp.ne.s32.totalorder %s5079_s4, %s4625_s26  ;;  %s4630_s17 = scalar_lea.hbm %s5627_s6, 256 }
  0xcb   : > { %p4631_p9 = scmp.lt.s32.totalorder %s5079_s4, %s5627_s6  ;;  %p4632_p10 = scmp.lt.s32.totalorder %s4630_s17, %s4625_s26 }
  0xcc   : > { %p4628_p3 = pnand %p4626_p4, %p4599_p7 }
  0xcd   : > { %p4633_p11 = por %p4632_p10, %p4631_p9 }
  0xce   : > { %p4629_p5 = pneg %p4628_p3 }
  0xd0   : > { %p4634_p12 = pnand %p4633_p11, %p4629_p5 }
  0xd2   : > { %4637 = shalt.err (!%p4634_p12)
}
  0xd3   : > { %s4638_s8 = scalar_lea.vmem %s746_s2, 128  ;;  %s4766_s12 = smov [#allocation5]  }
  0xd4   : > { %p4639_p1 = scmp.ne.s32.totalorder %s746_s2, %s4638_s8  ;;  %s4643_s29 = sshll.u32 %s4766_s12, 4  ;;  %s4644_s29 = int_to_ptr.vmem [resolvable:$false] %s4643_s29 }
  0xd5   : > { %s4645_s24 = scalar_lea.vmem %s4644_s29, 256  ;;  %p4646_p8 = scmp.lt.s32.totalorder %s746_s2, %s4644_s29 }
  0xd6   : > { %p4641_p0 = pnand %p4639_p1, %p4599_p7  ;;  %p4647_p4 = scmp.lt.s32.totalorder %s4645_s24, %s4638_s8 }
  0xd8   : > { %p4642_p2 = pneg %p4641_p0  ;;  %p4648_p3 = por %p4647_p4, %p4646_p8 }
  0xda   : > { %p4649_p6 = pnand %p4648_p3, %p4642_p2 }
  0xdc   : > { %4652 = shalt.err (!%p4649_p6)
}
  0xdd   : > { %4201 = dma.hbm_to_vmem [thread:$0]  (!%p5072_p13), %s5079_s4, 128, %s746_s2, %s735_s25  }
  0xde   : > { %p5628_p5 = scmp.ne.s32.totalorder %s5602_s1, 0 }
  0xdf   : > { %s5130_s22 = sand.u32 (!%p5628_p5), 1, %s4737_s28   ;;  %p5629_p7 = scmp.ne.s32.totalorder (!%p5628_p5), %s5621_s5, 0 }
  0xe0   : > { %754 = sbr.rel (%p5628_p5) target bundleno = 5872 (0x16f0), region = 108  ;;  %s5133_s3 = sshll.u32 (!%p5628_p5), %s5130_s22, 3 }
  0xe1   : > { %s757_s26 = scalar_lea.sflag (!%p5628_p5), [#allocation3], %s5130_s22  ;;  %s760_s18 = scalar_lea.vmem (!%p5628_p5), [#allocation2], %s5133_s3 }
  0xe5   : > { %4696 = dma.done.wait (%p5629_p7), %s757_s26, 128  }
  0xe6   : > { %4698 = vsyncadd (%p5629_p7), %s757_s26, 4294967168  ;;  %s765_s14 = sand.u32 1, %s4909_s23   ;;  %s769_s4 = scalar_lea.vmem [#allocation5], %s5133_s3 }
  0xe7   : > { %s766_s1 = scalar_lea.sflag [#allocation6], %s765_s14 }
  0xe8   : > { %4700 = dma.done.wait (%p5629_p7), %s766_s1, 128  }
  0xe9   : > { %4702 = vsyncadd (%p5629_p7), %s766_s1, 4294967168  ;;  %p5630_p6 = scmp.eq.s32.totalorder %s4909_s23, 0 }
  0xeb   : > { %4704 = dma.done.wait (%p5630_p6), [#allocation6], 16   ;;  %p5631_p13 = pmov %p5630_p6 }
  0xec   : > { %p5632_p9 = pmov %p5630_p6 }
  0xed   : > { %4706 = vsyncadd (%p5631_p13), [#allocation6], 4294967280 }
  0xee   : > { %4708 = dma.done.wait (%p5632_p9), [#allocation9], 2064   ;;  %p5633_p10 = pmov %p5630_p6 }
  0xef   : > { %p5634_p11 = pmov %p5630_p6 }
  0xf0   : > { %4710 = vsyncadd (%p5633_p10), [#allocation9], 4294965232 }
  0xf1   : > { %4712 = dma.done.wait (%p5634_p11), [#allocation12], 4112   ;;  %p5635_p12 = pmov %p5630_p6 }
  0xf2   : > { %p5636_p1 = pmov %p5630_p6 }
  0xf3   : > { %4714 = vsyncadd (%p5635_p12), [#allocation12], 4294963184 }
  0xf4   : > { %4716 = dma.done.wait (%p5636_p1), [#allocation15], 8192   ;;  %p5637_p0 = pmov %p5636_p1 }
  0xf6   : > { %4718 = vsyncadd (%p5637_p0), [#allocation15], 4294959104  ;;  %p5638_p2 = pmov %p5637_p0 }
  0xf7   : > { %p5639_p8 = pmov %p5637_p0 }
  0xf8   : > { %4720 = dma.done.wait (%p5638_p2), [#allocation18], 10240  }
  0xf9   : > { %4722 = vsyncadd (%p5639_p8), [#allocation18], 4294957056  ;;  %p5640_p4 = pmov %p5637_p0 }
  0xfa   : > { %p5641_p3 = pmov %p5637_p0 }
  0xfb   : > { %4724 = dma.done.wait (%p5640_p4), [#allocation21], 8192  }
  0xfc   : > { %4726 = vsyncadd (%p5641_p3), [#allocation21], 4294959104  ;;  %v5171_v0 = vld [vmem:[%s760_s18] sm:$0xff]  ;;  %v1028_v2 = vld [vmem:[#allocation13 + $0xf0] sm:$0xff]  ;;  %v4767_v5 = vmov 0.0   ;;  %vm4768_vm0 = vmmov 0  }
  0xfd   : > { %879 = vadd.xlane.f32.xlu0 %v5171_v0  ;;  %v1029_v1 = vld [vmem:[#allocation13 + $0xf8] sm:$0xff]  ;;  %v1027_v3 = vld [vmem:[#allocation13 + $0xe8] sm:$0xff]  ;;  %v1026_v4 = vld [vmem:[#allocation13 + $0xe0] sm:$0xff]  ;;  %3898 = vmatprep.subr.mxu0 %v4767_v5  ;;  %vm1130_vm1 = vcmask 261120   ;;  %s4769_s25 = smov 96   ;;  %s4770_s20 = smov 64  }
  0xfe   : > { %1042 = vmatprep.subr.mxu1 %v1029_v1  ;;  %v1025_v6 = vld [vmem:[#allocation13 + $0xd8] sm:$0xff]  ;;  %1106 = vmatprep.mubr.f32.mxu1 %v4767_v5  ;;  %v1024_v8 = vld [vmem:[#allocation13 + $0xd0] sm:$0xff]  ;;  %v1023_v10 = vld [vmem:[#allocation13 + $0xc8] sm:$0xff]  ;;  %v1032_v1 = vlaneseq  ;;  %vm1207_vm2 = vcmask 64512   ;;  %s4771_s17 = smov 32   ;;  %vm1801_vm3 = vcmask 523264  }
  0xff   : > { %1043 = vmatpush1.msra.mxu1 %v1028_v2  ;;  %v920_v7 = vld [vmem:[#allocation10 + $0x78] sm:$0xff]  ;;  %v919_v9 = vld [vmem:[#allocation10 + $0x70] sm:$0xff]  ;;  %v918_v11 = vld [vmem:[#allocation10 + $0x68] sm:$0xff]  ;;  %3930 = vmatprep.mubr.msk.f32.mxu0 %vm4768_vm0, %v4767_v5  ;;  %vm1803_vm4 = vcmask 785408   ;;  %s5643_s19 = sld [smem:[#allocation49_spill]]  ;;  %s3725_s24 = sshll.u32 %s4909_s23, 7 }
 0x100   : > { %1044 = vmatprep.subr.mxu1 %v1027_v3  ;;  %3899 = vmatpush3.msra.mxu0 %v920_v7  ;;  %v1022_v12 = vld [vmem:[#allocation13 + $0xc0] sm:$0xff]  ;;  %v1021_v13 = vld [vmem:[#allocation13 + $0xb8] sm:$0xff]  ;;  %v1020_v15 = vld [vmem:[#allocation13 + $0xb0] sm:$0xff]  ;;  %v5207_v2 = vshrl.u32 %v1032_v1, 7  ;;  %s5644_s29 = sld [smem:[#allocation51_spill]]  ;;  %s874_s26 = scalar_lea.vmem [#allocation22], %s5133_s3 }
 0x101   : > { %1045 = vmatpush1.msra.mxu1 %v1026_v4  ;;  %3900 = vmatprep.subr.mxu0 %v4767_v5  ;;  %v917_v14 = vld [vmem:[#allocation10 + $0x60] sm:$0xff]  ;;  %v1019_v16 = vld [vmem:[#allocation13 + $0xa8] sm:$0xff]  ;;  %v1016_v23 = vld [vmem:[#allocation13 + $0x90] sm:$0xff]  ;;  %s3471_s18 = sshll.u32 %s874_s26, 4  ;;  %s3458_s2 = scalar_lea.sflag [#allocation4], %s5130_s22  ;;  %s3472_s18 = int_to_ptr.vmem [resolvable:$true] %s3471_s18 }
 0x102   : > { %1046 = vmatprep.subr.mxu1 %v1025_v6  ;;  %3901 = vmatpush3.msra.mxu0 %v919_v9  ;;  %v1018_v17 = vld [vmem:[#allocation13 + $0xa0] sm:$0xff]  ;;  %v1017_v18 = vld [vmem:[#allocation13 + $0x98] sm:$0xff]  ;;  %v1015_v25 = vld [vmem:[#allocation13 + $0x88] sm:$0xff]  ;;  %v5210_v3 = vsub.s32 0, %v5207_v2  ;;  %v5222_v9 = vsub.s32 1, %v5207_v2  ;;  %p5646_p7 = scmp.ne.s32.totalorder %s5622_s21, 0 }
 0x103   : > { %1047 = vmatpush1.msra.mxu1 %v1024_v8  ;;  %3902 = vmatprep.subr.mxu0 %v4767_v5  ;;  %v916_v24 = vld [vmem:[#allocation10 + $0x58] sm:$0xff]  ;;  %v1014_v26 = vld [vmem:[#allocation13 + $0x80] sm:$0xff]  ;;  %v915_v27 = vld [vmem:[#allocation10 + $0x50] sm:$0xff] }
 0x104   : > { %1048 = vmatprep.subr.mxu1 %v1023_v10  ;;  %3903 = vmatpush3.msra.mxu0 %v918_v11  ;;  %v1013_v28 = vld [vmem:[#allocation13 + $0x78] sm:$0xff]  ;;  %v1012_v29 = vld [vmem:[#allocation13 + $0x70] sm:$0xff]  ;;  %v914_v30 = vld [vmem:[#allocation10 + $0x48] sm:$0xff] }
 0x105   : > { %1049 = vmatpush1.msra.mxu1 %v1022_v12  ;;  %3904 = vmatprep.subr.mxu0 %v4767_v5  ;;  %v1011_v31 = vld [vmem:[#allocation13 + $0x68] sm:$0xff]  ;;  %v1010_v32 = vld [vmem:[#allocation13 + $0x60] sm:$0xff]  ;;  %v1009_v34 = vld [vmem:[#allocation13 + $0x58] sm:$0xff] }
 0x106   : > { %1050 = vmatprep.subr.mxu1 %v1021_v13  ;;  %3905 = vmatpush3.msra.mxu0 %v917_v14  ;;  %v913_v33 = vld [vmem:[#allocation10 + $0x40] sm:$0xff]  ;;  %v1008_v35 = vld [vmem:[#allocation13 + $0x50] sm:$0xff]  ;;  %v1007_v37 = vld [vmem:[#allocation13 + $0x48] sm:$0xff] }
 0x107   : > { %1051 = vmatpush1.msra.mxu1 %v1020_v15  ;;  %3906 = vmatprep.subr.mxu0 %v4767_v5  ;;  %v912_v36 = vld [vmem:[#allocation10 + $0x38] sm:$0xff]  ;;  %v1006_v38 = vld [vmem:[#allocation13 + $0x40] sm:$0xff]  ;;  %v911_v39 = vld [vmem:[#allocation10 + $0x30] sm:$0xff] }
 0x108   : > { %1052 = vmatprep.subr.mxu1 %v1019_v16  ;;  %3907 = vmatpush3.msra.mxu0 %v916_v24  ;;  %v1005_v40 = vld [vmem:[#allocation13 + $0x38] sm:$0xff]  ;;  %v1004_v41 = vld [vmem:[#allocation13 + $0x30] sm:$0xff]  ;;  %v910_v42 = vld [vmem:[#allocation10 + $0x28] sm:$0xff] }
 0x109   : > { %1053 = vmatpush1.msra.mxu1 %v1018_v17  ;;  %3908 = vmatprep.subr.mxu0 %v4767_v5  ;;  %v1003_v43 = vld [vmem:[#allocation13 + $0x28] sm:$0xff]  ;;  %v1002_v44 = vld [vmem:[#allocation13 + $0x20] sm:$0xff]  ;;  %v1001_v46 = vld [vmem:[#allocation13 + $0x18] sm:$0xff] }
 0x10a   : > { %1054 = vmatprep.subr.mxu1 %v1017_v18  ;;  %3909 = vmatpush3.msra.mxu0 %v915_v27  ;;  %v909_v45 = vld [vmem:[#allocation10 + $0x20] sm:$0xff]  ;;  %v1000_v47 = vld [vmem:[#allocation13 + $0x10] sm:$0xff]  ;;  %v999_v49 = vld [vmem:[#allocation13 + $0x8] sm:$0xff] }
 0x10b   : > { %1055 = vmatpush1.msra.mxu1 %v1016_v23  ;;  %3910 = vmatprep.subr.mxu0 %v4767_v5  ;;  %v908_v48 = vld [vmem:[#allocation10 + $0x18] sm:$0xff]  ;;  %v998_v50 = vld [vmem:[#allocation13] sm:$0xff]  ;;  %v907_v51 = vld [vmem:[#allocation10 + $0x10] sm:$0xff] }
 0x10c   : > { %1056 = vmatprep.subr.mxu1 %v1015_v25  ;;  %3911 = vmatpush3.msra.mxu0 %v914_v30  ;;  %v876_v52 = vld [vmem:[%s769_s4] sm:$0xff]  ;;  %v905_v54 = vld [vmem:[#allocation10] sm:$0xff]  ;;  %v3690_v59 = vld [vmem:[#allocation7] ss:$0 sm:$0xff]  ;;  %s5645_s4 = sld [smem:[#allocation52_spill]] }
 0x10d   : > { %1057 = vmatpush1.msra.mxu1 %v1014_v26  ;;  %3912 = vmatprep.subr.mxu0 %v4767_v5  ;;  %v906_v53 = vld [vmem:[#allocation10 + $0x8] sm:$0xff]  ;;  %v3691_v61 = vld [vmem:[#allocation8] ss:$0 sm:$0xff]  ;;  %v1030_v4 = vld [vmem:[%s5554_s7] sm:$0x3] }
 0x10e   : > { %1058 = vmatprep.subr.mxu1 %v1013_v28  ;;  %3913 = vmatpush3.msra.mxu0 %v913_v33  ;;  %v1035_v6 = vrot.slane %v1030_v4, %v5210_v3  ;;  %v1039_v10 = vrot.slane %v1030_v4, %v5222_v9  ;;  %v3692_v11 = vld [vmem:[#allocation11] ss:$0 sm:$0xff] }
 0x10f   : > { %1059 = vmatpush1.msra.mxu1 %v1012_v29  ;;  %3914 = vmatprep.subr.mxu0 %v4767_v5 }
 0x110   : > { %1060 = vmatprep.subr.mxu1 %v1011_v31  ;;  %3915 = vmatpush3.msra.mxu0 %v912_v36 }
 0x111   : > { %1061 = vmatpush1.msra.mxu1 %v1010_v32  ;;  %3916 = vmatprep.subr.mxu0 %v4767_v5 }
 0x112   : > { %1062 = vmatprep.subr.mxu1 %v1009_v34  ;;  %3917 = vmatpush3.msra.mxu0 %v911_v39  ;;  %s3469_s5 = scalar_lea.hbm %s5645_s4, %s3725_s24 }
 0x113   : > { %1063 = vmatpush1.msra.mxu1 %v1008_v35  ;;  %3918 = vmatprep.subr.mxu0 %v4767_v5 }
 0x114   : > { %1064 = vmatprep.subr.mxu1 %v1007_v37  ;;  %3919 = vmatpush3.msra.mxu0 %v910_v42 }
 0x115   : > { %1065 = vmatpush1.msra.mxu1 %v1006_v38  ;;  %3920 = vmatprep.subr.mxu0 %v4767_v5 }
 0x116   : > { %1066 = vmatprep.subr.mxu1 %v1005_v40  ;;  %3921 = vmatpush3.msra.mxu0 %v909_v45 }
 0x117   : > { %1067 = vmatpush1.msra.mxu1 %v1004_v41  ;;  %3922 = vmatprep.subr.mxu0 %v4767_v5 }
 0x118   : > { %1068 = vmatprep.subr.mxu1 %v1003_v43  ;;  %3923 = vmatpush3.msra.mxu0 %v908_v48 }
 0x119   : > { %1069 = vmatpush1.msra.mxu1 %v1002_v44  ;;  %3924 = vmatprep.subr.mxu0 %v4767_v5 }
 0x11a   : > { %1070 = vmatprep.subr.mxu1 %v1001_v46  ;;  %3925 = vmatpush3.msra.mxu0 %v907_v51 }
 0x11b   : > { %1071 = vmatpush1.msra.mxu1 %v1000_v47  ;;  %3926 = vmatprep.subr.mxu0 %v4767_v5 }
 0x11c   : > { %1072 = vmatprep.subr.mxu1 %v999_v49  ;;  %3927 = vmatpush3.msra.mxu0 %v906_v53 }
 0x11d   : > { %1073 = vmatpush1.msra.mxu1 %v998_v50  ;;  %3928 = vmatprep.subr.mxu0 %v4767_v5 }
 0x11e   : > { %1107 = vmatmul.mubr.f32.vlgmr.msra.gmra.mxu1 %v876_v52  ;;  %3933 = vmatprep.subr.mxu1 %v4767_v5 }
 0x11f   : > { %3935 = vmatprep.mubr.msk.f32.mxu1 %vm4768_vm0, %v4767_v5  ;;  %3929 = vmatpush3.msra.mxu0 %v905_v54 }
 0x120   : > { %3973 = vmatprep.subr.mxu0 %v4767_v5 }
 0x186   : > { %v880_v19 = vpop.xlane.xlu0 %879 }
 0x187   : > { %v882_v20 = vmul.f32 0.0078125, %v880_v19 }
 0x189   : > { %v5181_v21 = vsub.f32 %v5171_v0, %v882_v20 }
 0x18b   : > { %v884_v22 = vmul.f32 %v5181_v21, %v5181_v21 }
 0x18d   : > { %885 = vadd.xlane.f32.xlu0 %v884_v22 }
 0x1de   : > { %v1108_v7 = vpop.f32.mrf.mxu1 }
 0x1df   : > { %v5216_v8 = vadd.f32 %v1108_v7, %v1035_v6 }
 0x1e0   : > { %v1110_v12 = vpop.f32.mrf.mxu1 }
 0x1e1   : > { %3934 = vmatpush3.xpose.msk.msra.mxu1 %vm1130_vm1, %v5216_v8  ;;  %v5225_v15 = vadd.f32 %v1110_v12, %v1039_v10  ;;  %v1127_v12 = vld [vmem:[#allocation14 + $0x70] sm:$0xff] }
 0x1e2   : > { %3938 = vmatprep.subr.mxu1 %v4767_v5 }
 0x216   : > { %v886_v55 = vpop.xlane.xlu0 %885 }
 0x217   : > { %v887_v56 = vmul.f32 0.0078125, %v886_v55 }
 0x219   : > { %v888_v57 = vadd.f32 1e-05, %v887_v56 }
 0x21b   : > { %4283 = vrsqrt.f32 %v888_v57 }
 0x228   : > { %v4284_v58 = vpop.eup %4283 }
 0x229   : > { %v890_v60 = vmul.f32 %v4284_v58, %v5181_v21 }
 0x22b   : > { %v897_v62 = vmul.f32 %v3690_v59, %v890_v60 }
 0x22d   : > { %v904_v63 = vadd.f32 %v3691_v61, %v897_v62 }
 0x22f   : > { %3931 = vmatmul.mubr.f32.vlgmr.msra.gmra.mxu0 %v904_v63 }
 0x230   : > { %4005 = vmatprep.mubr.msk.f32.mxu0 %vm4768_vm0, %v4767_v5 }
 0x2ef   : > { %v994_v13 = vpop.f32.mrf.mxu0 }
 0x2f0   : > { %v995_v14 = vadd.f32 %v3692_v11, %v994_v13  ;;  %v1128_v11 = vld [vmem:[#allocation14 + $0x78] sm:$0xff]  ;;  %v1126_v13 = vld [vmem:[#allocation14 + $0x68] sm:$0xff] }
 0x2f1   : > { %v3932_v16 = vpop.f32.mrf.mxu0  ;;  %3974 = vmatpush3.msra.mxu0 %v1128_v11  ;;  %v1934_v11 = vld [vmem:[#allocation16 + $0xc8] sm:$0xff] }
 0x2f2   : > { %1292 = vrot.lane.b32.xlu0 %v995_v14, %s4769_s25  ;;  %3936 = vmatmul.mubr.msk.f32.vlgmr.msra.gmra.mxu1 %vm1130_vm1, %v995_v14  ;;  %v1123_v16 = vld [vmem:[#allocation14 + $0x50] sm:$0xff] }
 0x2f3   : > { %3939 = vmatpush3.msra.mxu1 %v5225_v15  ;;  %3940 = vmatprep.mubr.msk.f32.mxu1 %vm4768_vm0, %v4767_v5 }
 0x2f4   : > { %3943 = vmatprep.subr.mxu1 %v4767_v5  ;;  %3975 = vmatprep.subr.mxu0 %v4767_v5 }
 0x2f5   : > { %3976 = vmatpush3.msra.mxu0 %v1127_v12  ;;  %v1933_v12 = vld [vmem:[#allocation16 + $0xc0] sm:$0xff] }
 0x2f6   : > { %1381 = vrot.lane.b32.xlu0 %v5225_v15, %s4769_s25  ;;  %3977 = vmatprep.subr.mxu0 %v4767_v5 }
 0x2f7   : > { %3978 = vmatpush3.msra.mxu0 %v1126_v13  ;;  %v1935_v13 = vld [vmem:[#allocation16 + $0xd0] sm:$0xff] }
 0x2f8   : > { %3979 = vmatprep.subr.mxu0 %v4767_v5 }
 0x2fa   : > { %1460 = vrot.lane.b32.xlu0 %v5216_v8, %s4770_s20 }
 0x2fe   : > { %1458 = vrot.lane.b32.xlu0 %v995_v14, %s4770_s20 }
 0x364   : > { %v1293_v23 = vpop.permute.xlu0 %1292 }
 0x368   : > { %v1382_v26 = vpop.permute.xlu0 %1381 }
 0x36c   : > { %v1461_v35 = vpop.permute.xlu0 %1460 }
 0x370   : > { %v1459_v37 = vpop.permute.xlu0 %1458 }
 0x3b2   : > { %v1203_v17 = vpop.f32.mrf.mxu1 }
 0x3b3   : > { %v1208_v18 = vsel %vm1207_vm2, %v1203_v17, -inf }
 0x3b4   : > { %1209 = vmax.xlane.f32.xlu1 %v1208_v18  ;;  %v3937_v19 = vpop.f32.mrf.mxu1  ;;  %v1121_v18 = vld [vmem:[#allocation14 + $0x40] sm:$0xff] }
 0x3b5   : > { %v1120_v19 = vld [vmem:[#allocation14 + $0x38] sm:$0xff] }
 0x3c5   : > { %1294 = vrot.lane.b32.xlu1 %v5216_v8, %s4769_s25 }
 0x43d   : > { %v1210_v20 = vpop.xlane.xlu1 %1209 }
 0x43e   : > { %v1211_v21 = vsub.f32 %v1203_v17, %v1210_v20  ;;  %v1122_v17 = vld [vmem:[#allocation14 + $0x48] sm:$0xff]  ;;  %v1119_v20 = vld [vmem:[#allocation14 + $0x30] sm:$0xff] }
 0x440   : > { %v1212_v22 = vmul.f32 1.442695, %v1211_v21  ;;  %v1118_v21 = vld [vmem:[#allocation14 + $0x28] sm:$0xff] }
 0x441   : > { %v1295_v25 = vpop.permute.xlu1 %1294 }
 0x442   : > { %4285 = vpow2.f32 %v1212_v22  ;;  %v1117_v22 = vld [vmem:[#allocation14 + $0x20] sm:$0xff] }
 0x44f   : > { %v5241_v24 = vpop.eup %4285 }
 0x450   : > { %3941 = vmatmul.mubr.msk.f32.vlgmr.msra.gmra.mxu1 %vm1207_vm2, %v5241_v24  ;;  %v1214_v7 = vsel %vm1207_vm2, %v5241_v24, 0.0  ;;  %v1115_v24 = vld [vmem:[#allocation14 + $0x10] sm:$0xff] }
 0x451   : > { %3944 = vmatpush3.xpose.msk.msra.mxu1 %vm1130_vm1, %v1295_v25  ;;  %3945 = vmatprep.mubr.msk.f32.mxu1 %vm4768_vm0, %v4767_v5  ;;  %v1114_v25 = vld [vmem:[#allocation14 + $0x8] sm:$0xff] }
 0x452   : > { %3948 = vmatprep.subr.mxu1 %v4767_v5 }
 0x454   : > { %3946 = vmatmul.mubr.msk.f32.vlgmr.msra.gmra.mxu1 %vm1130_vm1, %v1293_v23  ;;  %v1116_v23 = vld [vmem:[#allocation14 + $0x18] sm:$0xff] }
 0x455   : > { %3949 = vmatpush3.msra.mxu1 %v1382_v26  ;;  %3950 = vmatprep.mubr.msk.f32.mxu1 %vm4768_vm0, %v4767_v5 }
 0x456   : > { %3953 = vmatprep.subr.mxu1 %v4767_v5 }
 0x510   : > { %v5253_v27 = vpop.f32.mrf.mxu1 }
 0x512   : > { %v3942_v28 = vpop.f32.mrf.mxu1 }
 0x513   : > { %v1113_v28 = vld [vmem:[#allocation14] sm:$0xff] }
 0x514   : > { %v1366_v29 = vpop.f32.mrf.mxu1 }
 0x515   : > { %v1370_v30 = vsel %vm1207_vm2, %v1366_v29, -inf }
 0x516   : > { %1371 = vmax.xlane.f32.xlu1 %v1370_v30  ;;  %v3947_v31 = vpop.f32.mrf.mxu1 }
 0x527   : > { %1546 = vrot.lane.b32.xlu1 %v5225_v15, %s4770_s20 }
 0x52b   : > { %1623 = vrot.lane.b32.xlu1 %v995_v14, %s4771_s17  ;;  %v1125_v14 = vld [vmem:[#allocation14 + $0x60] sm:$0xff] }
 0x52c   : > { %3980 = vmatpush3.msra.mxu0 %v1125_v14  ;;  %v1931_v14 = vld [vmem:[#allocation16 + $0xb0] sm:$0xff] }
 0x52d   : > { %3981 = vmatprep.subr.mxu0 %v4767_v5 }
 0x59f   : > { %v1372_v32 = vpop.xlane.xlu1 %1371 }
 0x5a0   : > { %v1373_v33 = vsub.f32 %v1366_v29, %v1372_v32 }
 0x5a2   : > { %v1374_v34 = vmul.f32 1.442695, %v1373_v33 }
 0x5a3   : > { %v1547_v38 = vpop.permute.xlu1 %1546 }
 0x5a4   : > { %4287 = vpow2.f32 %v1374_v34 }
 0x5a7   : > { %v1624_v50 = vpop.permute.xlu1 %1623 }
 0x5b1   : > { %v4288_v36 = vpop.eup %4287 }
 0x5b2   : > { %3951 = vmatmul.mubr.msk.f32.vlgmr.msra.gmra.mxu1 %vm1207_vm2, %v4288_v36  ;;  %v1376_v44 = vsel %vm1207_vm2, %v4288_v36, 0.0 }
 0x5b3   : > { %3954 = vmatpush3.xpose.msk.msra.mxu1 %vm1130_vm1, %v1461_v35  ;;  %3955 = vmatprep.mubr.msk.f32.mxu1 %vm4768_vm0, %v4767_v5 }
 0x5b4   : > { %3958 = vmatprep.subr.mxu1 %v4767_v5 }
 0x5b6   : > { %3956 = vmatmul.mubr.msk.f32.vlgmr.msra.gmra.mxu1 %vm1130_vm1, %v1459_v37 }
 0x5b7   : > { %3959 = vmatpush3.msra.mxu1 %v1547_v38  ;;  %3960 = vmatprep.mubr.msk.f32.mxu1 %vm4768_vm0, %v4767_v5 }
 0x5b8   : > { %3963 = vmatprep.subr.mxu1 %v4767_v5 }
 0x672   : > { %v1453_v39 = vpop.f32.mrf.mxu1 }
 0x674   : > { %v3952_v40 = vpop.f32.mrf.mxu1 }
 0x676   : > { %v1532_v41 = vpop.f32.mrf.mxu1 }
 0x677   : > { %v1536_v42 = vsel %vm1207_vm2, %v1532_v41, -inf }
 0x678   : > { %1537 = vmax.xlane.f32.xlu0 %v1536_v42  ;;  %v3957_v43 = vpop.f32.mrf.mxu1  ;;  %v3705_v42 = vld [vmem:[%s5556_s9] ss:$0 sm:$0xff] }
 0x68e   : > { %1625 = vrot.lane.b32.xlu0 %v5216_v8, %s4771_s17 }
 0x692   : > { %1711 = vrot.lane.b32.xlu0 %v5225_v15, %s4771_s17  ;;  %v1124_v15 = vld [vmem:[#allocation14 + $0x58] sm:$0xff] }
 0x693   : > { %3982 = vmatpush3.msra.mxu0 %v1124_v15  ;;  %v1930_v15 = vld [vmem:[#allocation16 + $0xa8] sm:$0xff] }
 0x694   : > { %3983 = vmatprep.subr.mxu0 %v4767_v5 }
 0x695   : > { %3984 = vmatpush3.msra.mxu0 %v1123_v16  ;;  %v1932_v16 = vld [vmem:[#allocation16 + $0xb8] sm:$0xff] }
 0x696   : > { %3985 = vmatprep.subr.mxu0 %v4767_v5 }
 0x697   : > { %3986 = vmatpush3.msra.mxu0 %v1122_v17  ;;  %v1928_v17 = vld [vmem:[#allocation16 + $0x98] sm:$0xff] }
 0x698   : > { %3987 = vmatprep.subr.mxu0 %v4767_v5 }
 0x699   : > { %3988 = vmatpush3.msra.mxu0 %v1121_v18  ;;  %v1927_v18 = vld [vmem:[#allocation16 + $0x90] sm:$0xff] }
 0x69a   : > { %3989 = vmatprep.subr.mxu0 %v4767_v5 }
 0x69b   : > { %3990 = vmatpush3.msra.mxu0 %v1120_v19  ;;  %v1929_v19 = vld [vmem:[#allocation16 + $0xa0] sm:$0xff] }
 0x69c   : > { %3991 = vmatprep.subr.mxu0 %v4767_v5 }
 0x69d   : > { %3992 = vmatpush3.msra.mxu0 %v1119_v20  ;;  %v1925_v20 = vld [vmem:[#allocation16 + $0x80] sm:$0xff] }
 0x69e   : > { %3993 = vmatprep.subr.mxu0 %v4767_v5 }
 0x69f   : > { %3994 = vmatpush3.msra.mxu0 %v1118_v21  ;;  %v1924_v21 = vld [vmem:[#allocation16 + $0x78] sm:$0xff] }
 0x6a0   : > { %3995 = vmatprep.subr.mxu0 %v4767_v5 }
 0x6a1   : > { %3996 = vmatpush3.msra.mxu0 %v1117_v22  ;;  %v1926_v22 = vld [vmem:[#allocation16 + $0x88] sm:$0xff] }
 0x6a2   : > { %3997 = vmatprep.subr.mxu0 %v4767_v5 }
 0x6a3   : > { %3998 = vmatpush3.msra.mxu0 %v1116_v23  ;;  %v1922_v23 = vld [vmem:[#allocation16 + $0x68] sm:$0xff] }
 0x6a4   : > { %3999 = vmatprep.subr.mxu0 %v4767_v5 }
 0x6a5   : > { %4000 = vmatpush3.msra.mxu0 %v1115_v24  ;;  %v1921_v24 = vld [vmem:[#allocation16 + $0x60] sm:$0xff] }
 0x6a6   : > { %4001 = vmatprep.subr.mxu0 %v4767_v5 }
 0x6a7   : > { %4002 = vmatpush3.msra.mxu0 %v1114_v25  ;;  %v1923_v25 = vld [vmem:[#allocation16 + $0x70] sm:$0xff] }
 0x6a8   : > { %4003 = vmatprep.subr.mxu0 %v4767_v5 }
 0x6a9   : > { %4004 = vmatpush3.msra.mxu0 %v1113_v28  ;;  %v1918_v28 = vld [vmem:[#allocation16 + $0x48] sm:$0xff] }
 0x6aa   : > { %4008 = vmatprep.subr.mxu0 %v4767_v5 }
 0x6b1   : > { %1377 = vadd.xlane.f32.xlu0 %v1376_v44 }
 0x701   : > { %v1538_v45 = vpop.xlane.xlu0 %1537 }
 0x702   : > { %v1539_v46 = vsub.f32 %v1532_v41, %v1538_v45 }
 0x704   : > { %v1540_v47 = vmul.f32 1.442695, %v1539_v46  ;;  %v1955_v46 = vld [vmem:[#allocation16 + $0x170] sm:$0xff] }
 0x705   : > { %v1626_v48 = vpop.permute.xlu0 %1625 }
 0x706   : > { %4289 = vpow2.f32 %v1540_v47  ;;  %v1954_v47 = vld [vmem:[#allocation16 + $0x168] sm:$0xff] }
 0x709   : > { %v1712_v51 = vpop.permute.xlu0 %1711 }
 0x713   : > { %v4290_v49 = vpop.eup %4289 }
 0x714   : > { %3961 = vmatmul.mubr.msk.f32.vlgmr.msra.gmra.mxu1 %vm1207_vm2, %v4290_v49  ;;  %v1542_v57 = vsel %vm1207_vm2, %v4290_v49, 0.0  ;;  %v1952_v49 = vld [vmem:[#allocation16 + $0x158] sm:$0xff] }
 0x715   : > { %3964 = vmatpush3.xpose.msk.msra.mxu1 %vm1130_vm1, %v1626_v48  ;;  %3965 = vmatprep.mubr.msk.f32.mxu1 %vm4768_vm0, %v4767_v5  ;;  %v1956_v48 = vld [vmem:[#allocation16 + $0x178] sm:$0xff] }
 0x716   : > { %3968 = vmatprep.subr.mxu1 %v4767_v5 }
 0x718   : > { %3966 = vmatmul.mubr.msk.f32.vlgmr.msra.gmra.mxu1 %vm1130_vm1, %v1624_v50  ;;  %v1951_v50 = vld [vmem:[#allocation16 + $0x150] sm:$0xff] }
 0x719   : > { %3969 = vmatpush3.msra.mxu1 %v1712_v51  ;;  %3970 = vmatprep.mubr.msk.f32.mxu1 %vm4768_vm0, %v4767_v5  ;;  %v1953_v51 = vld [vmem:[#allocation16 + $0x160] sm:$0xff] }
 0x71a   : > { %1974 = vmatprep.subr.mxu1 %v1955_v46 }
 0x73a   : > { %v1378_v4 = vpop.xlane.xlu0 %1377 }
 0x7d4   : > { %v1618_v52 = vpop.f32.mrf.mxu1 }
 0x7d6   : > { %v3962_v53 = vpop.f32.mrf.mxu1 }
 0x7d7   : > { %v1950_v53 = vld [vmem:[#allocation16 + $0x148] sm:$0xff] }
 0x7d8   : > { %v1697_v54 = vpop.f32.mrf.mxu1 }
 0x7d9   : > { %v1701_v55 = vsel %vm1207_vm2, %v1697_v54, -inf }
 0x7da   : > { %1702 = vmax.xlane.f32.xlu1 %v1701_v55  ;;  %v3967_v56 = vpop.f32.mrf.mxu1  ;;  %v1947_v55 = vld [vmem:[#allocation16 + $0x130] sm:$0xff] }
 0x7db   : > { %v1945_v56 = vld [vmem:[#allocation16 + $0x120] sm:$0xff] }
 0x7de   : > { %1543 = vadd.xlane.f32.xlu1 %v1542_v57 }
 0x863   : > { %v1703_v58 = vpop.xlane.xlu1 %1702 }
 0x864   : > { %v1704_v59 = vsub.f32 %v1697_v54, %v1703_v58  ;;  %v1948_v54 = vld [vmem:[#allocation16 + $0x138] sm:$0xff] }
 0x866   : > { %v1705_v60 = vmul.f32 1.442695, %v1704_v59 }
 0x867   : > { %v1544_v61 = vpop.xlane.xlu1 %1543 }
 0x868   : > { %4291 = vpow2.f32 %v1705_v60 }
 0x869   : > { %4293 = vrcp.f32 %v1544_v61  ;;  %v1943_v61 = vld [vmem:[#allocation16 + $0x110] sm:$0xff] }
 0x86a   : > { %4295 = vrcp.f32 %v1378_v4  ;;  %v1939_v4 = vld [vmem:[#allocation16 + $0xf0] sm:$0xff] }
 0x875   : > { %v4292_v62 = vpop.eup %4291 }
 0x876   : > { %v4294_v63 = vpop.eup %4293  ;;  %3971 = vmatmul.mubr.msk.f32.vlgmr.msra.gmra.mxu1 %vm1207_vm2, %v4292_v62  ;;  %v1707_v1 = vsel %vm1207_vm2, %v4292_v62, 0.0  ;;  %v1942_v62 = vld [vmem:[#allocation16 + $0x108] sm:$0xff] }
 0x877   : > { %1708 = vadd.xlane.f32.xlu1 %v1707_v1  ;;  %v1622_v6 = vmul.f32 %v4294_v63, %v1618_v52  ;;  %2038 = vmatprep.mubr.f32.mxu1 %v4767_v5  ;;  %v4296_v8 = vpop.eup %4295  ;;  %v1949_v52 = vld [vmem:[#allocation16 + $0x140] sm:$0xff]  ;;  %v1944_v63 = vld [vmem:[#allocation16 + $0x118] sm:$0xff] }
 0x878   : > { %v1457_v10 = vmul.f32 %v4296_v8, %v1453_v39  ;;  %1975 = vmatpush1.msra.mxu1 %v1954_v47  ;;  %v1940_v1 = vld [vmem:[#allocation16 + $0xf8] sm:$0xff] }
 0x879   : > { %1793 = vrot.lane.b32.xlu0 %v1622_v6, %s4770_s20  ;;  %1976 = vmatprep.subr.mxu1 %v1952_v49  ;;  %v1941_v6 = vld [vmem:[#allocation16 + $0x100] sm:$0xff]  ;;  %v1936_v8 = vld [vmem:[#allocation16 + $0xd8] sm:$0xff]  ;;  %v1969_v49 = vsub.s32 2, %v5207_v2 }
 0x87a   : > { %1977 = vmatpush1.msra.mxu1 %v1951_v50 }
 0x87b   : > { %1215 = vadd.xlane.f32.xlu1 %v1214_v7  ;;  %1978 = vmatprep.subr.mxu1 %v1949_v52  ;;  %v1937_v7 = vld [vmem:[#allocation16 + $0xe0] sm:$0xff] }
 0x87c   : > { %1979 = vmatpush1.msra.mxu1 %v1948_v54 }
 0x88c   : > { %1789 = vrot.lane.b32.xlu1 %v1457_v10, %s4771_s17  ;;  %v1938_v10 = vld [vmem:[#allocation16 + $0xe8] sm:$0xff] }
 0x8eb   : > { %v1794_v38 = vpop.permute.xlu0 %1793 }
 0x900   : > { %v1709_v26 = vpop.xlane.xlu1 %1708 }
 0x901   : > { %4297 = vrcp.f32 %v1709_v26  ;;  %v1919_v26 = vld [vmem:[#allocation16 + $0x50] sm:$0xff] }
 0x904   : > { %v1216_v33 = vpop.xlane.xlu1 %1215 }
 0x905   : > { %4299 = vrcp.f32 %v1216_v33  ;;  %v1913_v33 = vld [vmem:[#allocation16 + $0x20] sm:$0xff] }
 0x908   : > { %v1790_v36 = vpop.permute.xlu1 %1789 }
 0x90e   : > { %v4298_v29 = vpop.eup %4297 }
 0x912   : > { %v4300_v34 = vpop.eup %4299 }
 0x913   : > { %v1291_v35 = vmul.f32 %v4300_v34, %v5253_v27  ;;  %v1912_v34 = vld [vmem:[#allocation16 + $0x18] sm:$0xff] }
 0x915   : > { %v1800_v37 = vsel %vm1130_vm1, %v1291_v35, %v1790_v36  ;;  %v1914_v35 = vld [vmem:[#allocation16 + $0x28] sm:$0xff] }
 0x916   : > { %v1802_v39 = vsel %vm1801_vm3, %v1800_v37, %v1794_v38  ;;  %v1910_v36 = vld [vmem:[#allocation16 + $0x8] sm:$0xff]  ;;  %v1909_v37 = vld [vmem:[#allocation16] sm:$0xff]  ;;  %v1911_v38 = vld [vmem:[#allocation16 + $0x10] sm:$0xff] }
 0x936   : > { %v1783_v30 = vpop.f32.mrf.mxu1 }
 0x937   : > { %v1787_v31 = vmul.f32 %v4298_v29, %v1783_v30  ;;  %v1920_v29 = vld [vmem:[#allocation16 + $0x58] sm:$0xff] }
 0x938   : > { %v3972_v32 = vpop.f32.mrf.mxu1  ;;  %v1916_v30 = vld [vmem:[#allocation16 + $0x38] sm:$0xff] }
 0x939   : > { %1797 = vrot.lane.b32.xlu1 %v1787_v31, %s4769_s25  ;;  %v1915_v31 = vld [vmem:[#allocation16 + $0x30] sm:$0xff]  ;;  %v1917_v32 = vld [vmem:[#allocation16 + $0x40] sm:$0xff] }
 0x9ab   : > { %v1798_v40 = vpop.permute.xlu1 %1797 }
 0x9ac   : > { %v1804_v41 = vsel %vm1803_vm4, %v1802_v39, %v1798_v40 }
 0x9ad   : > { %4006 = vmatmul.mubr.f32.vlgmr.msra.gmra.mxu0 %v1804_v41 }
 0x9ae   : > { %4040 = vmatprep.mubr.msk.f32.mxu0 %vm4768_vm0, %v4767_v5  ;;  %4009 = vmatpush3.msra.mxu0 %v1956_v48  ;;  %v1957_v48 = vld [vmem:[%s5560_s13] sm:$0x7] }
 0x9af   : > { %4010 = vmatprep.subr.mxu0 %v4767_v5  ;;  %v1966_v50 = vrot.slane %v1957_v48, %v5222_v9 }
 0x9b0   : > { %4011 = vmatpush3.msra.mxu0 %v1953_v51 }
 0x9b1   : > { %4012 = vmatprep.subr.mxu0 %v4767_v5 }
 0x9b2   : > { %4013 = vmatpush3.msra.mxu0 %v1950_v53  ;;  %v1962_v53 = vrot.slane %v1957_v48, %v5210_v3 }
 0x9b3   : > { %4014 = vmatprep.subr.mxu0 %v4767_v5 }
 0x9b4   : > { %4015 = vmatpush3.msra.mxu0 %v1947_v55  ;;  %v1970_v55 = vrot.slane %v1957_v48, %v1969_v49 }
 0x9b5   : > { %4016 = vmatprep.subr.mxu0 %v4767_v5 }
 0x9b6   : > { %4017 = vmatpush3.msra.mxu0 %v1944_v63 }
 0x9b7   : > { %4018 = vmatprep.subr.mxu0 %v4767_v5 }
 0x9b8   : > { %4019 = vmatpush3.msra.mxu0 %v1941_v6 }
 0x9b9   : > { %4020 = vmatprep.subr.mxu0 %v4767_v5 }
 0x9ba   : > { %4021 = vmatpush3.msra.mxu0 %v1938_v10 }
 0x9bb   : > { %4022 = vmatprep.subr.mxu0 %v4767_v5 }
 0x9bc   : > { %4023 = vmatpush3.msra.mxu0 %v1935_v13 }
 0x9bd   : > { %4024 = vmatprep.subr.mxu0 %v4767_v5 }
 0x9be   : > { %4025 = vmatpush3.msra.mxu0 %v1932_v16 }
 0x9bf   : > { %4026 = vmatprep.subr.mxu0 %v4767_v5 }
 0x9c0   : > { %4027 = vmatpush3.msra.mxu0 %v1929_v19 }
 0x9c1   : > { %4028 = vmatprep.subr.mxu0 %v4767_v5 }
 0x9c2   : > { %4029 = vmatpush3.msra.mxu0 %v1926_v22 }
 0x9c3   : > { %4030 = vmatprep.subr.mxu0 %v4767_v5 }
 0x9c4   : > { %4031 = vmatpush3.msra.mxu0 %v1923_v25 }
 0x9c5   : > { %4032 = vmatprep.subr.mxu0 %v4767_v5 }
 0x9c6   : > { %4033 = vmatpush3.msra.mxu0 %v1920_v29 }
 0x9c7   : > { %4034 = vmatprep.subr.mxu0 %v4767_v5 }
 0x9c8   : > { %4035 = vmatpush3.msra.mxu0 %v1917_v32 }
 0x9c9   : > { %4036 = vmatprep.subr.mxu0 %v4767_v5 }
 0x9ca   : > { %4037 = vmatpush3.msra.mxu0 %v1914_v35 }
 0x9cb   : > { %4038 = vmatprep.subr.mxu0 %v4767_v5 }
 0x9cc   : > { %4039 = vmatpush3.msra.mxu0 %v1911_v38 }
 0x9cd   : > { %4083 = vmatprep.subr.mxu0 %v4767_v5 }
 0xa6d   : > { %v1877_v27 = vpop.f32.mrf.mxu0 }
 0xa6e   : > { %v1878_v43 = vadd.f32 %v3705_v42, %v1877_v27  ;;  %v3706_v27 = vld [vmem:[%s5557_s10] ss:$0 sm:$0xff] }
 0xa6f   : > { %v4007_v44 = vpop.f32.mrf.mxu0 }
 0xa70   : > { %v5318_v45 = vadd.f32 %v1878_v43, %v5171_v0  ;;  %v1946_v0 = vld [vmem:[#allocation16 + $0x128] sm:$0xff]  ;;  %v3707_v44 = vld [vmem:[%s5558_s11] ss:$0 sm:$0xff] }
 0xa71   : > { %1980 = vmatprep.subr.mxu1 %v1946_v0 }
 0xa72   : > { %1884 = vadd.xlane.f32.xlu1 %v5318_v45  ;;  %1981 = vmatpush1.msra.mxu1 %v1945_v56 }
 0xa73   : > { %1982 = vmatprep.subr.mxu1 %v1943_v61 }
 0xa74   : > { %1983 = vmatpush1.msra.mxu1 %v1942_v62 }
 0xa75   : > { %1984 = vmatprep.subr.mxu1 %v1940_v1 }
 0xa76   : > { %1985 = vmatpush1.msra.mxu1 %v1939_v4 }
 0xa77   : > { %1986 = vmatprep.subr.mxu1 %v1937_v7 }
 0xa78   : > { %1987 = vmatpush1.msra.mxu1 %v1936_v8 }
 0xa79   : > { %1988 = vmatprep.subr.mxu1 %v1934_v11 }
 0xa7a   : > { %1989 = vmatpush1.msra.mxu1 %v1933_v12 }
 0xa7b   : > { %1990 = vmatprep.subr.mxu1 %v1931_v14 }
 0xa7c   : > { %1991 = vmatpush1.msra.mxu1 %v1930_v15 }
 0xa7d   : > { %1992 = vmatprep.subr.mxu1 %v1928_v17 }
 0xa7e   : > { %1993 = vmatpush1.msra.mxu1 %v1927_v18 }
 0xa7f   : > { %1994 = vmatprep.subr.mxu1 %v1925_v20 }
 0xa80   : > { %1995 = vmatpush1.msra.mxu1 %v1924_v21 }
 0xa81   : > { %1996 = vmatprep.subr.mxu1 %v1922_v23 }
 0xa82   : > { %1997 = vmatpush1.msra.mxu1 %v1921_v24 }
 0xa83   : > { %1998 = vmatprep.subr.mxu1 %v1919_v26 }
 0xa84   : > { %1999 = vmatpush1.msra.mxu1 %v1918_v28 }
 0xa85   : > { %2000 = vmatprep.subr.mxu1 %v1916_v30 }
 0xa86   : > { %2001 = vmatpush1.msra.mxu1 %v1915_v31 }
 0xa87   : > { %2002 = vmatprep.subr.mxu1 %v1913_v33 }
 0xa88   : > { %2003 = vmatpush1.msra.mxu1 %v1912_v34 }
 0xa89   : > { %2004 = vmatprep.subr.mxu1 %v1910_v36 }
 0xa8a   : > { %2005 = vmatpush1.msra.mxu1 %v1909_v37 }
 0xa8b   : > { %4043 = vmatprep.subr.mxu1 %v4767_v5 }
 0xafb   : > { %v1885_v57 = vpop.xlane.xlu1 %1884 }
 0xafc   : > { %v1886_v58 = vmul.f32 0.0078125, %v1885_v57 }
 0xafe   : > { %v5326_v59 = vsub.f32 %v5318_v45, %v1886_v58 }
 0xb00   : > { %v1888_v60 = vmul.f32 %v5326_v59, %v5326_v59 }
 0xb02   : > { %1889 = vadd.xlane.f32.xlu0 %v1888_v60 }
 0xb8b   : > { %v1890_v39 = vpop.xlane.xlu0 %1889 }
 0xb8c   : > { %v1891_v40 = vmul.f32 0.0078125, %v1890_v39 }
 0xb8e   : > { %v1892_v41 = vadd.f32 1e-05, %v1891_v40 }
 0xb90   : > { %4301 = vrsqrt.f32 %v1892_v41 }
 0xb9d   : > { %v4302_v42 = vpop.eup %4301 }
 0xb9e   : > { %v1894_v43 = vmul.f32 %v4302_v42, %v5326_v59 }
 0xba0   : > { %v1901_v46 = vmul.f32 %v3706_v27, %v1894_v43 }
 0xba2   : > { %v1908_v47 = vadd.f32 %v3707_v44, %v1901_v46 }
 0xba4   : > { %2039 = vmatmul.mubr.f32.vlgmr.msra.gmra.mxu1 %v1908_v47  ;;  %4041 = vmatmul.mubr.f32.vlgmr.msra.gmra.mxu0 %v1908_v47 }
 0xba5   : > { %4045 = vmatprep.mubr.msk.f32.mxu1 %vm4768_vm0, %v4767_v5  ;;  %4115 = vmatprep.mubr.msk.f32.mxu0 %vm4768_vm0, %v4767_v5 }
 0xc64   : > { %v2040_v51 = vpop.f32.mrf.mxu1  ;;  %v2111_v52 = vpop.f32.mrf.mxu0 }
 0xc65   : > { %v2041_v57 = vadd.f32 %v2040_v51, %v1962_v53  ;;  %v2112_v58 = vadd.f32 %v2111_v52, %v1970_v55  ;;  %v2129_v55 = vld [vmem:[#allocation17 + $0x70] sm:$0xff] }
 0xc66   : > { %v2042_v54 = vpop.f32.mrf.mxu1  ;;  %v4042_v0 = vpop.f32.mrf.mxu0 }
 0xc67   : > { %v5362_v56 = vadd.f32 %v2042_v54, %v1966_v50  ;;  %v2130_v0 = vld [vmem:[#allocation17 + $0x78] sm:$0xff] }
 0xc68   : > { %4084 = vmatpush3.msra.mxu0 %v2130_v0  ;;  %v2950_v0 = vld [vmem:[#allocation19 + $0x158] sm:$0xff] }
 0xc69   : > { %2294 = vrot.lane.b32.xlu1 %v5362_v56, %s4769_s25  ;;  %4044 = vmatpush3.xpose.msk.msra.mxu1 %vm1130_vm1, %v5362_v56 }
 0xc6a   : > { %4048 = vmatprep.subr.mxu1 %v4767_v5  ;;  %4085 = vmatprep.subr.mxu0 %v4767_v5 }
 0xc6b   : > { %4086 = vmatpush3.msra.mxu0 %v2129_v55  ;;  %v2947_v55 = vld [vmem:[#allocation19 + $0x140] sm:$0xff] }
 0xc6c   : > { %4046 = vmatmul.mubr.msk.f32.vlgmr.msra.gmra.mxu1 %vm1130_vm1, %v2041_v57  ;;  %4087 = vmatprep.subr.mxu0 %v4767_v5 }
 0xc6d   : > { %4049 = vmatpush3.msra.mxu1 %v2112_v58  ;;  %4050 = vmatprep.mubr.msk.f32.mxu1 %vm4768_vm0, %v4767_v5 }
 0xc6e   : > { %4053 = vmatprep.subr.mxu1 %v4767_v5 }
 0xcdb   : > { %v2295_v7 = vpop.permute.xlu1 %2294 }
 0xd2c   : > { %v2204_v59 = vpop.f32.mrf.mxu1 }
 0xd2d   : > { %v2208_v60 = vsel %vm1207_vm2, %v2204_v59, -inf }
 0xd2e   : > { %2209 = vmax.xlane.f32.xlu0 %v2208_v60  ;;  %v4047_v61 = vpop.f32.mrf.mxu1  ;;  %v2124_v60 = vld [vmem:[#allocation17 + $0x48] sm:$0xff] }
 0xd2f   : > { %v2123_v61 = vld [vmem:[#allocation17 + $0x40] sm:$0xff] }
 0xd44   : > { %2292 = vrot.lane.b32.xlu0 %v2041_v57, %s4769_s25 }
 0xd48   : > { %2381 = vrot.lane.b32.xlu0 %v2112_v58, %s4769_s25 }
 0xd4c   : > { %2460 = vrot.lane.b32.xlu0 %v5362_v56, %s4770_s20 }
 0xd50   : > { %2458 = vrot.lane.b32.xlu0 %v2041_v57, %s4770_s20 }
 0xdb7   : > { %v2210_v62 = vpop.xlane.xlu0 %2209 }
 0xdb8   : > { %v2211_v63 = vsub.f32 %v2204_v59, %v2210_v62  ;;  %v2125_v59 = vld [vmem:[#allocation17 + $0x50] sm:$0xff]  ;;  %v2122_v62 = vld [vmem:[#allocation17 + $0x38] sm:$0xff] }
 0xdba   : > { %v2212_v1 = vmul.f32 1.442695, %v2211_v63  ;;  %v2121_v63 = vld [vmem:[#allocation17 + $0x30] sm:$0xff] }
 0xdbb   : > { %v2293_v4 = vpop.permute.xlu0 %2292 }
 0xdbc   : > { %4303 = vpow2.f32 %v2212_v1  ;;  %v2120_v1 = vld [vmem:[#allocation17 + $0x28] sm:$0xff] }
 0xdbf   : > { %v2382_v8 = vpop.permute.xlu0 %2381 }
 0xdc3   : > { %v2461_v18 = vpop.permute.xlu0 %2460 }
 0xdc7   : > { %v2459_v20 = vpop.permute.xlu0 %2458 }
 0xdc9   : > { %v5379_v6 = vpop.eup %4303 }
 0xdca   : > { %4051 = vmatmul.mubr.msk.f32.vlgmr.msra.gmra.mxu1 %vm1207_vm2, %v5379_v6  ;;  %v2214_v52 = vsel %vm1207_vm2, %v5379_v6, 0.0  ;;  %v2118_v6 = vld [vmem:[#allocation17 + $0x18] sm:$0xff] }
 0xdcb   : > { %4054 = vmatpush3.xpose.msk.msra.mxu1 %vm1130_vm1, %v2295_v7  ;;  %4055 = vmatprep.mubr.msk.f32.mxu1 %vm4768_vm0, %v4767_v5  ;;  %v2117_v7 = vld [vmem:[#allocation17 + $0x10] sm:$0xff] }
 0xdcc   : > { %4058 = vmatprep.subr.mxu1 %v4767_v5 }
 0xdce   : > { %4056 = vmatmul.mubr.msk.f32.vlgmr.msra.gmra.mxu1 %vm1130_vm1, %v2293_v4  ;;  %v2119_v4 = vld [vmem:[#allocation17 + $0x20] sm:$0xff] }
 0xdcf   : > { %4059 = vmatpush3.msra.mxu1 %v2382_v8  ;;  %4060 = vmatprep.mubr.msk.f32.mxu1 %vm4768_vm0, %v4767_v5  ;;  %v2116_v8 = vld [vmem:[#allocation17 + $0x8] sm:$0xff] }
 0xdd0   : > { %4063 = vmatprep.subr.mxu1 %v4767_v5 }
 0xe8a   : > { %v5391_v10 = vpop.f32.mrf.mxu1 }
 0xe8c   : > { %v4052_v11 = vpop.f32.mrf.mxu1 }
 0xe8e   : > { %v2366_v12 = vpop.f32.mrf.mxu1 }
 0xe8f   : > { %v2370_v13 = vsel %vm1207_vm2, %v2366_v12, -inf }
 0xe90   : > { %2371 = vmax.xlane.f32.xlu1 %v2370_v13  ;;  %v4057_v14 = vpop.f32.mrf.mxu1 }
 0xea1   : > { %2546 = vrot.lane.b32.xlu1 %v2112_v58, %s4770_s20 }
 0xea5   : > { %2623 = vrot.lane.b32.xlu1 %v2041_v57, %s4771_s17  ;;  %v2127_v57 = vld [vmem:[#allocation17 + $0x60] sm:$0xff] }
 0xf19   : > { %v2372_v15 = vpop.xlane.xlu1 %2371 }
 0xf1a   : > { %v2373_v16 = vsub.f32 %v2366_v12, %v2372_v15  ;;  %v2115_v12 = vld [vmem:[#allocation17] sm:$0xff] }
 0xf1c   : > { %v2374_v17 = vmul.f32 1.442695, %v2373_v16 }
 0xf1d   : > { %v2547_v21 = vpop.permute.xlu1 %2546 }
 0xf1e   : > { %4305 = vpow2.f32 %v2374_v17 }
 0xf21   : > { %v2624_v34 = vpop.permute.xlu1 %2623 }
 0xf2b   : > { %v4306_v19 = vpop.eup %4305 }
 0xf2c   : > { %4061 = vmatmul.mubr.msk.f32.vlgmr.msra.gmra.mxu1 %vm1207_vm2, %v4306_v19  ;;  %v2376_v28 = vsel %vm1207_vm2, %v4306_v19, 0.0 }
 0xf2d   : > { %4064 = vmatpush3.xpose.msk.msra.mxu1 %vm1130_vm1, %v2461_v18  ;;  %4065 = vmatprep.mubr.msk.f32.mxu1 %vm4768_vm0, %v4767_v5 }
 0xf2e   : > { %4068 = vmatprep.subr.mxu1 %v4767_v5 }
 0xf30   : > { %4066 = vmatmul.mubr.msk.f32.vlgmr.msra.gmra.mxu1 %vm1130_vm1, %v2459_v20 }
 0xf31   : > { %4069 = vmatpush3.msra.mxu1 %v2547_v21  ;;  %4070 = vmatprep.mubr.msk.f32.mxu1 %vm4768_vm0, %v4767_v5 }
 0xf32   : > { %4073 = vmatprep.subr.mxu1 %v4767_v5 }
 0xfec   : > { %v2453_v22 = vpop.f32.mrf.mxu1 }
 0xfee   : > { %v4062_v23 = vpop.f32.mrf.mxu1 }
 0xff0   : > { %v2532_v24 = vpop.f32.mrf.mxu1 }
 0xff1   : > { %v2536_v25 = vsel %vm1207_vm2, %v2532_v24, -inf }
 0xff2   : > { %2537 = vmax.xlane.f32.xlu0 %v2536_v25  ;;  %v4067_v26 = vpop.f32.mrf.mxu1 }
 0xff3   : > { %v3720_v26 = vld [vmem:[%s5562_s15] ss:$0 sm:$0xff] }
0x1008   : > { %2625 = vrot.lane.b32.xlu0 %v5362_v56, %s4771_s17  ;;  %v2128_v56 = vld [vmem:[#allocation17 + $0x68] sm:$0xff] }
0x1009   : > { %4088 = vmatpush3.msra.mxu0 %v2128_v56  ;;  %v2949_v56 = vld [vmem:[#allocation19 + $0x150] sm:$0xff] }
0x100a   : > { %4089 = vmatprep.subr.mxu0 %v4767_v5 }
0x100b   : > { %4090 = vmatpush3.msra.mxu0 %v2127_v57  ;;  %v2944_v57 = vld [vmem:[#allocation19 + $0x128] sm:$0xff] }
0x100c   : > { %2711 = vrot.lane.b32.xlu0 %v2112_v58, %s4771_s17  ;;  %v2126_v58 = vld [vmem:[#allocation17 + $0x58] sm:$0xff]  ;;  %4091 = vmatprep.subr.mxu0 %v4767_v5 }
0x100d   : > { %4092 = vmatpush3.msra.mxu0 %v2126_v58  ;;  %v2946_v58 = vld [vmem:[#allocation19 + $0x138] sm:$0xff] }
0x100e   : > { %4093 = vmatprep.subr.mxu0 %v4767_v5 }
0x100f   : > { %4094 = vmatpush3.msra.mxu0 %v2125_v59  ;;  %v2943_v59 = vld [vmem:[#allocation19 + $0x120] sm:$0xff] }
0x1010   : > { %4095 = vmatprep.subr.mxu0 %v4767_v5 }
0x1011   : > { %4096 = vmatpush3.msra.mxu0 %v2124_v60  ;;  %v2945_v60 = vld [vmem:[#allocation19 + $0x130] sm:$0xff] }
0x1012   : > { %4097 = vmatprep.subr.mxu0 %v4767_v5 }
0x1013   : > { %4098 = vmatpush3.msra.mxu0 %v2123_v61  ;;  %v2940_v61 = vld [vmem:[#allocation19 + $0x108] sm:$0xff] }
0x1014   : > { %4099 = vmatprep.subr.mxu0 %v4767_v5 }
0x1015   : > { %4100 = vmatpush3.msra.mxu0 %v2122_v62  ;;  %v2942_v62 = vld [vmem:[#allocation19 + $0x118] sm:$0xff] }
0x1016   : > { %4101 = vmatprep.subr.mxu0 %v4767_v5 }
0x1017   : > { %4102 = vmatpush3.msra.mxu0 %v2121_v63  ;;  %v2939_v63 = vld [vmem:[#allocation19 + $0x100] sm:$0xff] }
0x1018   : > { %4103 = vmatprep.subr.mxu0 %v4767_v5 }
0x1019   : > { %4104 = vmatpush3.msra.mxu0 %v2120_v1  ;;  %v2941_v1 = vld [vmem:[#allocation19 + $0x110] sm:$0xff] }
0x101a   : > { %4105 = vmatprep.subr.mxu0 %v4767_v5 }
0x101b   : > { %4106 = vmatpush3.msra.mxu0 %v2119_v4  ;;  %v2936_v4 = vld [vmem:[#allocation19 + $0xe8] sm:$0xff] }
0x101c   : > { %4107 = vmatprep.subr.mxu0 %v4767_v5 }
0x101d   : > { %4108 = vmatpush3.msra.mxu0 %v2118_v6  ;;  %v2938_v6 = vld [vmem:[#allocation19 + $0xf8] sm:$0xff] }
0x101e   : > { %4109 = vmatprep.subr.mxu0 %v4767_v5 }
0x101f   : > { %4110 = vmatpush3.msra.mxu0 %v2117_v7  ;;  %v2935_v7 = vld [vmem:[#allocation19 + $0xe0] sm:$0xff] }
0x1020   : > { %4111 = vmatprep.subr.mxu0 %v4767_v5 }
0x1021   : > { %4112 = vmatpush3.msra.mxu0 %v2116_v8  ;;  %v2937_v8 = vld [vmem:[#allocation19 + $0xf0] sm:$0xff] }
0x1022   : > { %4113 = vmatprep.subr.mxu0 %v4767_v5 }
0x1023   : > { %4114 = vmatpush3.msra.mxu0 %v2115_v12  ;;  %v2934_v12 = vld [vmem:[#allocation19 + $0xd8] sm:$0xff] }
0x102b   : > { %2377 = vadd.xlane.f32.xlu0 %v2376_v28 }
0x107b   : > { %v2538_v29 = vpop.xlane.xlu0 %2537 }
0x107c   : > { %v2539_v30 = vsub.f32 %v2532_v24, %v2538_v29 }
0x107e   : > { %v2540_v31 = vmul.f32 1.442695, %v2539_v30 }
0x107f   : > { %v2626_v32 = vpop.permute.xlu0 %2625 }
0x1080   : > { %4307 = vpow2.f32 %v2540_v31  ;;  %v2968_v31 = vld [vmem:[#allocation19 + $0x1e8] sm:$0xff] }
0x1083   : > { %v2712_v35 = vpop.permute.xlu0 %2711 }
0x108d   : > { %v4308_v33 = vpop.eup %4307 }
0x108e   : > { %4071 = vmatmul.mubr.msk.f32.vlgmr.msra.gmra.mxu1 %vm1207_vm2, %v4308_v33  ;;  %v2542_v41 = vsel %vm1207_vm2, %v4308_v33, 0.0  ;;  %v2967_v33 = vld [vmem:[#allocation19 + $0x1e0] sm:$0xff] }
0x108f   : > { %4074 = vmatpush3.xpose.msk.msra.mxu1 %vm1130_vm1, %v2626_v32  ;;  %4075 = vmatprep.mubr.msk.f32.mxu1 %vm4768_vm0, %v4767_v5  ;;  %v2970_v32 = vld [vmem:[#allocation19 + $0x1f8] sm:$0xff] }
0x1090   : > { %4078 = vmatprep.subr.mxu1 %v4767_v5  ;;  %3064 = vmatprep.subr.mxu0 %v2970_v32  ;;  %v2912_v32 = vld [vmem:[#allocation19 + $0x28] sm:$0xff] }
0x1092   : > { %4076 = vmatmul.mubr.msk.f32.vlgmr.msra.gmra.mxu1 %vm1130_vm1, %v2624_v34  ;;  %v2969_v34 = vld [vmem:[#allocation19 + $0x1f0] sm:$0xff] }
0x1093   : > { %4079 = vmatpush3.msra.mxu1 %v2712_v35  ;;  %4080 = vmatprep.mubr.msk.f32.mxu1 %vm4768_vm0, %v4767_v5  ;;  %v2964_v35 = vld [vmem:[#allocation19 + $0x1c8] sm:$0xff] }
0x1094   : > { %2993 = vmatprep.subr.mxu1 %v2968_v31  ;;  %v2917_v31 = vld [vmem:[#allocation19 + $0x50] sm:$0xff] }
0x10b4   : > { %v2378_v50 = vpop.xlane.xlu0 %2377 }
0x114e   : > { %v2618_v36 = vpop.f32.mrf.mxu1 }
0x1150   : > { %v4072_v37 = vpop.f32.mrf.mxu1 }
0x1151   : > { %v2965_v37 = vld [vmem:[#allocation19 + $0x1d0] sm:$0xff] }
0x1152   : > { %v2697_v38 = vpop.f32.mrf.mxu1 }
0x1153   : > { %v2701_v39 = vsel %vm1207_vm2, %v2697_v38, -inf }
0x1154   : > { %2702 = vmax.xlane.f32.xlu1 %v2701_v39  ;;  %v4077_v40 = vpop.f32.mrf.mxu1  ;;  %v2962_v39 = vld [vmem:[#allocation19 + $0x1b8] sm:$0xff] }
0x1155   : > { %v2961_v40 = vld [vmem:[#allocation19 + $0x1b0] sm:$0xff] }
0x1158   : > { %2543 = vadd.xlane.f32.xlu1 %v2542_v41  ;;  %v2956_v41 = vld [vmem:[#allocation19 + $0x188] sm:$0xff] }
0x11dd   : > { %v2703_v42 = vpop.xlane.xlu1 %2702 }
0x11de   : > { %v2704_v27 = vsub.f32 %v2697_v38, %v2703_v42  ;;  %v2960_v38 = vld [vmem:[#allocation19 + $0x1a8] sm:$0xff]  ;;  %v2958_v42 = vld [vmem:[#allocation19 + $0x198] sm:$0xff] }
0x11e0   : > { %v2705_v43 = vmul.f32 1.442695, %v2704_v27  ;;  %v2955_v27 = vld [vmem:[#allocation19 + $0x180] sm:$0xff] }
0x11e1   : > { %v2544_v44 = vpop.xlane.xlu1 %2543 }
0x11e2   : > { %4309 = vpow2.f32 %v2705_v43  ;;  %v2957_v43 = vld [vmem:[#allocation19 + $0x190] sm:$0xff] }
0x11e3   : > { %4311 = vrcp.f32 %v2544_v44 }
0x11e4   : > { %4313 = vrcp.f32 %v2378_v50  ;;  %v2952_v50 = vld [vmem:[#allocation19 + $0x168] sm:$0xff] }
0x11ef   : > { %v4310_v46 = vpop.eup %4309 }
0x11f0   : > { %v4312_v47 = vpop.eup %4311  ;;  %4081 = vmatmul.mubr.msk.f32.vlgmr.msra.gmra.mxu1 %vm1207_vm2, %v4310_v46  ;;  %v2707_v48 = vsel %vm1207_vm2, %v4310_v46, 0.0 }
0x11f1   : > { %2708 = vadd.xlane.f32.xlu1 %v2707_v48  ;;  %v2622_v51 = vmul.f32 %v4312_v47, %v2618_v36  ;;  %3057 = vmatprep.mubr.f32.mxu1 %v4767_v5  ;;  %v4314_v53 = vpop.eup %4313  ;;  %v2963_v36 = vld [vmem:[#allocation19 + $0x1c0] sm:$0xff] }
0x11f2   : > { %v2457_v54 = vmul.f32 %v4314_v53, %v2453_v22  ;;  %2994 = vmatpush1.msra.mxu1 %v2967_v33  ;;  %v2953_v53 = vld [vmem:[#allocation19 + $0x170] sm:$0xff]  ;;  %v2914_v33 = vld [vmem:[#allocation19 + $0x38] sm:$0xff] }
0x11f3   : > { %2793 = vrot.lane.b32.xlu0 %v2622_v51, %s4770_s20  ;;  %2995 = vmatprep.subr.mxu1 %v2964_v35  ;;  %v2954_v51 = vld [vmem:[#allocation19 + $0x178] sm:$0xff]  ;;  %v2913_v35 = vld [vmem:[#allocation19 + $0x30] sm:$0xff]  ;;  %s5642_s20 = sld [smem:[#allocation47_spill]] }
0x11f4   : > { %2996 = vmatpush1.msra.mxu1 %v2963_v36  ;;  %v2910_v36 = vld [vmem:[#allocation19 + $0x18] sm:$0xff] }
0x11f5   : > { %2215 = vadd.xlane.f32.xlu1 %v2214_v52  ;;  %2997 = vmatprep.subr.mxu1 %v2960_v38  ;;  %v2951_v52 = vld [vmem:[#allocation19 + $0x160] sm:$0xff]  ;;  %v2909_v38 = vld [vmem:[#allocation19 + $0x10] sm:$0xff] }
0x1206   : > { %2789 = vrot.lane.b32.xlu1 %v2457_v54, %s4771_s17  ;;  %v2948_v54 = vld [vmem:[#allocation19 + $0x148] sm:$0xff] }
0x1265   : > { %v2794_v22 = vpop.permute.xlu0 %2793 }
0x127a   : > { %v2709_v11 = vpop.xlane.xlu1 %2708 }
0x127b   : > { %4315 = vrcp.f32 %v2709_v11  ;;  %v2932_v11 = vld [vmem:[#allocation19 + $0xc8] sm:$0xff] }
0x127e   : > { %v2216_v17 = vpop.xlane.xlu1 %2215 }
0x127f   : > { %4317 = vrcp.f32 %v2216_v17  ;;  %v2927_v17 = vld [vmem:[#allocation19 + $0xa0] sm:$0xff] }
0x1282   : > { %v2790_v20 = vpop.permute.xlu1 %2789 }
0x1288   : > { %v4316_v13 = vpop.eup %4315 }
0x128c   : > { %v4318_v18 = vpop.eup %4317 }
0x128d   : > { %v2291_v19 = vmul.f32 %v4318_v18, %v5391_v10  ;;  %v2929_v18 = vld [vmem:[#allocation19 + $0xb0] sm:$0xff] }
0x128f   : > { %v2800_v21 = vsel %vm1130_vm1, %v2291_v19, %v2790_v20  ;;  %v2924_v19 = vld [vmem:[#allocation19 + $0x88] sm:$0xff]  ;;  %v2926_v20 = vld [vmem:[#allocation19 + $0x98] sm:$0xff] }
0x1290   : > { %v2801_v23 = vsel %vm1801_vm3, %v2800_v21, %v2794_v22  ;;  %v2923_v21 = vld [vmem:[#allocation19 + $0x80] sm:$0xff]  ;;  %v2925_v22 = vld [vmem:[#allocation19 + $0x90] sm:$0xff] }
0x12b0   : > { %v2783_v14 = vpop.f32.mrf.mxu1 }
0x12b1   : > { %v2787_v15 = vmul.f32 %v4316_v13, %v2783_v14  ;;  %v2931_v13 = vld [vmem:[#allocation19 + $0xc0] sm:$0xff]  ;;  %v2933_v14 = vld [vmem:[#allocation19 + $0xd0] sm:$0xff] }
0x12b2   : > { %v4082_v16 = vpop.f32.mrf.mxu1 }
0x12b3   : > { %2797 = vrot.lane.b32.xlu1 %v2787_v15, %s4769_s25  ;;  %v2928_v15 = vld [vmem:[#allocation19 + $0xa8] sm:$0xff]  ;;  %v2930_v16 = vld [vmem:[#allocation19 + $0xb8] sm:$0xff]  ;;  %s4653_s25 = scalar_lea.vmem %s3472_s18, 128 }
0x12b4   : > { %p4654_p5 = scmp.ne.s32.totalorder %s3472_s18, %s4653_s25 }
0x12b6   : > { %p4655_p6 = pnand %p4654_p5, %p5646_p7 }
0x12b8   : > { %p4656_p13 = pneg %p4655_p6 }
0x1325   : > { %v2798_v24 = vpop.permute.xlu1 %2797 }
0x1326   : > { %v2802_v25 = vsel %vm1803_vm4, %v2801_v23, %v2798_v24  ;;  %v2920_v23 = vld [vmem:[#allocation19 + $0x68] sm:$0xff]  ;;  %v2922_v24 = vld [vmem:[#allocation19 + $0x78] sm:$0xff] }
0x1327   : > { %4116 = vmatmul.mubr.f32.vlgmr.msra.gmra.mxu0 %v2802_v25  ;;  %v2919_v25 = vld [vmem:[#allocation19 + $0x60] sm:$0xff] }
0x1328   : > { %3128 = vmatprep.mubr.f32.mxu0 %v4767_v5  ;;  %v2966_v5 = vld [vmem:[#allocation19 + $0x1d8] sm:$0xff]  ;;  %3065 = vmatpush1.msra.mxu0 %v2969_v34  ;;  %v2911_v34 = vld [vmem:[#allocation19 + $0x20] sm:$0xff] }
0x1329   : > { %3066 = vmatprep.subr.mxu0 %v2966_v5  ;;  %v2908_v5 = vld [vmem:[#allocation19 + $0x8] sm:$0xff] }
0x132a   : > { %3067 = vmatpush1.msra.mxu0 %v2965_v37  ;;  %v2907_v37 = vld [vmem:[#allocation19] sm:$0xff] }
0x132b   : > { %3068 = vmatprep.subr.mxu0 %v2962_v39 }
0x132c   : > { %3069 = vmatpush1.msra.mxu0 %v2961_v40 }
0x132d   : > { %3070 = vmatprep.subr.mxu0 %v2958_v42  ;;  %v3721_v42 = vld [vmem:[%s5563_s16] ss:$0 sm:$0xff] }
0x132e   : > { %3071 = vmatpush1.msra.mxu0 %v2957_v43  ;;  %v3722_v43 = vld [vmem:[%s5642_s20] ss:$0 sm:$0xff]  ;;  %s4772_s20 = smov [#allocation22]  }
0x132f   : > { %3072 = vmatprep.subr.mxu0 %v2954_v51  ;;  %v3258_v51 = vld [vmem:[#allocation20 + $0x78] sm:$0xff]  ;;  %s4657_s17 = sshll.u32 %s4772_s20, 4  ;;  %s4658_s17 = int_to_ptr.vmem [resolvable:$false] %s4657_s17 }
0x1330   : > { %3073 = vmatpush1.msra.mxu0 %v2953_v53  ;;  %v3273_v53 = vld [vmem:[#allocation20 + $0xf0] sm:$0xff]  ;;  %s4659_s23 = scalar_lea.vmem %s4658_s17, 256  ;;  %p4660_p9 = scmp.lt.s32.totalorder %s3472_s18, %s4658_s17 }
0x1331   : > { %3074 = vmatprep.subr.mxu0 %v2950_v0  ;;  %v3289_v0 = vld [vmem:[#allocation20 + $0x170] sm:$0xff]  ;;  %p4661_p10 = scmp.lt.s32.totalorder %s4659_s23, %s4653_s25 }
0x1332   : > { %3075 = vmatpush1.msra.mxu0 %v2949_v56  ;;  %v3304_v56 = vld [vmem:[#allocation20 + $0x1e8] sm:$0xff] }
0x1333   : > { %3076 = vmatprep.subr.mxu0 %v2946_v58  ;;  %v3288_v58 = vld [vmem:[#allocation20 + $0x168] sm:$0xff]  ;;  %p4662_p11 = por %p4661_p10, %p4660_p9 }
0x1334   : > { %3077 = vmatpush1.msra.mxu0 %v2945_v60  ;;  %v3303_v60 = vld [vmem:[#allocation20 + $0x1e0] sm:$0xff] }
0x1335   : > { %3078 = vmatprep.subr.mxu0 %v2942_v62  ;;  %v3287_v62 = vld [vmem:[#allocation20 + $0x160] sm:$0xff]  ;;  %p4663_p12 = pnand %p4662_p11, %p4656_p13 }
0x1336   : > { %3079 = vmatpush1.msra.mxu0 %v2941_v1  ;;  %v3302_v1 = vld [vmem:[#allocation20 + $0x1d8] sm:$0xff] }
0x1337   : > { %3080 = vmatprep.subr.mxu0 %v2938_v6  ;;  %v3286_v6 = vld [vmem:[#allocation20 + $0x158] sm:$0xff] }
0x1338   : > { %3081 = vmatpush1.msra.mxu0 %v2937_v8  ;;  %v3301_v8 = vld [vmem:[#allocation20 + $0x1d0] sm:$0xff] }
0x1339   : > { %3082 = vmatprep.subr.mxu0 %v2934_v12  ;;  %v3285_v12 = vld [vmem:[#allocation20 + $0x150] sm:$0xff] }
0x133a   : > { %3083 = vmatpush1.msra.mxu0 %v2933_v14  ;;  %v3300_v14 = vld [vmem:[#allocation20 + $0x1c8] sm:$0xff] }
0x133b   : > { %3084 = vmatprep.subr.mxu0 %v2930_v16  ;;  %v3284_v16 = vld [vmem:[#allocation20 + $0x148] sm:$0xff] }
0x133c   : > { %3085 = vmatpush1.msra.mxu0 %v2929_v18  ;;  %v3299_v18 = vld [vmem:[#allocation20 + $0x1c0] sm:$0xff] }
0x133d   : > { %3086 = vmatprep.subr.mxu0 %v2926_v20  ;;  %v3283_v20 = vld [vmem:[#allocation20 + $0x140] sm:$0xff] }
0x133e   : > { %3087 = vmatpush1.msra.mxu0 %v2925_v22  ;;  %v3298_v22 = vld [vmem:[#allocation20 + $0x1b8] sm:$0xff] }
0x133f   : > { %3088 = vmatprep.subr.mxu0 %v2922_v24  ;;  %v3282_v24 = vld [vmem:[#allocation20 + $0x138] sm:$0xff] }
0x13e7   : > { %v2875_v28 = vpop.f32.mrf.mxu0 }
0x13e8   : > { %v2876_v29 = vadd.f32 %v3720_v26, %v2875_v28  ;;  %v2921_v26 = vld [vmem:[#allocation19 + $0x70] sm:$0xff]  ;;  %v2916_v28 = vld [vmem:[#allocation19 + $0x48] sm:$0xff] }
0x13e9   : > { %v4117_v30 = vpop.f32.mrf.mxu0  ;;  %3089 = vmatpush1.msra.mxu0 %v2921_v26  ;;  %v3297_v26 = vld [vmem:[#allocation20 + $0x1b0] sm:$0xff] }
0x13ea   : > { %v5452_v10 = vadd.f32 %v2876_v29, %v5318_v45  ;;  %v2959_v45 = vld [vmem:[#allocation19 + $0x1a0] sm:$0xff]  ;;  %v2918_v29 = vld [vmem:[#allocation19 + $0x58] sm:$0xff] }
0x13eb   : > { %2998 = vmatpush1.msra.mxu1 %v2959_v45  ;;  %v2915_v30 = vld [vmem:[#allocation19 + $0x40] sm:$0xff]  ;;  %3090 = vmatprep.subr.mxu0 %v2918_v29  ;;  %v3281_v29 = vld [vmem:[#allocation20 + $0x130] sm:$0xff] }
0x13ec   : > { %2882 = vadd.xlane.f32.xlu1 %v5452_v10  ;;  %2999 = vmatprep.subr.mxu1 %v2956_v41 }
0x13ed   : > { %3000 = vmatpush1.msra.mxu1 %v2955_v27  ;;  %3091 = vmatpush1.msra.mxu0 %v2917_v31  ;;  %v3296_v31 = vld [vmem:[#allocation20 + $0x1a8] sm:$0xff] }
0x13ee   : > { %3001 = vmatprep.subr.mxu1 %v2952_v50  ;;  %3092 = vmatprep.subr.mxu0 %v2914_v33  ;;  %v3306_v50 = vld [vmem:[#allocation20 + $0x1f8] sm:$0xff]  ;;  %v3280_v33 = vld [vmem:[#allocation20 + $0x128] sm:$0xff] }
0x13ef   : > { %3002 = vmatpush1.msra.mxu1 %v2951_v52  ;;  %3093 = vmatpush1.msra.mxu0 %v2913_v35  ;;  %v3290_v52 = vld [vmem:[#allocation20 + $0x178] sm:$0xff]  ;;  %v3295_v35 = vld [vmem:[#allocation20 + $0x1a0] sm:$0xff] }
0x13f0   : > { %3003 = vmatprep.subr.mxu1 %v2948_v54  ;;  %3094 = vmatprep.subr.mxu0 %v2910_v36  ;;  %v3305_v54 = vld [vmem:[#allocation20 + $0x1f0] sm:$0xff]  ;;  %v3279_v36 = vld [vmem:[#allocation20 + $0x120] sm:$0xff] }
0x13f1   : > { %3004 = vmatpush1.msra.mxu1 %v2947_v55  ;;  %3095 = vmatpush1.msra.mxu0 %v2909_v38  ;;  %v3272_v55 = vld [vmem:[#allocation20 + $0xe8] sm:$0xff]  ;;  %v3294_v38 = vld [vmem:[#allocation20 + $0x198] sm:$0xff] }
0x13f2   : > { %3005 = vmatprep.subr.mxu1 %v2944_v57  ;;  %3863 = vmatprep.subr.mxu0 %v3306_v50  ;;  %v3256_v57 = vld [vmem:[#allocation20 + $0x68] sm:$0xff]  ;;  %v3259_v50 = vld [vmem:[#allocation20 + $0x80] sm:$0xff] }
0x13f3   : > { %3006 = vmatpush1.msra.mxu1 %v2943_v59  ;;  %v3271_v59 = vld [vmem:[#allocation20 + $0xe0] sm:$0xff] }
0x13f4   : > { %3007 = vmatprep.subr.mxu1 %v2940_v61  ;;  %v3255_v61 = vld [vmem:[#allocation20 + $0x60] sm:$0xff] }
0x13f5   : > { %3008 = vmatpush1.msra.mxu1 %v2939_v63  ;;  %v3270_v63 = vld [vmem:[#allocation20 + $0xd8] sm:$0xff] }
0x13f6   : > { %3009 = vmatprep.subr.mxu1 %v2936_v4  ;;  %v3254_v4 = vld [vmem:[#allocation20 + $0x58] sm:$0xff] }
0x13f7   : > { %3010 = vmatpush1.msra.mxu1 %v2935_v7  ;;  %v3269_v7 = vld [vmem:[#allocation20 + $0xd0] sm:$0xff] }
0x13f8   : > { %3011 = vmatprep.subr.mxu1 %v2932_v11  ;;  %v3253_v11 = vld [vmem:[#allocation20 + $0x50] sm:$0xff] }
0x13f9   : > { %3012 = vmatpush1.msra.mxu1 %v2931_v13  ;;  %v3268_v13 = vld [vmem:[#allocation20 + $0xc8] sm:$0xff] }
0x13fa   : > { %3013 = vmatprep.subr.mxu1 %v2928_v15  ;;  %v3252_v15 = vld [vmem:[#allocation20 + $0x48] sm:$0xff] }
0x13fb   : > { %3014 = vmatpush1.msra.mxu1 %v2927_v17  ;;  %v3267_v17 = vld [vmem:[#allocation20 + $0xc0] sm:$0xff] }
0x13fc   : > { %3015 = vmatprep.subr.mxu1 %v2924_v19  ;;  %v3251_v19 = vld [vmem:[#allocation20 + $0x40] sm:$0xff] }
0x13fd   : > { %3016 = vmatpush1.msra.mxu1 %v2923_v21  ;;  %v3266_v21 = vld [vmem:[#allocation20 + $0xb8] sm:$0xff] }
0x13fe   : > { %3017 = vmatprep.subr.mxu1 %v2920_v23  ;;  %v3250_v23 = vld [vmem:[#allocation20 + $0x38] sm:$0xff] }
0x13ff   : > { %3018 = vmatpush1.msra.mxu1 %v2919_v25  ;;  %v3265_v25 = vld [vmem:[#allocation20 + $0xb0] sm:$0xff] }
0x1400   : > { %3019 = vmatprep.subr.mxu1 %v2916_v28  ;;  %v3249_v28 = vld [vmem:[#allocation20 + $0x30] sm:$0xff] }
0x1401   : > { %3020 = vmatpush1.msra.mxu1 %v2915_v30  ;;  %v3264_v30 = vld [vmem:[#allocation20 + $0xa8] sm:$0xff] }
0x1402   : > { %3021 = vmatprep.subr.mxu1 %v2912_v32  ;;  %v3248_v32 = vld [vmem:[#allocation20 + $0x28] sm:$0xff] }
0x1403   : > { %3022 = vmatpush1.msra.mxu1 %v2911_v34  ;;  %v3263_v34 = vld [vmem:[#allocation20 + $0xa0] sm:$0xff] }
0x1404   : > { %3023 = vmatprep.subr.mxu1 %v2908_v5  ;;  %v3247_v5 = vld [vmem:[#allocation20 + $0x20] sm:$0xff] }
0x1405   : > { %3024 = vmatpush1.msra.mxu1 %v2907_v37  ;;  %v3262_v37 = vld [vmem:[#allocation20 + $0x98] sm:$0xff] }
0x1475   : > { %v2883_v44 = vpop.xlane.xlu1 %2882 }
0x1476   : > { %v2884_v46 = vmul.f32 0.0078125, %v2883_v44 }
0x1478   : > { %v5456_v47 = vsub.f32 %v5452_v10, %v2884_v46 }
0x147a   : > { %v2886_v48 = vmul.f32 %v5456_v47, %v5456_v47 }
0x147c   : > { %2887 = vadd.xlane.f32.xlu0 %v2886_v48  ;;  %v3274_v48 = vld [vmem:[#allocation20 + $0xf8] sm:$0xff] }
0x147d   : > { %3828 = vmatprep.subr.mxu1 %v3274_v48  ;;  %v3276_v48 = vld [vmem:[#allocation20 + $0x108] sm:$0xff] }
0x1505   : > { %v2888_v39 = vpop.xlane.xlu0 %2887 }
0x1506   : > { %v2889_v45 = vmul.f32 0.0078125, %v2888_v39  ;;  %v3246_v39 = vld [vmem:[#allocation20 + $0x18] sm:$0xff] }
0x1508   : > { %v2890_v40 = vadd.f32 1e-05, %v2889_v45  ;;  %v3278_v45 = vld [vmem:[#allocation20 + $0x118] sm:$0xff] }
0x150a   : > { %4319 = vrsqrt.f32 %v2890_v40  ;;  %v3261_v40 = vld [vmem:[#allocation20 + $0x90] sm:$0xff] }
0x1517   : > { %v4320_v41 = vpop.eup %4319 }
0x1518   : > { %v2892_v27 = vmul.f32 %v4320_v41, %v5456_v47  ;;  %v3257_v47 = vld [vmem:[#allocation20 + $0x70] sm:$0xff] }
0x1519   : > { %v3293_v41 = vld [vmem:[#allocation20 + $0x190] sm:$0xff] }
0x151a   : > { %v2899_v44 = vmul.f32 %v3721_v42, %v2892_v27  ;;  %v3245_v42 = vld [vmem:[#allocation20 + $0x10] sm:$0xff] }
0x151b   : > { %v3277_v27 = vld [vmem:[#allocation20 + $0x110] sm:$0xff] }
0x151c   : > { %v2906_v46 = vadd.f32 %v3722_v43, %v2899_v44  ;;  %v3260_v43 = vld [vmem:[#allocation20 + $0x88] sm:$0xff] }
0x151d   : > { %v3292_v44 = vld [vmem:[#allocation20 + $0x188] sm:$0xff] }
0x151e   : > { %3058 = vmatmul.mubr.f32.vlgmr.msra.gmra.mxu1 %v2906_v46  ;;  %3129 = vmatmul.mubr.f32.vlgmr.msra.gmra.mxu0 %v2906_v46  ;;  %v3244_v46 = vld [vmem:[#allocation20 + $0x8] sm:$0xff] }
0x151f   : > { %3829 = vmatpush3.msra.mxu1 %v3258_v51  ;;  %3864 = vmatpush3.msra.mxu0 %v3290_v52  ;;  %v3291_v51 = vld [vmem:[#allocation20 + $0x180] sm:$0xff] }
0x1520   : > { %3830 = vmatprep.subr.mxu1 %v3273_v53  ;;  %3865 = vmatprep.subr.mxu0 %v3305_v54  ;;  %v3243_v52 = vld [vmem:[#allocation20] sm:$0xff]  ;;  %v2971_v54 = vld [vmem:[%s5643_s19] sm:$0xf] }
0x1521   : > { %3831 = vmatpush3.msra.mxu1 %v3257_v47  ;;  %3866 = vmatpush3.msra.mxu0 %v3289_v0  ;;  %v3275_v53 = vld [vmem:[#allocation20 + $0x100] sm:$0xff]  ;;  %v2987_v47 = vsub.s32 3, %v5207_v2  ;;  %v2976_v0 = vrot.slane %v2971_v54, %v5210_v3 }
0x1522   : > { %3832 = vmatprep.subr.mxu1 %v3272_v55  ;;  %3867 = vmatprep.subr.mxu0 %v3304_v56  ;;  %v2984_v55 = vrot.slane %v2971_v54, %v1969_v49 }
0x1523   : > { %3833 = vmatpush3.msra.mxu1 %v3256_v57  ;;  %3868 = vmatpush3.msra.mxu0 %v3288_v58  ;;  %v2980_v58 = vrot.slane %v2971_v54, %v5222_v9 }
0x1524   : > { %3834 = vmatprep.subr.mxu1 %v3271_v59  ;;  %3869 = vmatprep.subr.mxu0 %v3303_v60  ;;  %v2988_v59 = vrot.slane %v2971_v54, %v2987_v47 }
0x1525   : > { %3835 = vmatpush3.msra.mxu1 %v3255_v61  ;;  %3870 = vmatpush3.msra.mxu0 %v3287_v62 }
0x1526   : > { %3836 = vmatprep.subr.mxu1 %v3270_v63  ;;  %3871 = vmatprep.subr.mxu0 %v3302_v1 }
0x1527   : > { %3837 = vmatpush3.msra.mxu1 %v3254_v4  ;;  %3872 = vmatpush3.msra.mxu0 %v3286_v6 }
0x1528   : > { %3838 = vmatprep.subr.mxu1 %v3269_v7  ;;  %3873 = vmatprep.subr.mxu0 %v3301_v8 }
0x1529   : > { %3839 = vmatpush3.msra.mxu1 %v3253_v11  ;;  %3874 = vmatpush3.msra.mxu0 %v3285_v12 }
0x152a   : > { %3840 = vmatprep.subr.mxu1 %v3268_v13  ;;  %3875 = vmatprep.subr.mxu0 %v3300_v14 }
0x152b   : > { %3841 = vmatpush3.msra.mxu1 %v3252_v15  ;;  %3876 = vmatpush3.msra.mxu0 %v3284_v16 }
0x152c   : > { %3842 = vmatprep.subr.mxu1 %v3267_v17  ;;  %3877 = vmatprep.subr.mxu0 %v3299_v18 }
0x152d   : > { %3843 = vmatpush3.msra.mxu1 %v3251_v19  ;;  %3878 = vmatpush3.msra.mxu0 %v3283_v20 }
0x152e   : > { %3844 = vmatprep.subr.mxu1 %v3266_v21  ;;  %3879 = vmatprep.subr.mxu0 %v3298_v22 }
0x152f   : > { %3845 = vmatpush3.msra.mxu1 %v3250_v23  ;;  %3880 = vmatpush3.msra.mxu0 %v3282_v24 }
0x1530   : > { %3846 = vmatprep.subr.mxu1 %v3265_v25  ;;  %3881 = vmatprep.subr.mxu0 %v3297_v26 }
0x1531   : > { %3847 = vmatpush3.msra.mxu1 %v3249_v28  ;;  %3882 = vmatpush3.msra.mxu0 %v3281_v29 }
0x1532   : > { %3848 = vmatprep.subr.mxu1 %v3264_v30  ;;  %3883 = vmatprep.subr.mxu0 %v3296_v31 }
0x1533   : > { %3849 = vmatpush3.msra.mxu1 %v3248_v32  ;;  %3884 = vmatpush3.msra.mxu0 %v3280_v33 }
0x1534   : > { %3850 = vmatprep.subr.mxu1 %v3263_v34  ;;  %3885 = vmatprep.subr.mxu0 %v3295_v35 }
0x1535   : > { %3851 = vmatpush3.msra.mxu1 %v3247_v5  ;;  %3886 = vmatpush3.msra.mxu0 %v3279_v36 }
0x1536   : > { %3852 = vmatprep.subr.mxu1 %v3262_v37  ;;  %3887 = vmatprep.subr.mxu0 %v3294_v38 }
0x1537   : > { %3853 = vmatpush3.msra.mxu1 %v3246_v39  ;;  %3888 = vmatpush3.msra.mxu0 %v3278_v45 }
0x1538   : > { %3854 = vmatprep.subr.mxu1 %v3261_v40  ;;  %3889 = vmatprep.subr.mxu0 %v3293_v41 }
0x1539   : > { %3855 = vmatpush3.msra.mxu1 %v3245_v42  ;;  %3890 = vmatpush3.msra.mxu0 %v3277_v27 }
0x153a   : > { %3856 = vmatprep.subr.mxu1 %v3260_v43  ;;  %3891 = vmatprep.subr.mxu0 %v3292_v44 }
0x153b   : > { %3857 = vmatpush3.msra.mxu1 %v3244_v46  ;;  %3892 = vmatpush3.msra.mxu0 %v3276_v48 }
0x153c   : > { %3858 = vmatprep.subr.mxu1 %v3259_v50  ;;  %3893 = vmatprep.subr.mxu0 %v3291_v51 }
0x153d   : > { %3859 = vmatpush3.msra.mxu1 %v3243_v52  ;;  %3894 = vmatpush3.msra.mxu0 %v3275_v53 }
0x15de   : > { %v3059_v56 = vpop.f32.mrf.mxu1  ;;  %v3130_v57 = vpop.f32.mrf.mxu0 }
0x15df   : > { %v5475_v60 = vadd.f32 %v3059_v56, %v2976_v0  ;;  %v5477_v61 = vadd.f32 %v3130_v57, %v2984_v55 }
0x15e0   : > { %v3061_v62 = vpop.f32.mrf.mxu1  ;;  %v3132_v63 = vpop.f32.mrf.mxu0 }
0x15e1   : > { %v5480_v1 = vmul.f32 0.70710677, %v5475_v60  ;;  %v5483_v4 = vmul.f32 0.70710677, %v5477_v61  ;;  %v5485_v3 = vadd.f32 %v3061_v62, %v2980_v58  ;;  %v5487_v2 = vadd.f32 %v3132_v63, %v2988_v59 }
0x15e3   : > { %v3143_v49 = vand.u32 2147483647, %v5480_v1  ;;  %v3145_v9 = vand.u32 2147483647, %v5483_v4  ;;  %v5492_v6 = vmul.f32 0.70710677, %v5485_v3 }
0x15e4   : > { %v5495_v7 = vmul.f32 0.70710677, %v5487_v2  ;;  %vm3223_vm5 = vcmp.lt.f32.partialorder %v5480_v1, 0.0  ;;  %vm3225_vm6 = vcmp.lt.f32.partialorder %v5483_v4, 0.0  ;;  %v3135_v1 = vmul.f32 0.5, %v5475_v60 }
0x15e5   : > { %v3147_v8 = vmul.f32 0.3275911, %v3143_v49  ;;  %v3149_v11 = vmul.f32 0.3275911, %v3145_v9  ;;  %v3144_v12 = vand.u32 2147483647, %v5492_v6 }
0x15e6   : > { %v3146_v13 = vand.u32 2147483647, %v5495_v7  ;;  %v3199_v20 = vsub.f32 0.0, %v3143_v49  ;;  %v3201_v21 = vsub.f32 0.0, %v3145_v9  ;;  %vm3224_vm7 = vcmp.lt.f32.partialorder %v5492_v6, 0.0 }
0x15e7   : > { %v3151_v14 = vadd.f32 1.0, %v3147_v8  ;;  %v3153_v15 = vadd.f32 1.0, %v3149_v11  ;;  %v3148_v16 = vmul.f32 0.3275911, %v3144_v12  ;;  %v3200_v23 = vsub.f32 0.0, %v3144_v12 }
0x15e8   : > { %v3150_v17 = vmul.f32 0.3275911, %v3146_v13  ;;  %v3203_v22 = vmul.f32 %v3199_v20, %v3143_v49  ;;  %v3205_v24 = vmul.f32 %v3201_v21, %v3145_v9  ;;  %v3202_v25 = vsub.f32 0.0, %v3146_v13 }
0x15e9   : > { %4321 = vrcp.f32 %v3151_v14  ;;  %v3152_v18 = vadd.f32 1.0, %v3148_v16  ;;  %v3204_v31 = vmul.f32 %v3200_v23, %v3144_v12  ;;  %vm3226_vm8 = vcmp.lt.f32.partialorder %v5495_v7, 0.0 }
0x15ea   : > { %4323 = vrcp.f32 %v3153_v15  ;;  %v3154_v19 = vadd.f32 1.0, %v3150_v17  ;;  %v3207_v30 = vmul.f32 1.442695, %v3203_v22  ;;  %v3211_v33 = vmul.f32 1.442695, %v3205_v24 }
0x15eb   : > { %4325 = vrcp.f32 %v3152_v18  ;;  %v3206_v34 = vmul.f32 %v3202_v25, %v3146_v13  ;;  %v3209_v38 = vmul.f32 1.442695, %v3204_v31  ;;  %v3137_v6 = vmul.f32 0.5, %v5477_v61  ;;  %v3723_v61 = vld [vmem:[%s5644_s29] ss:$0 sm:$0xff] }
0x15ec   : > { %4327 = vrcp.f32 %v3154_v19 }
0x15ed   : > { %4329 = vpow2.f32 %v3207_v30  ;;  %v3213_v41 = vmul.f32 1.442695, %v3206_v34 }
0x15ee   : > { %4331 = vpow2.f32 %v3211_v33 }
0x15ef   : > { %4333 = vpow2.f32 %v3209_v38 }
0x15f0   : > { %4335 = vpow2.f32 %v3213_v41 }
0x15f6   : > { %v4322_v26 = vpop.eup %4321 }
0x15f7   : > { %v4324_v28 = vpop.eup %4323  ;;  %v3163_v29 = vmul.f32 1.0614054, %v4322_v26 }
0x15f8   : > { %v3165_v32 = vmul.f32 1.0614054, %v4324_v28  ;;  %v4326_v5 = vpop.eup %4325 }
0x15f9   : > { %v3167_v35 = vadd.f32 -1.4531521, %v3163_v29  ;;  %v3164_v39 = vmul.f32 1.0614054, %v4326_v5  ;;  %v4328_v45 = vpop.eup %4327 }
0x15fa   : > { %v3169_v36 = vadd.f32 -1.4531521, %v3165_v32  ;;  %v3166_v43 = vmul.f32 1.0614054, %v4328_v45  ;;  %v4330_v11 = vpop.eup %4329 }
0x15fb   : > { %v3171_v37 = vmul.f32 %v4322_v26, %v3167_v35  ;;  %v3168_v27 = vadd.f32 -1.4531521, %v3164_v39  ;;  %v4332_v13 = vpop.eup %4331 }
0x15fc   : > { %v3173_v40 = vmul.f32 %v4324_v28, %v3169_v36  ;;  %v3170_v50 = vadd.f32 -1.4531521, %v3166_v43  ;;  %v4334_v21 = vpop.eup %4333 }
0x15fd   : > { %v3175_v42 = vadd.f32 1.4214138, %v3171_v37  ;;  %v3172_v48 = vmul.f32 %v4326_v5, %v3168_v27  ;;  %v4336_v29 = vpop.eup %4335  ;;  %v3136_v37 = vmul.f32 0.5, %v5485_v3 }
0x15fe   : > { %v3177_v44 = vadd.f32 1.4214138, %v3173_v40  ;;  %v3174_v54 = vmul.f32 %v4328_v45, %v3170_v50  ;;  %v3138_v40 = vmul.f32 0.5, %v5487_v2 }
0x15ff   : > { %v3179_v46 = vmul.f32 %v4322_v26, %v3175_v42  ;;  %v3176_v53 = vadd.f32 1.4214138, %v3172_v48 }
0x1600   : > { %v3181_v51 = vmul.f32 %v4324_v28, %v3177_v44  ;;  %v3178_v56 = vadd.f32 1.4214138, %v3174_v54 }
0x1601   : > { %v3183_v52 = vadd.f32 -0.28449672, %v3179_v46  ;;  %v3180_v55 = vmul.f32 %v4326_v5, %v3176_v53 }
0x1602   : > { %v3185_v47 = vadd.f32 -0.28449672, %v3181_v51  ;;  %v3182_v62 = vmul.f32 %v4328_v45, %v3178_v56 }
0x1603   : > { %v3187_v0 = vmul.f32 %v4322_v26, %v3183_v52  ;;  %v3184_v59 = vadd.f32 -0.28449672, %v3180_v55 }
0x1604   : > { %v3189_v57 = vmul.f32 %v4324_v28, %v3185_v47  ;;  %v3186_v8 = vadd.f32 -0.28449672, %v3182_v62 }
0x1605   : > { %v3191_v58 = vadd.f32 0.2548296, %v3187_v0  ;;  %v3188_v9 = vmul.f32 %v4326_v5, %v3184_v59 }
0x1606   : > { %v3193_v63 = vadd.f32 0.2548296, %v3189_v57  ;;  %v3190_v16 = vmul.f32 %v4328_v45, %v3186_v8 }
0x1607   : > { %v3195_v49 = vmul.f32 %v4322_v26, %v3191_v58  ;;  %v3192_v15 = vadd.f32 0.2548296, %v3188_v9 }
0x1608   : > { %v3197_v12 = vmul.f32 %v4324_v28, %v3193_v63  ;;  %v3194_v20 = vadd.f32 0.2548296, %v3190_v16 }
0x1609   : > { %v3215_v14 = vmul.f32 %v4330_v11, %v3195_v49  ;;  %v3196_v19 = vmul.f32 %v4326_v5, %v3192_v15 }
0x160a   : > { %v3217_v17 = vmul.f32 %v4332_v13, %v3197_v12  ;;  %v3198_v25 = vmul.f32 %v4328_v45, %v3194_v20 }
0x160b   : > { %v3219_v18 = vsub.f32 1.0, %v3215_v14  ;;  %v3216_v24 = vmul.f32 %v4334_v21, %v3196_v19 }
0x160c   : > { %v3221_v22 = vsub.f32 1.0, %v3217_v17  ;;  %v3218_v31 = vmul.f32 %v4336_v29, %v3198_v25 }
0x160d   : > { %v3227_v23 = vsub.f32 0.0, %v3219_v18  ;;  %v3220_v26 = vsub.f32 1.0, %v3216_v24 }
0x160e   : > { %v3229_v30 = vsub.f32 0.0, %v3221_v22  ;;  %v3222_v33 = vsub.f32 1.0, %v3218_v31 }
0x160f   : > { %v3231_v28 = vsel %vm3223_vm5, %v3227_v23, %v3219_v18  ;;  %v3228_v32 = vsub.f32 0.0, %v3220_v26 }
0x1610   : > { %v3233_v34 = vsel %vm3225_vm6, %v3229_v30, %v3221_v22  ;;  %v3235_v35 = vadd.f32 1.0, %v3231_v28  ;;  %v3230_v36 = vsub.f32 0.0, %v3222_v33 }
0x1611   : > { %v3232_v5 = vsel %vm3224_vm7, %v3228_v32, %v3220_v26  ;;  %v3237_v39 = vadd.f32 1.0, %v3233_v34 }
0x1612   : > { %v3236_v38 = vadd.f32 1.0, %v3232_v5  ;;  %v3234_v45 = vsel %vm3226_vm8, %v3230_v36, %v3222_v33  ;;  %v3239_v42 = vmul.f32 %v3235_v35, %v3135_v1 }
0x1613   : > { %v3238_v41 = vadd.f32 1.0, %v3234_v45  ;;  %v3241_v43 = vmul.f32 %v3237_v39, %v3137_v6 }
0x1614   : > { %v3240_v4 = vmul.f32 %v3236_v38, %v3136_v37 }
0x1615   : > { %v3242_v27 = vmul.f32 %v3238_v41, %v3138_v40 }
0x1616   : > { %3371 = vmatprep.mubr.f32.mxu1 %v3240_v4 }
0x1617   : > { %3372 = vmatmul.mubr.f32.vlgmr.msra.gmra.mxu1 %v3239_v42  ;;  %3441 = vmatprep.mubr.f32.mxu0 %v3242_v27 }
0x1618   : > { %3442 = vmatmul.mubr.f32.vlgmr.msra.gmra.mxu0 %v3241_v43 }
0x16d7   : > { %v3860_v3 = vpop.f32.mrf.mxu1 }
0x16d8   : > { %v3895_v60 = vpop.f32.mrf.mxu0 }
0x16d9   : > { %v3861_v7 = vpop.f32.mrf.mxu1 }
0x16da   : > { %v3862_v44 = vadd.f32 %v3861_v7, %v3860_v3  ;;  %v3896_v2 = vpop.f32.mrf.mxu0 }
0x16db   : > { %v3897_v46 = vadd.f32 %v3896_v2, %v3895_v60 }
0x16dd   : > { %v3444_v48 = vadd.f32 %v3897_v46, %v3862_v44 }
0x16df   : > { %v3447_v50 = vadd.f32 %v3444_v48, %v5452_v10 }
0x16e1   : > { %v3455_v51 = vadd.f32 %v3723_v61, %v3447_v50 }
0x16e3   : > { %3456 = vst [vmem:[%s874_s26] sm:$0xff] %v3455_v51 }
0x16e4   : > { %4666 = shalt.err (!%p4663_p12)
}
0x16e5   : > { %s4667_s3 = scalar_lea.hbm %s3469_s5, 128  ;;  %s4671_s19 = scalar_lea.hbm %s5645_s4, 256 }
0x16e6   : > { %p4668_p1 = scmp.ne.s32.totalorder %s3469_s5, %s4667_s3  ;;  %p4672_p8 = scmp.lt.s32.totalorder %s3469_s5, %s5645_s4 }
0x16e7   : > { %p4673_p4 = scmp.lt.s32.totalorder %s4671_s19, %s4667_s3 }
0x16e8   : > { %p4669_p0 = pnand %p4668_p1, %p5646_p7 }
0x16e9   : > { %p4674_p3 = por %p4673_p4, %p4672_p8 }
0x16ea   : > { %p4670_p2 = pneg %p4669_p0 }
0x16ec   : > { %p4675_p5 = pnand %p4674_p3, %p4670_p2 }
0x16ee   : > { %4678 = shalt.err (!%p4675_p5)
}
0x16ef   : > { %4162 = dma.vmem_to_hbm [thread:$0]  (%p5646_p7), %s3472_s18, 128, %s3469_s5, %s3458_s2  }
0x16f0 PF: > { %s5647_s29 = sld [smem:[#allocation32_spill]]  ;;  %p5650_p13 = scmp.ge.s32.totalorder %s4745_s30, 2 }
0x16f1   : > { %s5648_s24 = sld [smem:[#allocation36_spill]] }
0x16f6   : > { %s3483_s26 = sand.u32 1, %s5647_s29  }
0x16f7   : > { %p5649_p6 = scmp.ne.s32.totalorder %s5648_s24, 0  ;;  %s3484_s14 = scalar_lea.sflag [#allocation4], %s3483_s26 }
0x16f9   : > { %p4203_p9 = pnand %p5650_p13, %p5649_p6 }
0x16fb   : > { %p4204_p10 = pneg %p4203_p9 }
0x16fd   : > { %4728 = dma.done.wait (%p4204_p10), %s3484_s14, 128  }
0x16fe   : > { %4730 = vsyncadd (%p4204_p10), %s3484_s14, 4294967168  ;;  %s5651_s30 = sld [smem:[#allocation34_spill]]  ;;  %s5654_s3 = smov %s4737_s28 }
0x16ff   : > { %s5652_s1 = sld [smem:[#allocation33_spill]] }
0x1700   : > { %s5653_s29 = sld [smem:[#allocation35_spill]] }
0x1704   : > { %p43_p11 = scmp.ge.s32.totalorder %s5651_s30, 4  }
0x1705   : > { %s5655_s28 = smov %s5652_s1 }
0x1706   :  { %45 = sbr.rel (!%p43_p11) target bundleno = 29 (0x1d), region = 206 }
0x170b   :  { %3489 = vsyncpa [#allocation3], 1 }
0x170c   :  { %3491 = vsyncpa [#allocation3 + $0x1], 1 }
0x170d   :  { %3492 = vsyncpa [#allocation6], 1 }
0x170e   :  { %3494 = vsyncpa [#allocation6 + $0x1], 1 }
0x170f   :  { %3495 = vsyncpa [#allocation9], 1 }
0x1710   :  { %3496 = vsyncpa [#allocation12], 1 }
0x1711   :  { %3497 = vsyncpa [#allocation15], 1 }
0x1712   :  { %3498 = vsyncpa [#allocation18], 1 }
0x1713   :  { %3499 = vsyncpa [#allocation21], 1 }
0x1714   :  { %3500 = vsyncpa [#allocation4], 1 }
0x1715   :  { %3502 = vsyncpa [#allocation4 + $0x1], 1 }

</bundles_post_ra>
